<compile_context>
chip_gen: v7x
topology: tpu7x:2x2x1
jax: 0.10.0
libtpu: 0.0.40
codegen_flags: <defaults>
</compile_context>

<pallas_src>
import jax
import jax.numpy as jnp
from jax.experimental import pallas as pl
from jax.experimental.pallas import tpu as pltpu


C_PAD = 128          # lane-padded channel width used everywhere
FC1_IN = 16 * C_PAD  # flattened conv2 output fed to fc1 (padded layout)


def _round_up(x, m):
    return (x + m - 1) // m * m


# ----------------------------------------------------------------------------
# Pallas kernels
# ----------------------------------------------------------------------------
def _conv_pool_relu_kernel(p_ref, w_ref, b_ref, o_ref):
    """Conv (as im2col matmul) + fused 2x2 max-pool + ReLU for a batch block.

    p_ref: (B, 4, R, K) bf16  -- 4 = the 2x2 pool sub-positions
    w_ref: (K, 128) bf16, b_ref: (1, 128) f32
    o_ref: (B, R, 128) bf16   -- lane-dense output
    """
    bb, npool, r, k = p_ref.shape
    w = w_ref[...]
    m = None
    # One matmul per pool sub-position; running max keeps the f32 intermediate
    # at (B*R, 128) instead of (B*4R, 128).
    for off in range(npool):
        p = p_ref[:, off, :, :].reshape(bb * r, k)           # bf16
        h = jnp.dot(p, w, preferred_element_type=jnp.float32)
        m = h if m is None else jnp.maximum(m, h)
    m = m.reshape(bb, r, C_PAD) + b_ref[...]                 # bias after max (const/channel)
    o_ref[...] = jnp.maximum(m, 0.0).astype(o_ref.dtype)     # ReLU


def _mlp_logsoftmax_kernel(x_ref, w1_ref, b1_ref, w2_ref, b2_ref, o_ref):
    """fc1 + ReLU + fc2 + log_softmax for a batch block.

    x_ref: (B, 2048) bf16 (flattened padded conv2 output; NCHW flatten is
           pre-folded into w1), w1: (2048, 128) bf16, w2: (128, 128) bf16,
    b1: (1, 128) f32, b2: (1, 128) f32 (-1e30 in the 118 padded logit lanes),
    o_ref: (B, 128) f32.
    """
    x = x_ref[...]
    h = jnp.dot(x, w1_ref[...], preferred_element_type=jnp.float32) + b1_ref[...]
    h = jnp.maximum(h, 0.0)
    logits = jnp.dot(h.astype(jnp.bfloat16), w2_ref[...],
                     preferred_element_type=jnp.float32) + b2_ref[...]
    m = jnp.max(logits, axis=-1, keepdims=True)
    z = logits - m
    lse = jnp.log(jnp.sum(jnp.exp(z), axis=-1, keepdims=True))
    o_ref[...] = (z - lse).astype(o_ref.dtype)


# ----------------------------------------------------------------------------
# pallas_call wrappers
# ----------------------------------------------------------------------------
def conv_pool_relu(patches, w, b, *, block_b):
    n, npool, r, k = patches.shape
    return pl.pallas_call(
        _conv_pool_relu_kernel,
        out_shape=jax.ShapeDtypeStruct((n, r, C_PAD), jnp.bfloat16),
        grid=(n // block_b,),
        in_specs=[
            pl.BlockSpec((block_b, npool, r, k), lambda i: (i, 0, 0, 0)),
            pl.BlockSpec((k, C_PAD), lambda i: (0, 0)),
            pl.BlockSpec((1, C_PAD), lambda i: (0, 0)),
        ],
        out_specs=pl.BlockSpec((block_b, r, C_PAD), lambda i: (i, 0, 0)),
        compiler_params=pltpu.CompilerParams(dimension_semantics=("parallel",)),
    )(patches, w, b)


def mlp_logsoftmax(x, w1, b1, w2, b2, *, block_b):
    n, kin = x.shape
    return pl.pallas_call(
        _mlp_logsoftmax_kernel,
        out_shape=jax.ShapeDtypeStruct((n, C_PAD), jnp.float32),
        grid=(n // block_b,),
        in_specs=[
            pl.BlockSpec((block_b, kin), lambda i: (i, 0)),
            pl.BlockSpec((kin, C_PAD), lambda i: (0, 0)),
            pl.BlockSpec((1, C_PAD), lambda i: (0, 0)),
            pl.BlockSpec((C_PAD, C_PAD), lambda i: (0, 0)),
            pl.BlockSpec((1, C_PAD), lambda i: (0, 0)),
        ],
        out_specs=pl.BlockSpec((block_b, C_PAD), lambda i: (i, 0)),
        compiler_params=pltpu.CompilerParams(dimension_semantics=("parallel",)),
    )(x, w1, b1, w2, b2)


# ----------------------------------------------------------------------------
# Plain-JAX glue: im2col with the 4 pool sub-positions as a separate axis
# ----------------------------------------------------------------------------
def extract_pool_patches(x_nhwc, ksize, out_h, out_w):
    """x_nhwc: (N, H, W, C) -> (N, 4, out_h*out_w, ksize*ksize*C).
    Axis 1 holds pool offsets (0,0),(0,1),(1,0),(1,1); patch elements are
    ordered (kh, kw, cin)."""
    n = x_nhwc.shape[0]
    c = x_nhwc.shape[3]
    blocks = []
    for dy in (0, 1):
        for dx in (0, 1):
            taps = []
            for kh in range(ksize):
                for kw in range(ksize):
                    r0, c0 = dy + kh, dx + kw
                    taps.append(x_nhwc[:, r0:r0 + 2 * out_h:2,
                                       c0:c0 + 2 * out_w:2, :])
            patch = jnp.stack(taps, axis=3)                   # (N, oh, ow, k*k, C)
            blocks.append(patch.reshape(n, out_h * out_w, ksize * ksize * c))
    return jnp.stack(blocks, axis=1)                          # (N, 4, R, K)


# ----------------------------------------------------------------------------
# Parameters (PyTorch layouts) and trace-time repacking (pad + fold + bf16)
# ----------------------------------------------------------------------------
def init_params(key):
    ks = jax.random.split(key, 8)

    def u(k, shape, fan_in):
        bound = 1.0 / jnp.sqrt(float(fan_in))
        return jax.random.uniform(k, shape, jnp.float32, -bound, bound)

    return {
        "conv1_w": u(ks[0], (10, 1, 5, 5), 1 * 5 * 5),
        "conv1_b": u(ks[1], (10,), 1 * 5 * 5),
        "conv2_w": u(ks[2], (20, 10, 5, 5), 10 * 5 * 5),
        "conv2_b": u(ks[3], (20,), 10 * 5 * 5),
        "fc1_w": u(ks[4], (50, 320), 320),   # PyTorch layout (out, in)
        "fc1_b": u(ks[5], (50,), 320),
        "fc2_w": u(ks[6], (10, 50), 50),
        "fc2_b": u(ks[7], (10,), 50),
    }


def prepare_params(params):
    f32, bf16 = jnp.float32, jnp.bfloat16
    # conv1: (10,1,5,5) -> im2col weight (25,10) -> pad (32,128)
    w1 = jnp.transpose(params["conv1_w"], (2, 3, 1, 0)).reshape(25, 10)
    w1 = jnp.pad(w1, ((0, 7), (0, C_PAD - 10))).astype(bf16)
    b1 = jnp.pad(params["conv1_b"], (0, C_PAD - 10)).reshape(1, C_PAD).astype(f32)
    # conv2: (20,10,5,5) -> (250,20) -> pad (256,128)
    w2 = jnp.transpose(params["conv2_w"], (2, 3, 1, 0)).reshape(250, 20)
    w2 = jnp.pad(w2, ((0, 6), (0, C_PAD - 20))).astype(bf16)
    b2 = jnp.pad(params["conv2_b"], (0, C_PAD - 20)).reshape(1, C_PAD).astype(f32)
    # fc1 (50,320): PyTorch flatten index = c*16 + s (NCHW). Our conv2 output is
    # (N, 16, 128) NHWC-padded, flattened as s*128 + c -> permute+pad the weight.
    wf1 = params["fc1_w"].reshape(50, 20, 16)          # (f, c, s)
    wf1 = jnp.transpose(wf1, (2, 1, 0))                # (s, c, f)
    wf1 = jnp.pad(wf1, ((0, 0), (0, C_PAD - 20), (0, C_PAD - 50)))
    wf1 = wf1.reshape(FC1_IN, C_PAD).astype(bf16)
    bf1 = jnp.pad(params["fc1_b"], (0, C_PAD - 50)).reshape(1, C_PAD).astype(f32)
    # fc2 (10,50) -> (50,10) -> pad (128,128); padded logit lanes biased to -1e30
    wf2 = jnp.pad(params["fc2_w"].T, ((0, C_PAD - 50), (0, C_PAD - 10))).astype(bf16)
    bf2 = jnp.concatenate(
        [params["fc2_b"].astype(f32),
         jnp.full((C_PAD - 10,), -1e30, f32)]).reshape(1, C_PAD)
    return dict(w1=w1, b1=b1, w2=w2, b2=b2,
                fc1_w=wf1, fc1_b=bf1, fc2_w=wf2, fc2_b=bf2)


# ----------------------------------------------------------------------------
# Forward pass
# ----------------------------------------------------------------------------
def forward(x, params):
    n = x.shape[0]
    bb = min(_round_up(max(n, 1), 8), 32)      # images per grid step
    n_pad = _round_up(n, bb)
    x = jnp.pad(x, ((0, n_pad - n), (0, 0), (0, 0), (0, 0)))
    x_nhwc = jnp.transpose(x, (0, 2, 3, 1)).astype(jnp.float32)   # (Np, 28, 28, 1)

    prep = prepare_params(params)              # trace-time pad / permute / bf16

    # conv1(5x5, 1->10) + maxpool2 + relu
    p1 = extract_pool_patches(x_nhwc, 5, 12, 12)                  # (Np, 4, 144, 25)
    p1 = jnp.pad(p1, ((0, 0), (0, 0), (0, 0), (0, 7))).astype(jnp.bfloat16)
    a1 = conv_pool_relu(p1, prep["w1"], prep["b1"], block_b=bb)   # (Np, 144, 128) bf16

    # conv2(5x5, 10->20) + Dropout2d(identity, eval) + maxpool2 + relu
    a1_nhwc = a1[:, :, :10].reshape(n_pad, 12, 12, 10)
    p2 = extract_pool_patches(a1_nhwc, 5, 4, 4)                   # (Np, 4, 16, 250)
    p2 = jnp.pad(p2, ((0, 0), (0, 0), (0, 0), (0, 6))).astype(jnp.bfloat16)
    a2 = conv_pool_relu(p2, prep["w2"], prep["b2"], block_b=bb)   # (Np, 16, 128) bf16

    # fc1 + relu (+ dropout identity) + fc2 + log_softmax; the NCHW flatten is
    # folded into fc1's weights, so a plain reshape feeds the MLP kernel.
    flat = a2.reshape(n_pad, FC1_IN)                              # (Np, 2048)
    out = mlp_logsoftmax(flat, prep["fc1_w"], prep["fc1_b"],
                         prep["fc2_w"], prep["fc2_b"], block_b=bb)  # (Np, 128)
    return out[:n, :10]


if __name__ == "__main__":
    root = jax.random.PRNGKey(0)
    kx, kp = jax.random.split(root)
    x = jax.random.normal(kx, (2, 1, 28, 28), jnp.float32)        # MNIST-shaped NCHW
    params = init_params(kp)

    out = jax.jit(forward)(x, params)
    out = jax.block_until_ready(out)

    assert out.shape == (2, 10), out.shape
    # log_softmax sanity: exp of each row sums to 1
    assert jnp.allclose(jnp.exp(out).sum(axis=-1), 1.0, atol=1e-3)
    print("KERNEL_OK")
</pallas_src>

<mosaic_0001>
module attributes {stable_mosaic.version = 11 : i64} {
  func.func @_conv_pool_relu_kernel(%arg0: i32, %arg1: memref<8x4x144x32xbf16, #tpu.memory_space<vmem>>, %arg2: memref<32x128xbf16, #tpu.memory_space<vmem>>, %arg3: memref<1x128xf32, #tpu.memory_space<vmem>>, %arg4: memref<8x144x128xbf16, #tpu.memory_space<vmem>>) attributes {dimension_semantics = [#tpu.dimension_semantics<parallel>], iteration_bounds = array<i64: 1>, scalar_prefetch = 0 : i64, scratch_operands = 0 : i64, tpu.core_type = #tpu.core_type<tc>, window_params = [{transform_indices = @transform_0, window_bounds = array<i64: 8, 4, 144, 32>}, {pipeline_mode = #tpu.pipeline_mode<synchronous>, transform_indices = @transform_1, window_bounds = array<i64: 32, 128>}, {pipeline_mode = #tpu.pipeline_mode<synchronous>, transform_indices = @transform_2, window_bounds = array<i64: 1, 128>}, {transform_indices = @transform_3, window_bounds = array<i64: 8, 144, 128>}]} {
    %c0 = arith.constant 0 : index
    %c0_0 = arith.constant 0 : index
    %0 = vector.load %arg2[%c0, %c0_0] : memref<32x128xbf16, #tpu.memory_space<vmem>>, vector<32x128xbf16>
    %c0_1 = arith.constant 0 : index
    %c0_2 = arith.constant 0 : index
    %c0_3 = arith.constant 0 : index
    %c0_4 = arith.constant 0 : index
    %1 = vector.load %arg1[%c0_1, %c0_2, %c0_3, %c0_4] : memref<8x4x144x32xbf16, #tpu.memory_space<vmem>>, vector<8x1x144x32xbf16>
    %2 = vector.shape_cast %1 : vector<8x1x144x32xbf16> to vector<8x144x32xbf16>
    %3 = vector.shape_cast %2 : vector<8x144x32xbf16> to vector<1152x32xbf16>
    %cst = arith.constant dense<0.000000e+00> : vector<1152x128xf32>
    %4 = tpu.matmul %3, %0, %cst {dimension_numbers = #tpu.dot_dimension_numbers<[1], [0], [0], [1], [0, 0, 1, 1], [], []>} : vector<1152x32xbf16>, vector<32x128xbf16>, vector<1152x128xf32> -> vector<1152x128xf32>
    %c0_5 = arith.constant 0 : index
    %c1 = arith.constant 1 : index
    %c0_6 = arith.constant 0 : index
    %c0_7 = arith.constant 0 : index
    %5 = vector.load %arg1[%c0_5, %c1, %c0_6, %c0_7] : memref<8x4x144x32xbf16, #tpu.memory_space<vmem>>, vector<8x1x144x32xbf16>
    %6 = vector.shape_cast %5 : vector<8x1x144x32xbf16> to vector<8x144x32xbf16>
    %7 = vector.shape_cast %6 : vector<8x144x32xbf16> to vector<1152x32xbf16>
    %cst_8 = arith.constant dense<0.000000e+00> : vector<1152x128xf32>
    %8 = tpu.matmul %7, %0, %cst_8 {dimension_numbers = #tpu.dot_dimension_numbers<[1], [0], [0], [1], [0, 0, 1, 1], [], []>} : vector<1152x32xbf16>, vector<32x128xbf16>, vector<1152x128xf32> -> vector<1152x128xf32>
    %9 = arith.maximumf %4, %8 : vector<1152x128xf32>
    %c0_9 = arith.constant 0 : index
    %c2 = arith.constant 2 : index
    %c0_10 = arith.constant 0 : index
    %c0_11 = arith.constant 0 : index
    %10 = vector.load %arg1[%c0_9, %c2, %c0_10, %c0_11] : memref<8x4x144x32xbf16, #tpu.memory_space<vmem>>, vector<8x1x144x32xbf16>
    %11 = vector.shape_cast %10 : vector<8x1x144x32xbf16> to vector<8x144x32xbf16>
    %12 = vector.shape_cast %11 : vector<8x144x32xbf16> to vector<1152x32xbf16>
    %cst_12 = arith.constant dense<0.000000e+00> : vector<1152x128xf32>
    %13 = tpu.matmul %12, %0, %cst_12 {dimension_numbers = #tpu.dot_dimension_numbers<[1], [0], [0], [1], [0, 0, 1, 1], [], []>} : vector<1152x32xbf16>, vector<32x128xbf16>, vector<1152x128xf32> -> vector<1152x128xf32>
    %14 = arith.maximumf %9, %13 : vector<1152x128xf32>
    %c0_13 = arith.constant 0 : index
    %c3 = arith.constant 3 : index
    %c0_14 = arith.constant 0 : index
    %c0_15 = arith.constant 0 : index
    %15 = vector.load %arg1[%c0_13, %c3, %c0_14, %c0_15] : memref<8x4x144x32xbf16, #tpu.memory_space<vmem>>, vector<8x1x144x32xbf16>
    %16 = vector.shape_cast %15 : vector<8x1x144x32xbf16> to vector<8x144x32xbf16>
    %17 = vector.shape_cast %16 : vector<8x144x32xbf16> to vector<1152x32xbf16>
    %cst_16 = arith.constant dense<0.000000e+00> : vector<1152x128xf32>
    %18 = tpu.matmul %17, %0, %cst_16 {dimension_numbers = #tpu.dot_dimension_numbers<[1], [0], [0], [1], [0, 0, 1, 1], [], []>} : vector<1152x32xbf16>, vector<32x128xbf16>, vector<1152x128xf32> -> vector<1152x128xf32>
    %19 = arith.maximumf %14, %18 : vector<1152x128xf32>
    %20 = vector.shape_cast %19 : vector<1152x128xf32> to vector<8x144x128xf32>
    %c0_17 = arith.constant 0 : index
    %c0_18 = arith.constant 0 : index
    %21 = vector.load %arg3[%c0_17, %c0_18] : memref<1x128xf32, #tpu.memory_space<vmem>>, vector<1x128xf32>
    %22 = vector.shape_cast %21 : vector<1x128xf32> to vector<1x1x128xf32>
    %23 = vector.broadcast %22 : vector<1x1x128xf32> to vector<8x144x128xf32>
    %24 = arith.addf %20, %23 : vector<8x144x128xf32>
    %cst_19 = arith.constant 0.000000e+00 : f32
    %25 = vector.broadcast %cst_19 : f32 to vector<8x144x128xf32>
    %26 = arith.maximumf %24, %25 : vector<8x144x128xf32>
    %27 = arith.truncf %26 : vector<8x144x128xf32> to vector<8x144x128xbf16>
    %c0_20 = arith.constant 0 : index
    %c0_21 = arith.constant 0 : index
    %c0_22 = arith.constant 0 : index
    %28 = vector.load %arg4[%c0_20, %c0_21, %c0_22] : memref<8x144x128xbf16, #tpu.memory_space<vmem>>, vector<8x144x128xbf16>
    tpu.vector_store %arg4[%c0_20, %c0_21, %c0_22], %27 {strides = array<i32>} : memref<8x144x128xbf16, #tpu.memory_space<vmem>>, vector<8x144x128xbf16>,
    return
  }
  func.func @transform_0(%arg0: i32) -> (i32, i32, i32, i32) {
    %c0_i32 = arith.constant 0 : i32
    %c0_i32_0 = arith.constant 0 : i32
    %c0_i32_1 = arith.constant 0 : i32
    %c0_i32_2 = arith.constant 0 : i32
    return %arg0, %c0_i32, %c0_i32_0, %c0_i32_1 : i32, i32, i32, i32
  }
  func.func @transform_1(%arg0: i32) -> (i32, i32) {
    %c0_i32 = arith.constant 0 : i32
    %c0_i32_0 = arith.constant 0 : i32
    %c0_i32_1 = arith.constant 0 : i32
    return %c0_i32, %c0_i32_0 : i32, i32
  }
  func.func @transform_2(%arg0: i32) -> (i32, i32) {
    %c0_i32 = arith.constant 0 : i32
    %c0_i32_0 = arith.constant 0 : i32
    %c0_i32_1 = arith.constant 0 : i32
    return %c0_i32, %c0_i32_0 : i32, i32
  }
  func.func @transform_3(%arg0: i32) -> (i32, i32, i32) {
    %c0_i32 = arith.constant 0 : i32
    %c0_i32_0 = arith.constant 0 : i32
    %c0_i32_1 = arith.constant 0 : i32
    return %arg0, %c0_i32, %c0_i32_0 : i32, i32, i32
  }
}

module attributes {stable_mosaic.version = 11 : i64} {
  func.func @_conv_pool_relu_kernel(%arg0: i32, %arg1: memref<8x4x16x256xbf16, #tpu.memory_space<vmem>>, %arg2: memref<256x128xbf16, #tpu.memory_space<vmem>>, %arg3: memref<1x128xf32, #tpu.memory_space<vmem>>, %arg4: memref<8x16x128xbf16, #tpu.memory_space<vmem>>) attributes {dimension_semantics = [#tpu.dimension_semantics<parallel>], iteration_bounds = array<i64: 1>, scalar_prefetch = 0 : i64, scratch_operands = 0 : i64, tpu.core_type = #tpu.core_type<tc>, window_params = [{transform_indices = @transform_0, window_bounds = array<i64: 8, 4, 16, 256>}, {pipeline_mode = #tpu.pipeline_mode<synchronous>, transform_indices = @transform_1, window_bounds = array<i64: 256, 128>}, {pipeline_mode = #tpu.pipeline_mode<synchronous>, transform_indices = @transform_2, window_bounds = array<i64: 1, 128>}, {transform_indices = @transform_3, window_bounds = array<i64: 8, 16, 128>}]} {
    %c0 = arith.constant 0 : index
    %c0_0 = arith.constant 0 : index
    %0 = vector.load %arg2[%c0, %c0_0] : memref<256x128xbf16, #tpu.memory_space<vmem>>, vector<256x128xbf16>
    %c0_1 = arith.constant 0 : index
    %c0_2 = arith.constant 0 : index
    %c0_3 = arith.constant 0 : index
    %c0_4 = arith.constant 0 : index
    %1 = vector.load %arg1[%c0_1, %c0_2, %c0_3, %c0_4] : memref<8x4x16x256xbf16, #tpu.memory_space<vmem>>, vector<8x1x16x256xbf16>
    %2 = vector.shape_cast %1 : vector<8x1x16x256xbf16> to vector<8x16x256xbf16>
    %3 = vector.shape_cast %2 : vector<8x16x256xbf16> to vector<128x256xbf16>
    %cst = arith.constant dense<0.000000e+00> : vector<128x128xf32>
    %4 = tpu.matmul %3, %0, %cst {dimension_numbers = #tpu.dot_dimension_numbers<[1], [0], [0], [1], [0, 0, 1, 1], [], []>} : vector<128x256xbf16>, vector<256x128xbf16>, vector<128x128xf32> -> vector<128x128xf32>
    %c0_5 = arith.constant 0 : index
    %c1 = arith.constant 1 : index
    %c0_6 = arith.constant 0 : index
    %c0_7 = arith.constant 0 : index
    %5 = vector.load %arg1[%c0_5, %c1, %c0_6, %c0_7] : memref<8x4x16x256xbf16, #tpu.memory_space<vmem>>, vector<8x1x16x256xbf16>
    %6 = vector.shape_cast %5 : vector<8x1x16x256xbf16> to vector<8x16x256xbf16>
    %7 = vector.shape_cast %6 : vector<8x16x256xbf16> to vector<128x256xbf16>
    %cst_8 = arith.constant dense<0.000000e+00> : vector<128x128xf32>
    %8 = tpu.matmul %7, %0, %cst_8 {dimension_numbers = #tpu.dot_dimension_numbers<[1], [0], [0], [1], [0, 0, 1, 1], [], []>} : vector<128x256xbf16>, vector<256x128xbf16>, vector<128x128xf32> -> vector<128x128xf32>
    %9 = arith.maximumf %4, %8 : vector<128x128xf32>
    %c0_9 = arith.constant 0 : index
    %c2 = arith.constant 2 : index
    %c0_10 = arith.constant 0 : index
    %c0_11 = arith.constant 0 : index
    %10 = vector.load %arg1[%c0_9, %c2, %c0_10, %c0_11] : memref<8x4x16x256xbf16, #tpu.memory_space<vmem>>, vector<8x1x16x256xbf16>
    %11 = vector.shape_cast %10 : vector<8x1x16x256xbf16> to vector<8x16x256xbf16>
    %12 = vector.shape_cast %11 : vector<8x16x256xbf16> to vector<128x256xbf16>
    %cst_12 = arith.constant dense<0.000000e+00> : vector<128x128xf32>
    %13 = tpu.matmul %12, %0, %cst_12 {dimension_numbers = #tpu.dot_dimension_numbers<[1], [0], [0], [1], [0, 0, 1, 1], [], []>} : vector<128x256xbf16>, vector<256x128xbf16>, vector<128x128xf32> -> vector<128x128xf32>
    %14 = arith.maximumf %9, %13 : vector<128x128xf32>
    %c0_13 = arith.constant 0 : index
    %c3 = arith.constant 3 : index
    %c0_14 = arith.constant 0 : index
    %c0_15 = arith.constant 0 : index
    %15 = vector.load %arg1[%c0_13, %c3, %c0_14, %c0_15] : memref<8x4x16x256xbf16, #tpu.memory_space<vmem>>, vector<8x1x16x256xbf16>
    %16 = vector.shape_cast %15 : vector<8x1x16x256xbf16> to vector<8x16x256xbf16>
    %17 = vector.shape_cast %16 : vector<8x16x256xbf16> to vector<128x256xbf16>
    %cst_16 = arith.constant dense<0.000000e+00> : vector<128x128xf32>
    %18 = tpu.matmul %17, %0, %cst_16 {dimension_numbers = #tpu.dot_dimension_numbers<[1], [0], [0], [1], [0, 0, 1, 1], [], []>} : vector<128x256xbf16>, vector<256x128xbf16>, vector<128x128xf32> -> vector<128x128xf32>
    %19 = arith.maximumf %14, %18 : vector<128x128xf32>
    %20 = vector.shape_cast %19 : vector<128x128xf32> to vector<8x16x128xf32>
    %c0_17 = arith.constant 0 : index
    %c0_18 = arith.constant 0 : index
    %21 = vector.load %arg3[%c0_17, %c0_18] : memref<1x128xf32, #tpu.memory_space<vmem>>, vector<1x128xf32>
    %22 = vector.shape_cast %21 : vector<1x128xf32> to vector<1x1x128xf32>
    %23 = vector.broadcast %22 : vector<1x1x128xf32> to vector<8x16x128xf32>
    %24 = arith.addf %20, %23 : vector<8x16x128xf32>
    %cst_19 = arith.constant 0.000000e+00 : f32
    %25 = vector.broadcast %cst_19 : f32 to vector<8x16x128xf32>
    %26 = arith.maximumf %24, %25 : vector<8x16x128xf32>
    %27 = arith.truncf %26 : vector<8x16x128xf32> to vector<8x16x128xbf16>
    %c0_20 = arith.constant 0 : index
    %c0_21 = arith.constant 0 : index
    %c0_22 = arith.constant 0 : index
    %28 = vector.load %arg4[%c0_20, %c0_21, %c0_22] : memref<8x16x128xbf16, #tpu.memory_space<vmem>>, vector<8x16x128xbf16>
    tpu.vector_store %arg4[%c0_20, %c0_21, %c0_22], %27 {strides = array<i32>} : memref<8x16x128xbf16, #tpu.memory_space<vmem>>, vector<8x16x128xbf16>,
    return
  }
  func.func @transform_0(%arg0: i32) -> (i32, i32, i32, i32) {
    %c0_i32 = arith.constant 0 : i32
    %c0_i32_0 = arith.constant 0 : i32
    %c0_i32_1 = arith.constant 0 : i32
    %c0_i32_2 = arith.constant 0 : i32
    return %arg0, %c0_i32, %c0_i32_0, %c0_i32_1 : i32, i32, i32, i32
  }
  func.func @transform_1(%arg0: i32) -> (i32, i32) {
    %c0_i32 = arith.constant 0 : i32
    %c0_i32_0 = arith.constant 0 : i32
    %c0_i32_1 = arith.constant 0 : i32
    return %c0_i32, %c0_i32_0 : i32, i32
  }
  func.func @transform_2(%arg0: i32) -> (i32, i32) {
    %c0_i32 = arith.constant 0 : i32
    %c0_i32_0 = arith.constant 0 : i32
    %c0_i32_1 = arith.constant 0 : i32
    return %c0_i32, %c0_i32_0 : i32, i32
  }
  func.func @transform_3(%arg0: i32) -> (i32, i32, i32) {
    %c0_i32 = arith.constant 0 : i32
    %c0_i32_0 = arith.constant 0 : i32
    %c0_i32_1 = arith.constant 0 : i32
    return %arg0, %c0_i32, %c0_i32_0 : i32, i32, i32
  }
}

module attributes {stable_mosaic.version = 11 : i64} {
  func.func @_mlp_logsoftmax_kernel(%arg0: i32, %arg1: memref<8x2048xbf16, #tpu.memory_space<vmem>>, %arg2: memref<2048x128xbf16, #tpu.memory_space<vmem>>, %arg3: memref<1x128xf32, #tpu.memory_space<vmem>>, %arg4: memref<128x128xbf16, #tpu.memory_space<vmem>>, %arg5: memref<1x128xf32, #tpu.memory_space<vmem>>, %arg6: memref<8x128xf32, #tpu.memory_space<vmem>>) attributes {dimension_semantics = [#tpu.dimension_semantics<parallel>], iteration_bounds = array<i64: 1>, scalar_prefetch = 0 : i64, scratch_operands = 0 : i64, tpu.core_type = #tpu.core_type<tc>, window_params = [{transform_indices = @transform_0, window_bounds = array<i64: 8, 2048>}, {pipeline_mode = #tpu.pipeline_mode<synchronous>, transform_indices = @transform_1, window_bounds = array<i64: 2048, 128>}, {pipeline_mode = #tpu.pipeline_mode<synchronous>, transform_indices = @transform_2, window_bounds = array<i64: 1, 128>}, {pipeline_mode = #tpu.pipeline_mode<synchronous>, transform_indices = @transform_3, window_bounds = array<i64: 128, 128>}, {pipeline_mode = #tpu.pipeline_mode<synchronous>, transform_indices = @transform_4, window_bounds = array<i64: 1, 128>}, {transform_indices = @transform_5, window_bounds = array<i64: 8, 128>}]} {
    %c0 = arith.constant 0 : index
    %c0_0 = arith.constant 0 : index
    %0 = vector.load %arg1[%c0, %c0_0] : memref<8x2048xbf16, #tpu.memory_space<vmem>>, vector<8x2048xbf16>
    %c0_1 = arith.constant 0 : index
    %c0_2 = arith.constant 0 : index
    %1 = vector.load %arg2[%c0_1, %c0_2] : memref<2048x128xbf16, #tpu.memory_space<vmem>>, vector<2048x128xbf16>
    %cst = arith.constant dense<0.000000e+00> : vector<8x128xf32>
    %2 = tpu.matmul %0, %1, %cst {dimension_numbers = #tpu.dot_dimension_numbers<[1], [0], [0], [1], [0, 0, 1, 1], [], []>} : vector<8x2048xbf16>, vector<2048x128xbf16>, vector<8x128xf32> -> vector<8x128xf32>
    %c0_3 = arith.constant 0 : index
    %c0_4 = arith.constant 0 : index
    %3 = vector.load %arg3[%c0_3, %c0_4] : memref<1x128xf32, #tpu.memory_space<vmem>>, vector<1x128xf32>
    %4 = vector.broadcast %3 : vector<1x128xf32> to vector<8x128xf32>
    %5 = arith.addf %2, %4 : vector<8x128xf32>
    %cst_5 = arith.constant 0.000000e+00 : f32
    %6 = vector.broadcast %cst_5 : f32 to vector<8x128xf32>
    %7 = arith.maximumf %5, %6 : vector<8x128xf32>
    %8 = arith.truncf %7 : vector<8x128xf32> to vector<8x128xbf16>
    %c0_6 = arith.constant 0 : index
    %c0_7 = arith.constant 0 : index
    %9 = vector.load %arg4[%c0_6, %c0_7] : memref<128x128xbf16, #tpu.memory_space<vmem>>, vector<128x128xbf16>
    %cst_8 = arith.constant dense<0.000000e+00> : vector<8x128xf32>
    %10 = tpu.matmul %8, %9, %cst_8 {dimension_numbers = #tpu.dot_dimension_numbers<[1], [0], [0], [1], [0, 0, 1, 1], [], []>} : vector<8x128xbf16>, vector<128x128xbf16>, vector<8x128xf32> -> vector<8x128xf32>
    %c0_9 = arith.constant 0 : index
    %c0_10 = arith.constant 0 : index
    %11 = vector.load %arg5[%c0_9, %c0_10] : memref<1x128xf32, #tpu.memory_space<vmem>>, vector<1x128xf32>
    %12 = vector.broadcast %11 : vector<1x128xf32> to vector<8x128xf32>
    %13 = arith.addf %10, %12 : vector<8x128xf32>
    %cst_11 = arith.constant dense<0xFF800000> : vector<8xf32>
    %14 = vector.multi_reduction <maximumf>, %13, %cst_11 [1] : vector<8x128xf32> to vector<8xf32>
    %15 = vector.shape_cast %14 : vector<8xf32> to vector<8x1xf32>
    %16 = vector.broadcast %15 : vector<8x1xf32> to vector<8x128xf32>
    %17 = arith.subf %13, %16 : vector<8x128xf32>
    %18 = math.exp %17 : vector<8x128xf32>
    %cst_12 = arith.constant dense<0.000000e+00> : vector<8xf32>
    %19 = vector.multi_reduction <add>, %18, %cst_12 [1] : vector<8x128xf32> to vector<8xf32>
    %20 = vector.shape_cast %19 : vector<8xf32> to vector<8x1xf32>
    %21 = math.log %20 : vector<8x1xf32>
    %22 = vector.broadcast %21 : vector<8x1xf32> to vector<8x128xf32>
    %23 = arith.subf %17, %22 : vector<8x128xf32>
    %c0_13 = arith.constant 0 : index
    %c0_14 = arith.constant 0 : index
    %24 = vector.load %arg6[%c0_13, %c0_14] : memref<8x128xf32, #tpu.memory_space<vmem>>, vector<8x128xf32>
    tpu.vector_store %arg6[%c0_13, %c0_14], %23 {strides = array<i32>} : memref<8x128xf32, #tpu.memory_space<vmem>>, vector<8x128xf32>,
    return
  }
  func.func @transform_0(%arg0: i32) -> (i32, i32) {
    %c0_i32 = arith.constant 0 : i32
    %c0_i32_0 = arith.constant 0 : i32
    return %arg0, %c0_i32 : i32, i32
  }
  func.func @transform_1(%arg0: i32) -> (i32, i32) {
    %c0_i32 = arith.constant 0 : i32
    %c0_i32_0 = arith.constant 0 : i32
    %c0_i32_1 = arith.constant 0 : i32
    return %c0_i32, %c0_i32_0 : i32, i32
  }
  func.func @transform_2(%arg0: i32) -> (i32, i32) {
    %c0_i32 = arith.constant 0 : i32
    %c0_i32_0 = arith.constant 0 : i32
    %c0_i32_1 = arith.constant 0 : i32
    return %c0_i32, %c0_i32_0 : i32, i32
  }
  func.func @transform_3(%arg0: i32) -> (i32, i32) {
    %c0_i32 = arith.constant 0 : i32
    %c0_i32_0 = arith.constant 0 : i32
    %c0_i32_1 = arith.constant 0 : i32
    return %c0_i32, %c0_i32_0 : i32, i32
  }
  func.func @transform_4(%arg0: i32) -> (i32, i32) {
    %c0_i32 = arith.constant 0 : i32
    %c0_i32_0 = arith.constant 0 : i32
    %c0_i32_1 = arith.constant 0 : i32
    return %c0_i32, %c0_i32_0 : i32, i32
  }
  func.func @transform_5(%arg0: i32) -> (i32, i32) {
    %c0_i32 = arith.constant 0 : i32
    %c0_i32_0 = arith.constant 0 : i32
    return %arg0, %c0_i32 : i32, i32
  }
}

</mosaic_0001>

<bundles_post_ra>
// kernel: forward.3
= control target key start
LH: loop header
LB: loop body
LE: loop exit
PB: predicated region body
PF: predicated region fallthrough
CT: control target
= control target key end

     0   :  { %vm535_vm0 = vcmask 261120   ;;  %s12555_s1 = inlined_call_operand.vmem [shape: bf16[32,128], index: 1, kind: input, shape index: {}]   ;;  %s12556_s0 = inlined_call_operand.vmem [shape: bf16[8,4,144,32], index: 0, kind: input, shape index: {}]   ;;  %s12557_s2 = inlined_call_operand.vmem [shape: f32[1,128], index: 2, kind: input, shape index: {}]   ;;  %s12558_s3 = inlined_call_operand.vmem [shape: bf16[8,144,128], index: 3, kind: output, shape index: {}]  }
   0x1   :  { %v9420_v0 = vld [vmem:[%s12555_s1] sm:$0xff]   ;;  %v9421_v1 = vld [vmem:[%s12555_s1 + $0x8] sm:$0xff]   ;;  %v9425_v5 = vld [vmem:[%s12556_s0 + $0x50] sm:$0xff]  }
   0x2   :  { %8828 = vmatprep.subr.bf16.mxu0 %v9420_v0  ;;  %8976 = vmatprep.subr.bf16.mxu1 %v9420_v0  ;;  %v9422_v2 = vld [vmem:[%s12556_s0] sm:$0xff]   ;;  %v9423_v3 = vld [vmem:[%s12556_s0 + $0x48] sm:$0xff]   ;;  %v9426_v6 = vld [vmem:[%s12556_s0 + $0x10] sm:$0xff]  }
   0x3   :  { %8829 = vmatpush3.bf16.msra.mxu0 %v9420_v0  ;;  %8977 = vmatpush3.bf16.msra.mxu1 %v9420_v0  ;;  %v9424_v4 = vld [vmem:[%s12556_s0 + $0x8] sm:$0xff]   ;;  %v9427_v7 = vld [vmem:[%s12556_s0 + $0x58] sm:$0xff]   ;;  %v9429_v9 = vld [vmem:[%s12556_s0 + $0x60] sm:$0xff]  }
   0x4   :  { %8830 = vmatprep.subr.bf16.mxu0 %v9421_v1  ;;  %8978 = vmatprep.subr.bf16.mxu1 %v9421_v1  ;;  %v9428_v8 = vld [vmem:[%s12556_s0 + $0x18] sm:$0xff]   ;;  %v9430_v10 = vld [vmem:[%s12556_s0 + $0x20] sm:$0xff]   ;;  %v9431_v11 = vld [vmem:[%s12556_s0 + $0x68] sm:$0xff]  }
   0x5   :  { %8832 = vmatprep.mubr.msk.bf16.mxu0 %vm535_vm0, %v9422_v2  ;;  %8980 = vmatprep.mubr.msk.bf16.mxu1 %vm535_vm0, %v9423_v3  ;;  %v9432_v12 = vld [vmem:[%s12556_s0 + $0x28] sm:$0xff]   ;;  %v9433_v13 = vld [vmem:[%s12556_s0 + $0x70] sm:$0xff]   ;;  %v9435_v15 = vld [vmem:[%s12556_s0 + $0x78] sm:$0xff]  }
   0x6   :  { %v9434_v14 = vld [vmem:[%s12556_s0 + $0x30] sm:$0xff]   ;;  %v9436_v16 = vld [vmem:[%s12556_s0 + $0x38] sm:$0xff]   ;;  %v9437_v17 = vld [vmem:[%s12556_s0 + $0x80] sm:$0xff]  }
   0x7   :  { %8831 = vmatpush3.bf16.msra.mxu0 %v9421_v1  ;;  %8979 = vmatpush3.bf16.msra.mxu1 %v9421_v1  ;;  %v9438_v18 = vld [vmem:[%s12556_s0 + $0x40] sm:$0xff]   ;;  %v9439_v19 = vld [vmem:[%s12556_s0 + $0x88] sm:$0xff]   ;;  %v9443_v23 = vld [vmem:[%s12556_s0 + $0x170] sm:$0xff]  }
   0x8   :  { %9124 = vmatprep.subr.bf16.mxu0 %v9420_v0  ;;  %9272 = vmatprep.subr.bf16.mxu1 %v9420_v0  ;;  %v9440_v20 = vld [vmem:[%s12556_s0 + $0x120] sm:$0xff]   ;;  %v9441_v21 = vld [vmem:[%s12556_s0 + $0x168] sm:$0xff]   ;;  %v9444_v24 = vld [vmem:[%s12556_s0 + $0x130] sm:$0xff]  }
   0x9   :  { %v9442_v22 = vld [vmem:[%s12556_s0 + $0x128] sm:$0xff]   ;;  %v9445_v25 = vld [vmem:[%s12556_s0 + $0x178] sm:$0xff]   ;;  %v9447_v27 = vld [vmem:[%s12556_s0 + $0x180] sm:$0xff]  }
   0xa   :  { %8833 = vmatmul.mubr.msk.bf16.vlgmr.msra.gmra.mrb[0].mxu0 %vm535_vm0, %v9424_v4  ;;  %8981 = vmatmul.mubr.msk.bf16.vlgmr.msra.gmra.mrb[0].mxu1 %vm535_vm0, %v9425_v5  ;;  %v9446_v26 = vld [vmem:[%s12556_s0 + $0x138] sm:$0xff]   ;;  %v9448_v28 = vld [vmem:[%s12556_s0 + $0x140] sm:$0xff]   ;;  %v9449_v29 = vld [vmem:[%s12556_s0 + $0x188] sm:$0xff]  }
   0xb   :  { %9125 = vmatpush3.bf16.msra.mxu0 %v9420_v0  ;;  %9273 = vmatpush3.bf16.msra.mxu1 %v9420_v0  ;;  %v9450_v30 = vld [vmem:[%s12556_s0 + $0x148] sm:$0xff]   ;;  %v9451_v31 = vld [vmem:[%s12556_s0 + $0x190] sm:$0xff]   ;;  %v9453_v33 = vld [vmem:[%s12556_s0 + $0x198] sm:$0xff]  }
   0xc   :  { %8836 = vmatprep.mubr.msk.bf16.mxu0 %vm535_vm0, %v9426_v6  ;;  %8984 = vmatprep.mubr.msk.bf16.mxu1 %vm535_vm0, %v9427_v7  ;;  %v9452_v32 = vld [vmem:[%s12556_s0 + $0x150] sm:$0xff]   ;;  %v9454_v34 = vld [vmem:[%s12556_s0 + $0x158] sm:$0xff]   ;;  %v9455_v35 = vld [vmem:[%s12556_s0 + $0x1a0] sm:$0xff]  }
   0xd   :  { %9126 = vmatprep.subr.bf16.mxu0 %v9421_v1  ;;  %9274 = vmatprep.subr.bf16.mxu1 %v9421_v1  ;;  %v9456_v36 = vld [vmem:[%s12556_s0 + $0x160] sm:$0xff]   ;;  %v9457_v37 = vld [vmem:[%s12556_s0 + $0x1a8] sm:$0xff]   ;;  %v9461_v41 = vld [vmem:[%s12556_s0 + $0x290] sm:$0xff]  }
   0xe   :  { %v9458_v38 = vld [vmem:[%s12556_s0 + $0x240] sm:$0xff]   ;;  %v9459_v39 = vld [vmem:[%s12556_s0 + $0x288] sm:$0xff]   ;;  %v9462_v42 = vld [vmem:[%s12556_s0 + $0x250] sm:$0xff]  }
   0xf   :  { %9127 = vmatpush3.bf16.msra.mxu0 %v9421_v1  ;;  %9275 = vmatpush3.bf16.msra.mxu1 %v9421_v1  ;;  %v9460_v40 = vld [vmem:[%s12556_s0 + $0x248] sm:$0xff]   ;;  %v9463_v43 = vld [vmem:[%s12556_s0 + $0x298] sm:$0xff]   ;;  %v9465_v45 = vld [vmem:[%s12556_s0 + $0x2a0] sm:$0xff]  }
  0x10   :  { %v9464_v44 = vld [vmem:[%s12556_s0 + $0x258] sm:$0xff]   ;;  %v9466_v46 = vld [vmem:[%s12556_s0 + $0x260] sm:$0xff]   ;;  %v9467_v47 = vld [vmem:[%s12556_s0 + $0x2a8] sm:$0xff]  }
  0x11   :  { %v9468_v48 = vld [vmem:[%s12556_s0 + $0x268] sm:$0xff]   ;;  %v9469_v49 = vld [vmem:[%s12556_s0 + $0x2b0] sm:$0xff]   ;;  %v9471_v51 = vld [vmem:[%s12556_s0 + $0x2b8] sm:$0xff]  }
  0x12   :  { %8837 = vmatmul.mubr.msk.bf16.gmra.mrb[4].mxu0 %vm535_vm0, %v9428_v8  ;;  %8985 = vmatmul.mubr.msk.bf16.gmra.mrb[4].mxu1 %vm535_vm0, %v9429_v9  ;;  %v9470_v50 = vld [vmem:[%s12556_s0 + $0x270] sm:$0xff]   ;;  %v9472_v52 = vld [vmem:[%s12556_s0 + $0x278] sm:$0xff]   ;;  %v9473_v53 = vld [vmem:[%s12556_s0 + $0x2c0] sm:$0xff]  }
  0x13   :  { %8840 = vmatprep.mubr.msk.bf16.mxu0 %vm535_vm0, %v9430_v10  ;;  %8988 = vmatprep.mubr.msk.bf16.mxu1 %vm535_vm0, %v9431_v11  ;;  %v9474_v54 = vld [vmem:[%s12556_s0 + $0x280] sm:$0xff]   ;;  %v9475_v55 = vld [vmem:[%s12556_s0 + $0x2c8] sm:$0xff]   ;;  %v9479_v59 = vld [vmem:[%s12556_s0 + $0x3b0] sm:$0xff]  }
  0x14   :  { %v9476_v56 = vld [vmem:[%s12556_s0 + $0x360] sm:$0xff]   ;;  %v9477_v57 = vld [vmem:[%s12556_s0 + $0x3a8] sm:$0xff]   ;;  %v9480_v60 = vld [vmem:[%s12556_s0 + $0x370] sm:$0xff]  }
  0x15   :  { %v9478_v58 = vld [vmem:[%s12556_s0 + $0x368] sm:$0xff]   ;;  %v9481_v61 = vld [vmem:[%s12556_s0 + $0x3b8] sm:$0xff]   ;;  %v9483_v63 = vld [vmem:[%s12556_s0 + $0x3c0] sm:$0xff]  }
  0x16   :  { %v9482_v62 = vld [vmem:[%s12556_s0 + $0x378] sm:$0xff]   ;;  %v9484_v0 = vld [vmem:[%s12556_s0 + $0x380] sm:$0xff]   ;;  %v9485_v1 = vld [vmem:[%s12556_s0 + $0x3c8] sm:$0xff]  }
  0x17   :  { %v9486_v2 = vld [vmem:[%s12556_s0 + $0x388] sm:$0xff]   ;;  %v9487_v3 = vld [vmem:[%s12556_s0 + $0x3d0] sm:$0xff]   ;;  %v9489_v5 = vld [vmem:[%s12556_s0 + $0x3d8] sm:$0xff]  }
  0x18   :  { %v9488_v4 = vld [vmem:[%s12556_s0 + $0x390] sm:$0xff]   ;;  %v9490_v6 = vld [vmem:[%s12556_s0 + $0x398] sm:$0xff]   ;;  %v9491_v7 = vld [vmem:[%s12556_s0 + $0x3e0] sm:$0xff]  }
  0x19   :  { %v9492_v8 = vld [vmem:[%s12556_s0 + $0x3a0] sm:$0xff]   ;;  %v9493_v9 = vld [vmem:[%s12556_s0 + $0x3e8] sm:$0xff]  }
  0x1a   :  { %8841 = vmatmul.mubr.msk.bf16.gmra.mrb[8].mxu0 %vm535_vm0, %v9432_v12  ;;  %8989 = vmatmul.mubr.msk.bf16.gmra.mrb[8].mxu1 %vm535_vm0, %v9433_v13  ;;  %v9494_v10 = vld [vmem:[%s12556_s0 + $0x480] sm:$0xff]   ;;  %v9495_v11 = vld [vmem:[%s12556_s0 + $0x4c8] sm:$0xff]   ;;  %v9497_v13 = vld [vmem:[%s12556_s0 + $0x4d0] sm:$0xff]  }
  0x1b   :  { %8844 = vmatprep.mubr.msk.bf16.mxu0 %vm535_vm0, %v9434_v14  ;;  %8992 = vmatprep.mubr.msk.bf16.mxu1 %vm535_vm0, %v9435_v15  ;;  %v9496_v12 = vld [vmem:[%s12556_s0 + $0x488] sm:$0xff]   ;;  %v9498_v14 = vld [vmem:[%s12556_s0 + $0x490] sm:$0xff]   ;;  %v9499_v15 = vld [vmem:[%s12556_s0 + $0x4d8] sm:$0xff]  }
  0x22   :  { %8845 = vmatmul.mubr.msk.bf16.gmra.mrb[12].mxu0 %vm535_vm0, %v9436_v16  ;;  %8993 = vmatmul.mubr.msk.bf16.gmra.mrb[12].mxu1 %vm535_vm0, %v9437_v17  ;;  %v9500_v16 = vld [vmem:[%s12556_s0 + $0x498] sm:$0xff]   ;;  %v9501_v17 = vld [vmem:[%s12556_s0 + $0x4e0] sm:$0xff]  }
  0x23   :  { %8848 = vmatprep.mubr.msk.bf16.mxu0 %vm535_vm0, %v9438_v18  ;;  %8996 = vmatprep.mubr.msk.bf16.mxu1 %vm535_vm0, %v9439_v19  ;;  %v9502_v18 = vld [vmem:[%s12556_s0 + $0x4a0] sm:$0xff]   ;;  %v9503_v19 = vld [vmem:[%s12556_s0 + $0x4e8] sm:$0xff]  }
  0x2a   :  { %8849 = vmatmul.mubr.msk.bf16.gmra.mrb[16].mxu0 %vm535_vm0, %v9440_v20  ;;  %8997 = vmatmul.mubr.msk.bf16.gmra.mrb[16].mxu1 %vm535_vm0, %v9441_v21  ;;  %v9504_v20 = vld [vmem:[%s12556_s0 + $0x4a8] sm:$0xff]   ;;  %v9505_v21 = vld [vmem:[%s12556_s0 + $0x4f0] sm:$0xff]  }
  0x2b   :  { %8852 = vmatprep.mubr.msk.bf16.mxu0 %vm535_vm0, %v9442_v22  ;;  %9000 = vmatprep.mubr.msk.bf16.mxu1 %vm535_vm0, %v9443_v23  ;;  %v9506_v22 = vld [vmem:[%s12556_s0 + $0x4b0] sm:$0xff]   ;;  %v9507_v23 = vld [vmem:[%s12556_s0 + $0x4f8] sm:$0xff]  }
  0x32   :  { %8853 = vmatmul.mubr.msk.bf16.gmra.mrb[20].mxu0 %vm535_vm0, %v9444_v24  ;;  %9001 = vmatmul.mubr.msk.bf16.gmra.mrb[20].mxu1 %vm535_vm0, %v9445_v25  ;;  %v9508_v24 = vld [vmem:[%s12556_s0 + $0x4b8] sm:$0xff]   ;;  %v9509_v25 = vld [vmem:[%s12556_s0 + $0x500] sm:$0xff]  }
  0x33   :  { %8856 = vmatprep.mubr.msk.bf16.mxu0 %vm535_vm0, %v9446_v26  ;;  %9004 = vmatprep.mubr.msk.bf16.mxu1 %vm535_vm0, %v9447_v27  ;;  %v9510_v26 = vld [vmem:[%s12556_s0 + $0x4c0] sm:$0xff]   ;;  %v9511_v27 = vld [vmem:[%s12556_s0 + $0x508] sm:$0xff]  }
  0x3a   :  { %8857 = vmatmul.mubr.msk.bf16.gmra.mrb[24].mxu0 %vm535_vm0, %v9448_v28  ;;  %9005 = vmatmul.mubr.msk.bf16.gmra.mrb[24].mxu1 %vm535_vm0, %v9449_v29  ;;  %v9512_v28 = vld [vmem:[%s12556_s0 + $0x5a0] sm:$0xff]   ;;  %v9513_v29 = vld [vmem:[%s12556_s0 + $0x5e8] sm:$0xff]  }
  0x3b   :  { %8860 = vmatprep.mubr.msk.bf16.mxu0 %vm535_vm0, %v9450_v30  ;;  %9008 = vmatprep.mubr.msk.bf16.mxu1 %vm535_vm0, %v9451_v31  ;;  %v9514_v30 = vld [vmem:[%s12556_s0 + $0x5a8] sm:$0xff]   ;;  %v9515_v31 = vld [vmem:[%s12556_s0 + $0x5f0] sm:$0xff]  }
  0x42   :  { %8861 = vmatmul.mubr.msk.bf16.gmra.mrb[28].mxu0 %vm535_vm0, %v9452_v32  ;;  %9009 = vmatmul.mubr.msk.bf16.gmra.mrb[28].mxu1 %vm535_vm0, %v9453_v33  ;;  %v9516_v32 = vld [vmem:[%s12556_s0 + $0x5b0] sm:$0xff]   ;;  %v9517_v33 = vld [vmem:[%s12556_s0 + $0x5f8] sm:$0xff]  }
  0x43   :  { %8864 = vmatprep.mubr.msk.bf16.mxu0 %vm535_vm0, %v9454_v34  ;;  %9012 = vmatprep.mubr.msk.bf16.mxu1 %vm535_vm0, %v9455_v35  ;;  %v9518_v34 = vld [vmem:[%s12556_s0 + $0x5b8] sm:$0xff]   ;;  %v9519_v35 = vld [vmem:[%s12556_s0 + $0x600] sm:$0xff]  }
  0x4a   :  { %8865 = vmatmul.mubr.msk.bf16.gmra.mrb[32].mxu0 %vm535_vm0, %v9456_v36  ;;  %9013 = vmatmul.mubr.msk.bf16.gmra.mrb[32].mxu1 %vm535_vm0, %v9457_v37  ;;  %v9520_v36 = vld [vmem:[%s12556_s0 + $0x5c0] sm:$0xff]   ;;  %v9521_v37 = vld [vmem:[%s12556_s0 + $0x608] sm:$0xff]  }
  0x4b   :  { %8868 = vmatprep.mubr.msk.bf16.mxu0 %vm535_vm0, %v9458_v38  ;;  %9016 = vmatprep.mubr.msk.bf16.mxu1 %vm535_vm0, %v9459_v39  ;;  %v9522_v38 = vld [vmem:[%s12556_s0 + $0x5c8] sm:$0xff]   ;;  %v9523_v39 = vld [vmem:[%s12556_s0 + $0x610] sm:$0xff]  }
  0x52   :  { %8869 = vmatmul.mubr.msk.bf16.gmra.mrb[36].mxu0 %vm535_vm0, %v9460_v40  ;;  %9017 = vmatmul.mubr.msk.bf16.gmra.mrb[36].mxu1 %vm535_vm0, %v9461_v41  ;;  %v9524_v40 = vld [vmem:[%s12556_s0 + $0x5d0] sm:$0xff]   ;;  %v9525_v41 = vld [vmem:[%s12556_s0 + $0x618] sm:$0xff]  }
  0x53   :  { %8872 = vmatprep.mubr.msk.bf16.mxu0 %vm535_vm0, %v9462_v42  ;;  %9020 = vmatprep.mubr.msk.bf16.mxu1 %vm535_vm0, %v9463_v43  ;;  %v9526_v42 = vld [vmem:[%s12556_s0 + $0x5d8] sm:$0xff]   ;;  %v9527_v43 = vld [vmem:[%s12556_s0 + $0x620] sm:$0xff]  }
  0x5a   :  { %8873 = vmatmul.mubr.msk.bf16.gmra.mrb[40].mxu0 %vm535_vm0, %v9464_v44  ;;  %9021 = vmatmul.mubr.msk.bf16.gmra.mrb[40].mxu1 %vm535_vm0, %v9465_v45  ;;  %v9528_v44 = vld [vmem:[%s12556_s0 + $0x5e0] sm:$0xff]   ;;  %v9529_v45 = vld [vmem:[%s12556_s0 + $0x628] sm:$0xff]  }
  0x5b   :  { %8876 = vmatprep.mubr.msk.bf16.mxu0 %vm535_vm0, %v9466_v46  ;;  %9024 = vmatprep.mubr.msk.bf16.mxu1 %vm535_vm0, %v9467_v47  ;;  %v9530_v46 = vld [vmem:[%s12556_s0 + $0x6c0] sm:$0xff]   ;;  %v9531_v47 = vld [vmem:[%s12556_s0 + $0x708] sm:$0xff]  }
  0x62   :  { %8877 = vmatmul.mubr.msk.bf16.gmra.mrb[44].mxu0 %vm535_vm0, %v9468_v48  ;;  %9025 = vmatmul.mubr.msk.bf16.gmra.mrb[44].mxu1 %vm535_vm0, %v9469_v49  ;;  %v9532_v48 = vld [vmem:[%s12556_s0 + $0x6c8] sm:$0xff]   ;;  %v9533_v49 = vld [vmem:[%s12556_s0 + $0x710] sm:$0xff]  }
  0x63   :  { %8880 = vmatprep.mubr.msk.bf16.mxu0 %vm535_vm0, %v9470_v50  ;;  %9028 = vmatprep.mubr.msk.bf16.mxu1 %vm535_vm0, %v9471_v51 }
  0x6a   :  { %8881 = vmatmul.mubr.msk.bf16.gmra.mrb[48].mxu0 %vm535_vm0, %v9472_v52  ;;  %9029 = vmatmul.mubr.msk.bf16.gmra.mrb[48].mxu1 %vm535_vm0, %v9473_v53 }
  0x6b   :  { %8884 = vmatprep.mubr.msk.bf16.mxu0 %vm535_vm0, %v9474_v54  ;;  %9032 = vmatprep.mubr.msk.bf16.mxu1 %vm535_vm0, %v9475_v55 }
  0x72   :  { %8885 = vmatmul.mubr.msk.bf16.gmra.mrb[52].mxu0 %vm535_vm0, %v9476_v56  ;;  %9033 = vmatmul.mubr.msk.bf16.gmra.mrb[52].mxu1 %vm535_vm0, %v9477_v57  ;;  %v9534_v57 = vld [vmem:[%s12556_s0 + $0x6d0] sm:$0xff]  }
  0x73   :  { %8888 = vmatprep.mubr.msk.bf16.mxu0 %vm535_vm0, %v9478_v58  ;;  %9036 = vmatprep.mubr.msk.bf16.mxu1 %vm535_vm0, %v9479_v59  ;;  %v9535_v58 = vld [vmem:[%s12556_s0 + $0x718] sm:$0xff]   ;;  %v9560_v59 = vld [vmem:[%s12556_s0 + $0x810] sm:$0xff]  }
  0x7a   :  { %8889 = vmatmul.mubr.msk.bf16.gmra.mrb[56].mxu0 %vm535_vm0, %v9480_v60  ;;  %9037 = vmatmul.mubr.msk.bf16.gmra.mrb[56].mxu1 %vm535_vm0, %v9481_v61 }
  0x7b   :  { %8892 = vmatprep.mubr.msk.bf16.mxu0 %vm535_vm0, %v9482_v62  ;;  %9040 = vmatprep.mubr.msk.bf16.mxu1 %vm535_vm0, %v9483_v63 }
  0x82   :  { %8893 = vmatmul.mubr.msk.bf16.gmra.mrb[60].mxu0 %vm535_vm0, %v9484_v0  ;;  %9041 = vmatmul.mubr.msk.bf16.gmra.mrb[60].mxu1 %vm535_vm0, %v9485_v1  ;;  %v9536_v0 = vld [vmem:[%s12556_s0 + $0x6d8] sm:$0xff]   ;;  %v9537_v1 = vld [vmem:[%s12556_s0 + $0x720] sm:$0xff]  }
  0x83   :  { %8896 = vmatprep.mubr.msk.bf16.mxu0 %vm535_vm0, %v9486_v2  ;;  %9044 = vmatprep.mubr.msk.bf16.mxu1 %vm535_vm0, %v9487_v3 }
  0x8a   :  { %8897 = vmatmul.mubr.msk.bf16.gmra.mrb[64].mxu0 %vm535_vm0, %v9488_v4  ;;  %9045 = vmatmul.mubr.msk.bf16.gmra.mrb[64].mxu1 %vm535_vm0, %v9489_v5 }
  0x8b   :  { %8900 = vmatprep.mubr.msk.bf16.mxu0 %vm535_vm0, %v9490_v6  ;;  %9048 = vmatprep.mubr.msk.bf16.mxu1 %vm535_vm0, %v9491_v7 }
  0x92   :  { %8901 = vmatmul.mubr.msk.bf16.gmra.mrb[68].mxu0 %vm535_vm0, %v9492_v8  ;;  %9049 = vmatmul.mubr.msk.bf16.gmra.mrb[68].mxu1 %vm535_vm0, %v9493_v9  ;;  %v9538_v9 = vld [vmem:[%s12556_s0 + $0x6e0] sm:$0xff]  }
  0x93   :  { %8904 = vmatprep.mubr.msk.bf16.mxu0 %vm535_vm0, %v9494_v10  ;;  %9052 = vmatprep.mubr.msk.bf16.mxu1 %vm535_vm0, %v9495_v11  ;;  %v9539_v10 = vld [vmem:[%s12556_s0 + $0x728] sm:$0xff]   ;;  %v9559_v11 = vld [vmem:[%s12556_s0 + $0x850] sm:$0xff]  }
  0x9a   :  { %8905 = vmatmul.mubr.msk.bf16.gmra.mrb[72].mxu0 %vm535_vm0, %v9496_v12  ;;  %9053 = vmatmul.mubr.msk.bf16.gmra.mrb[72].mxu1 %vm535_vm0, %v9497_v13 }
  0x9b   :  { %8908 = vmatprep.mubr.msk.bf16.mxu0 %vm535_vm0, %v9498_v14  ;;  %9056 = vmatprep.mubr.msk.bf16.mxu1 %vm535_vm0, %v9499_v15 }
  0xa2   :  { %8909 = vmatmul.mubr.msk.bf16.gmra.mrb[76].mxu0 %vm535_vm0, %v9500_v16  ;;  %9057 = vmatmul.mubr.msk.bf16.gmra.mrb[76].mxu1 %vm535_vm0, %v9501_v17  ;;  %v9540_v16 = vld [vmem:[%s12556_s0 + $0x6e8] sm:$0xff]   ;;  %v9541_v17 = vld [vmem:[%s12556_s0 + $0x730] sm:$0xff]  }
  0xa3   :  { %8912 = vmatprep.mubr.msk.bf16.mxu0 %vm535_vm0, %v9502_v18  ;;  %9060 = vmatprep.mubr.msk.bf16.mxu1 %vm535_vm0, %v9503_v19 }
  0xaa   :  { %8913 = vmatmul.mubr.msk.bf16.gmra.mrb[80].mxu0 %vm535_vm0, %v9504_v20  ;;  %9061 = vmatmul.mubr.msk.bf16.gmra.mrb[80].mxu1 %vm535_vm0, %v9505_v21 }
  0xab   :  { %8916 = vmatprep.mubr.msk.bf16.mxu0 %vm535_vm0, %v9506_v22  ;;  %9064 = vmatprep.mubr.msk.bf16.mxu1 %vm535_vm0, %v9507_v23 }
  0xb2   :  { %8917 = vmatmul.mubr.msk.bf16.gmra.mrb[84].mxu0 %vm535_vm0, %v9508_v24  ;;  %9065 = vmatmul.mubr.msk.bf16.gmra.mrb[84].mxu1 %vm535_vm0, %v9509_v25  ;;  %v9542_v25 = vld [vmem:[%s12556_s0 + $0x6f0] sm:$0xff]  }
  0xb3   :  { %8920 = vmatprep.mubr.msk.bf16.mxu0 %vm535_vm0, %v9510_v26  ;;  %9068 = vmatprep.mubr.msk.bf16.mxu1 %vm535_vm0, %v9511_v27  ;;  %v9543_v26 = vld [vmem:[%s12556_s0 + $0x738] sm:$0xff]   ;;  %v9556_v27 = vld [vmem:[%s12556_s0 + $0x800] sm:$0xff]  }
  0xba   :  { %8921 = vmatmul.mubr.msk.bf16.gmra.mrb[88].mxu0 %vm535_vm0, %v9512_v28  ;;  %9069 = vmatmul.mubr.msk.bf16.gmra.mrb[88].mxu1 %vm535_vm0, %v9513_v29 }
  0xbb   :  { %8924 = vmatprep.mubr.msk.bf16.mxu0 %vm535_vm0, %v9514_v30  ;;  %9072 = vmatprep.mubr.msk.bf16.mxu1 %vm535_vm0, %v9515_v31 }
  0xc2   :  { %8925 = vmatmul.mubr.msk.bf16.gmra.mrb[92].mxu0 %vm535_vm0, %v9516_v32  ;;  %9073 = vmatmul.mubr.msk.bf16.gmra.mrb[92].mxu1 %vm535_vm0, %v9517_v33  ;;  %v9544_v32 = vld [vmem:[%s12556_s0 + $0x6f8] sm:$0xff]   ;;  %v9545_v33 = vld [vmem:[%s12556_s0 + $0x740] sm:$0xff]  }
  0xc3   :  { %8928 = vmatprep.mubr.msk.bf16.mxu0 %vm535_vm0, %v9518_v34  ;;  %9076 = vmatprep.mubr.msk.bf16.mxu1 %vm535_vm0, %v9519_v35 }
  0xca   :  { %8929 = vmatmul.mubr.msk.bf16.gmra.mrb[96].mxu0 %vm535_vm0, %v9520_v36  ;;  %9077 = vmatmul.mubr.msk.bf16.gmra.mrb[96].mxu1 %vm535_vm0, %v9521_v37 }
  0xcb   :  { %8932 = vmatprep.mubr.msk.bf16.mxu0 %vm535_vm0, %v9522_v38  ;;  %9080 = vmatprep.mubr.msk.bf16.mxu1 %vm535_vm0, %v9523_v39 }
  0xd2   :  { %8933 = vmatmul.mubr.msk.bf16.gmra.mrb[100].mxu0 %vm535_vm0, %v9524_v40  ;;  %9081 = vmatmul.mubr.msk.bf16.gmra.mrb[100].mxu1 %vm535_vm0, %v9525_v41  ;;  %v9546_v41 = vld [vmem:[%s12556_s0 + $0x700] sm:$0xff]  }
  0xd3   :  { %8936 = vmatprep.mubr.msk.bf16.mxu0 %vm535_vm0, %v9526_v42  ;;  %9084 = vmatprep.mubr.msk.bf16.mxu1 %vm535_vm0, %v9527_v43  ;;  %v9547_v42 = vld [vmem:[%s12556_s0 + $0x748] sm:$0xff]   ;;  %v9555_v43 = vld [vmem:[%s12556_s0 + $0x840] sm:$0xff]  }
  0xda   :  { %8937 = vmatmul.mubr.msk.bf16.gmra.mrb[104].mxu0 %vm535_vm0, %v9528_v44  ;;  %9085 = vmatmul.mubr.msk.bf16.gmra.mrb[104].mxu1 %vm535_vm0, %v9529_v45 }
  0xdb   :  { %8940 = vmatprep.mubr.msk.bf16.mxu0 %vm535_vm0, %v9530_v46  ;;  %9088 = vmatprep.mubr.msk.bf16.mxu1 %vm535_vm0, %v9531_v47 }
  0xdd   :  { %v10184_v50 = vpop.f32.mrb[0].mxu0  ;;  %v10186_v51 = vpop.f32.mrb[0].mxu1 }
  0xde   :  { %v10188_v52 = vpop.f32.mrb[1].mxu0  ;;  %v10190_v53 = vpop.f32.mrb[1].mxu1 }
  0xdf   :  { %v10194_v55 = vpop.f32.mrb[2].mxu0  ;;  %v10196_v56 = vpop.f32.mrb[2].mxu1 }
  0xe0   :  { %v10206_v60 = vpop.f32.mrb[3].mxu0  ;;  %v10208_v61 = vpop.f32.mrb[3].mxu1 }
  0xe2   :  { %8941 = vmatmul.mubr.msk.bf16.gmra.mrb[108].mxu0 %vm535_vm0, %v9532_v48  ;;  %9089 = vmatmul.mubr.msk.bf16.gmra.mrb[108].mxu1 %vm535_vm0, %v9533_v49  ;;  %v9548_v48 = vld [vmem:[%s12556_s0 + $0x7e0] sm:$0xff]   ;;  %v9549_v49 = vld [vmem:[%s12556_s0 + $0x828] sm:$0xff]  }
  0xe3   :  { %8944 = vmatprep.mubr.msk.bf16.mxu0 %vm535_vm0, %v9534_v57  ;;  %9092 = vmatprep.mubr.msk.bf16.mxu1 %vm535_vm0, %v9535_v58 }
  0xe5   :  { %v10224_v2 = vpop.f32.mrb[4].mxu0  ;;  %v10226_v3 = vpop.f32.mrb[4].mxu1 }
  0xe6   :  { %v10228_v4 = vpop.f32.mrb[5].mxu0  ;;  %v10230_v5 = vpop.f32.mrb[5].mxu1 }
  0xe7   :  { %v10234_v7 = vpop.f32.mrb[6].mxu0  ;;  %v10236_v8 = vpop.f32.mrb[6].mxu1 }
  0xe8   :  { %v10246_v12 = vpop.f32.mrb[7].mxu0  ;;  %v10248_v13 = vpop.f32.mrb[7].mxu1 }
  0xea   :  { %8945 = vmatmul.mubr.msk.bf16.gmra.mrb[112].mxu0 %vm535_vm0, %v9536_v0  ;;  %9093 = vmatmul.mubr.msk.bf16.gmra.mrb[112].mxu1 %vm535_vm0, %v9537_v1 }
  0xeb   :  { %8948 = vmatprep.mubr.msk.bf16.mxu0 %vm535_vm0, %v9538_v9  ;;  %9096 = vmatprep.mubr.msk.bf16.mxu1 %vm535_vm0, %v9539_v10 }
  0xed   :  { %v10264_v18 = vpop.f32.mrb[8].mxu0  ;;  %v10266_v19 = vpop.f32.mrb[8].mxu1 }
  0xee   :  { %v10268_v20 = vpop.f32.mrb[9].mxu0  ;;  %v10270_v21 = vpop.f32.mrb[9].mxu1 }
  0xef   :  { %v10274_v23 = vpop.f32.mrb[10].mxu0  ;;  %v10276_v24 = vpop.f32.mrb[10].mxu1 }
  0xf0   :  { %v10286_v28 = vpop.f32.mrb[11].mxu0  ;;  %v10288_v29 = vpop.f32.mrb[11].mxu1 }
  0xf2   :  { %8949 = vmatmul.mubr.msk.bf16.gmra.mrb[116].mxu0 %vm535_vm0, %v9540_v16  ;;  %9097 = vmatmul.mubr.msk.bf16.gmra.mrb[116].mxu1 %vm535_vm0, %v9541_v17  ;;  %v9550_v17 = vld [vmem:[%s12556_s0 + $0x7e8] sm:$0xff]  }
  0xf3   :  { %8952 = vmatprep.mubr.msk.bf16.mxu0 %vm535_vm0, %v9542_v25  ;;  %9100 = vmatprep.mubr.msk.bf16.mxu1 %vm535_vm0, %v9543_v26  ;;  %v9551_v25 = vld [vmem:[%s12556_s0 + $0x830] sm:$0xff]  }
  0xf5   :  { %v10304_v34 = vpop.f32.mrb[12].mxu0  ;;  %v10306_v35 = vpop.f32.mrb[12].mxu1 }
  0xf6   :  { %v10308_v36 = vpop.f32.mrb[13].mxu0  ;;  %v10310_v37 = vpop.f32.mrb[13].mxu1 }
  0xf7   :  { %v10314_v39 = vpop.f32.mrb[14].mxu0  ;;  %v10316_v40 = vpop.f32.mrb[14].mxu1 }
  0xf8   :  { %v10326_v44 = vpop.f32.mrb[15].mxu0  ;;  %v10328_v45 = vpop.f32.mrb[15].mxu1 }
  0xfa   :  { %8953 = vmatmul.mubr.msk.bf16.gmra.mrb[120].mxu0 %vm535_vm0, %v9544_v32  ;;  %9101 = vmatmul.mubr.msk.bf16.gmra.mrb[120].mxu1 %vm535_vm0, %v9545_v33 }
  0xfb   :  { %8956 = vmatprep.mubr.msk.bf16.mxu0 %vm535_vm0, %v9546_v41  ;;  %9104 = vmatprep.mubr.msk.bf16.mxu1 %vm535_vm0, %v9547_v42  ;;  %v9552_v42 = vld [vmem:[%s12556_s0 + $0x7f0] sm:$0xff]   ;;  %v9554_v41 = vld [vmem:[%s12556_s0 + $0x7f8] sm:$0xff]  }
  0xfd   :  { %v10344_v57 = vpop.f32.mrb[16].mxu0  ;;  %v10346_v58 = vpop.f32.mrb[16].mxu1 }
  0xfe   :  { %v10348_v0 = vpop.f32.mrb[17].mxu0  ;;  %v10350_v1 = vpop.f32.mrb[17].mxu1 }
  0xff   :  { %v10354_v10 = vpop.f32.mrb[18].mxu0  ;;  %v10356_v16 = vpop.f32.mrb[18].mxu1 }
 0x100   :  { %v10366_v32 = vpop.f32.mrb[19].mxu0  ;;  %v10368_v33 = vpop.f32.mrb[19].mxu1 }
 0x102   :  { %8957 = vmatmul.mubr.msk.bf16.gmra.mrb[124].mxu0 %vm535_vm0, %v9548_v48  ;;  %9105 = vmatmul.mubr.msk.bf16.gmra.mrb[124].mxu1 %vm535_vm0, %v9549_v49  ;;  %v9553_v48 = vld [vmem:[%s12556_s0 + $0x838] sm:$0xff]   ;;  %v9558_v49 = vld [vmem:[%s12556_s0 + $0x808] sm:$0xff]  }
 0x103   :  { %8960 = vmatprep.mubr.msk.bf16.mxu0 %vm535_vm0, %v9550_v17  ;;  %9108 = vmatprep.mubr.msk.bf16.mxu1 %vm535_vm0, %v9551_v25 }
 0x105   :  { %v10378_v9 = vpop.f32.mrb[20].mxu0  ;;  %v10380_v26 = vpop.f32.mrb[20].mxu1 }
 0x106   :  { %v10382_v47 = vpop.f32.mrb[21].mxu0  ;;  %v10384_v46 = vpop.f32.mrb[21].mxu1 }
 0x107   :  { %v10394_v17 = vpop.f32.mrb[22].mxu0  ;;  %v10396_v25 = vpop.f32.mrb[22].mxu1 }
 0x108   :  { %v10406_v31 = vpop.f32.mrb[23].mxu0  ;;  %v10408_v30 = vpop.f32.mrb[23].mxu1 }
 0x109   :  { %12800 = vst [vmem:[#allocation2_spill] sm:$0xff] %v10408_v30 }
 0x10a   :  { %8961 = vmatmul.mubr.msk.bf16.gmra.mrb[128].mxu0 %vm535_vm0, %v9552_v42  ;;  %9109 = vmatmul.mubr.msk.bf16.gmra.mrb[128].mxu1 %vm535_vm0, %v9553_v48  ;;  %v9557_v42 = vld [vmem:[%s12556_s0 + $0x848] sm:$0xff]  }
 0x10b   :  { %8964 = vmatprep.mubr.msk.bf16.mxu0 %vm535_vm0, %v9554_v41  ;;  %9112 = vmatprep.mubr.msk.bf16.mxu1 %vm535_vm0, %v9555_v43  ;;  %v9562_v41 = vld [vmem:[%s12556_s0 + $0x818] sm:$0xff]  }
 0x10d   :  { %v10418_v22 = vpop.f32.mrb[24].mxu0  ;;  %v10420_v38 = vpop.f32.mrb[24].mxu1 }
 0x10e   :  { %12801 = vst [vmem:[#allocation3_spill] sm:$0xff] %v10418_v22  ;;  %12802 = vst [vmem:[#allocation4_spill] sm:$0xff] %v10420_v38  ;;  %v10422_v15 = vpop.f32.mrb[25].mxu0  ;;  %v10424_v14 = vpop.f32.mrb[25].mxu1 }
 0x10f   :  { %12803 = vst [vmem:[#allocation5_spill] sm:$0xff] %v10422_v15  ;;  %12804 = vst [vmem:[#allocation6_spill] sm:$0xff] %v10424_v14  ;;  %v10434_v43 = vpop.f32.mrb[26].mxu0  ;;  %v10436_v48 = vpop.f32.mrb[26].mxu1 }
 0x110   :  { %12805 = vst [vmem:[#allocation7_spill] sm:$0xff] %v10434_v43  ;;  %12806 = vst [vmem:[#allocation8_spill] sm:$0xff] %v10436_v48  ;;  %v10446_v63 = vpop.f32.mrb[27].mxu0  ;;  %v10448_v62 = vpop.f32.mrb[27].mxu1 }
 0x111   :  { %12807 = vst [vmem:[#allocation9_spill] sm:$0xff] %v10446_v63  ;;  %12808 = vst [vmem:[#allocation10_spill] sm:$0xff] %v10448_v62  ;;  %v9563_v62 = vld [vmem:[%s12556_s0 + $0x860] sm:$0xff]  }
 0x112   :  { %8965 = vmatmul.mubr.msk.bf16.gmra.mrb[132].mxu0 %vm535_vm0, %v9556_v27  ;;  %9113 = vmatmul.mubr.msk.bf16.gmra.mrb[132].mxu1 %vm535_vm0, %v9557_v42  ;;  %v9561_v27 = vld [vmem:[%s12556_s0 + $0x858] sm:$0xff]  }
 0x113   :  { %8968 = vmatprep.mubr.msk.bf16.mxu0 %vm535_vm0, %v9558_v49  ;;  %9116 = vmatprep.mubr.msk.bf16.mxu1 %vm535_vm0, %v9559_v11 }
 0x115   :  { %v10458_v54 = vpop.f32.mrb[28].mxu0  ;;  %v10460_v6 = vpop.f32.mrb[28].mxu1 }
 0x116   :  { %12809 = vst [vmem:[#allocation11_spill] sm:$0xff] %v10458_v54  ;;  %12810 = vst [vmem:[#allocation12_spill] sm:$0xff] %v10460_v6  ;;  %v10462_v14 = vpop.f32.mrb[29].mxu0  ;;  %v10464_v15 = vpop.f32.mrb[29].mxu1 }
 0x117   :  { %12811 = vst [vmem:[#allocation13_spill] sm:$0xff] %v10462_v14  ;;  %12812 = vst [vmem:[#allocation14_spill] sm:$0xff] %v10464_v15  ;;  %v10474_v11 = vpop.f32.mrb[30].mxu0  ;;  %v10476_v42 = vpop.f32.mrb[30].mxu1  ;;  %v9566_v15 = vld [vmem:[%s12556_s0 + $0x90] sm:$0xff]  }
 0x118   :  { %12813 = vst [vmem:[#allocation15_spill] sm:$0xff] %v10474_v11  ;;  %12814 = vst [vmem:[#allocation16_spill] sm:$0xff] %v10476_v42  ;;  %v10486_v48 = vpop.f32.mrb[31].mxu0  ;;  %v10488_v43 = vpop.f32.mrb[31].mxu1 }
 0x119   :  { %12815 = vst [vmem:[#allocation17_spill] sm:$0xff] %v10486_v48  ;;  %12816 = vst [vmem:[#allocation18_spill] sm:$0xff] %v10488_v43 }
 0x11a   :  { %8969 = vmatmul.mubr.msk.bf16.gmra.mrb[136].mxu0 %vm535_vm0, %v9560_v59  ;;  %9117 = vmatmul.mubr.msk.bf16.gmra.mrb[136].mxu1 %vm535_vm0, %v9561_v27  ;;  %v9564_v59 = vld [vmem:[%s12556_s0 + $0x820] sm:$0xff]  }
 0x11b   :  { %8972 = vmatprep.mubr.msk.bf16.mxu0 %vm535_vm0, %v9562_v41  ;;  %9120 = vmatprep.mubr.msk.bf16.mxu1 %vm535_vm0, %v9563_v62  ;;  %v9565_v41 = vld [vmem:[%s12556_s0 + $0x868] sm:$0xff]  }
 0x11d   :  { %v10498_v54 = vpop.f32.mrb[32].mxu0  ;;  %v10500_v63 = vpop.f32.mrb[32].mxu1 }
 0x11e   :  { %12817 = vst [vmem:[#allocation19_spill] sm:$0xff] %v10498_v54  ;;  %12818 = vst [vmem:[#allocation20_spill] sm:$0xff] %v10500_v63  ;;  %v10504_v14 = vpop.f32.mrb[33].mxu0  ;;  %v10506_v49 = vpop.f32.mrb[33].mxu1  ;;  %v9567_v63 = vld [vmem:[%s12556_s0 + $0xd8] sm:$0xff]   ;;  %v9570_v54 = vld [vmem:[%s12556_s0 + $0xa0] sm:$0xff]  }
 0x11f   :  { %12819 = vst [vmem:[#allocation21_spill] sm:$0xff] %v10504_v14  ;;  %12820 = vst [vmem:[#allocation22_spill] sm:$0xff] %v10506_v49  ;;  %v10516_v27 = vpop.f32.mrb[34].mxu0  ;;  %v10518_v6 = vpop.f32.mrb[34].mxu1 }
 0x120   :  { %12821 = vst [vmem:[#allocation23_spill] sm:$0xff] %v10516_v27  ;;  %12822 = vst [vmem:[#allocation24_spill] sm:$0xff] %v10518_v6  ;;  %v10528_v43 = vpop.f32.mrb[35].mxu0  ;;  %v10530_v48 = vpop.f32.mrb[35].mxu1 }
 0x121   :  { %12823 = vst [vmem:[#allocation25_spill] sm:$0xff] %v10528_v43  ;;  %12824 = vst [vmem:[#allocation26_spill] sm:$0xff] %v10530_v48 }
 0x122   :  { %8973 = vmatmul.mubr.msk.bf16.gmra.mrb[140].mxu0 %vm535_vm0, %v9564_v59  ;;  %9121 = vmatmul.mubr.msk.bf16.gmra.mrb[140].mxu1 %vm535_vm0, %v9565_v41  ;;  %v9568_v59 = vld [vmem:[%s12556_s0 + $0x98] sm:$0xff]  }
 0x123   :  { %9128 = vmatprep.mubr.msk.bf16.mxu0 %vm535_vm0, %v9566_v15  ;;  %9276 = vmatprep.mubr.msk.bf16.mxu1 %vm535_vm0, %v9567_v63  ;;  %v9569_v15 = vld [vmem:[%s12556_s0 + $0xe0] sm:$0xff]  }
 0x125   :  { %v10538_v49 = vpop.f32.mrb[36].mxu0  ;;  %v10540_v14 = vpop.f32.mrb[36].mxu1 }
 0x126   :  { %12825 = vst [vmem:[#allocation27_spill] sm:$0xff] %v10538_v49  ;;  %12826 = vst [vmem:[#allocation28_spill] sm:$0xff] %v10540_v14  ;;  %v10544_v6 = vpop.f32.mrb[37].mxu0  ;;  %v10546_v27 = vpop.f32.mrb[37].mxu1  ;;  %v9571_v14 = vld [vmem:[%s12556_s0 + $0xe8] sm:$0xff]   ;;  %v9574_v49 = vld [vmem:[%s12556_s0 + $0xb0] sm:$0xff]  }
 0x127   :  { %12827 = vst [vmem:[#allocation29_spill] sm:$0xff] %v10544_v6  ;;  %12828 = vst [vmem:[#allocation30_spill] sm:$0xff] %v10546_v27  ;;  %v10556_v41 = vpop.f32.mrb[38].mxu0  ;;  %v10558_v62 = vpop.f32.mrb[38].mxu1 }
 0x128   :  { %12829 = vst [vmem:[#allocation31_spill] sm:$0xff] %v10556_v41  ;;  %12830 = vst [vmem:[#allocation32_spill] sm:$0xff] %v10558_v62  ;;  %v10568_v48 = vpop.f32.mrb[39].mxu0  ;;  %v10570_v43 = vpop.f32.mrb[39].mxu1 }
 0x129   :  { %12831 = vst [vmem:[#allocation33_spill] sm:$0xff] %v10568_v48  ;;  %12832 = vst [vmem:[#allocation34_spill] sm:$0xff] %v10570_v43 }
 0x12a   :  { %9129 = vmatmul.mubr.msk.bf16.vlgmr.msra.gmra.mrb[144].mxu0 %vm535_vm0, %v9568_v59  ;;  %9277 = vmatmul.mubr.msk.bf16.vlgmr.msra.gmra.mrb[144].mxu1 %vm535_vm0, %v9569_v15  ;;  %v9572_v59 = vld [vmem:[%s12556_s0 + $0xa8] sm:$0xff]  }
 0x12b   :  { %9132 = vmatprep.mubr.msk.bf16.mxu0 %vm535_vm0, %v9570_v54  ;;  %9280 = vmatprep.mubr.msk.bf16.mxu1 %vm535_vm0, %v9571_v14  ;;  %v9573_v54 = vld [vmem:[%s12556_s0 + $0xf0] sm:$0xff]  }
 0x12d   :  { %v10578_v27 = vpop.f32.mrb[40].mxu0  ;;  %v10580_v6 = vpop.f32.mrb[40].mxu1 }
 0x12e   :  { %12833 = vst [vmem:[#allocation35_spill] sm:$0xff] %v10578_v27  ;;  %12834 = vst [vmem:[#allocation36_spill] sm:$0xff] %v10580_v6  ;;  %v10584_v62 = vpop.f32.mrb[41].mxu0  ;;  %v10586_v41 = vpop.f32.mrb[41].mxu1  ;;  %v9575_v6 = vld [vmem:[%s12556_s0 + $0xf8] sm:$0xff]   ;;  %v9578_v27 = vld [vmem:[%s12556_s0 + $0xc0] sm:$0xff]  }
 0x12f   :  { %12835 = vst [vmem:[#allocation37_spill] sm:$0xff] %v10584_v62  ;;  %12836 = vst [vmem:[#allocation38_spill] sm:$0xff] %v10586_v41  ;;  %v10596_v15 = vpop.f32.mrb[42].mxu0  ;;  %v10598_v63 = vpop.f32.mrb[42].mxu1 }
 0x130   :  { %12837 = vst [vmem:[#allocation39_spill] sm:$0xff] %v10596_v15  ;;  %12838 = vst [vmem:[#allocation40_spill] sm:$0xff] %v10598_v63  ;;  %v10608_v43 = vpop.f32.mrb[43].mxu0  ;;  %v10610_v48 = vpop.f32.mrb[43].mxu1 }
 0x131   :  { %12839 = vst [vmem:[#allocation41_spill] sm:$0xff] %v10608_v43  ;;  %12840 = vst [vmem:[#allocation42_spill] sm:$0xff] %v10610_v48 }
 0x132   :  { %9133 = vmatmul.mubr.msk.bf16.gmra.mrb[148].mxu0 %vm535_vm0, %v9572_v59  ;;  %9281 = vmatmul.mubr.msk.bf16.gmra.mrb[148].mxu1 %vm535_vm0, %v9573_v54  ;;  %v9576_v59 = vld [vmem:[%s12556_s0 + $0xb8] sm:$0xff]  }
 0x133   :  { %9136 = vmatprep.mubr.msk.bf16.mxu0 %vm535_vm0, %v9574_v49  ;;  %9284 = vmatprep.mubr.msk.bf16.mxu1 %vm535_vm0, %v9575_v6  ;;  %v9577_v49 = vld [vmem:[%s12556_s0 + $0x100] sm:$0xff]  }
 0x135   :  { %v10618_v41 = vpop.f32.mrb[44].mxu0  ;;  %v10620_v62 = vpop.f32.mrb[44].mxu1 }
 0x136   :  { %12841 = vst [vmem:[#allocation43_spill] sm:$0xff] %v10618_v41  ;;  %12842 = vst [vmem:[#allocation44_spill] sm:$0xff] %v10620_v62  ;;  %v10624_v63 = vpop.f32.mrb[45].mxu0  ;;  %v10626_v15 = vpop.f32.mrb[45].mxu1  ;;  %v9579_v62 = vld [vmem:[%s12556_s0 + $0x108] sm:$0xff]   ;;  %v9582_v41 = vld [vmem:[%s12556_s0 + $0xd0] sm:$0xff]  }
 0x137   :  { %12843 = vst [vmem:[#allocation45_spill] sm:$0xff] %v10624_v63  ;;  %12844 = vst [vmem:[#allocation46_spill] sm:$0xff] %v10626_v15  ;;  %v10636_v54 = vpop.f32.mrb[46].mxu0  ;;  %v10638_v14 = vpop.f32.mrb[46].mxu1 }
 0x138   :  { %12845 = vst [vmem:[#allocation47_spill] sm:$0xff] %v10636_v54  ;;  %12846 = vst [vmem:[#allocation48_spill] sm:$0xff] %v10638_v14  ;;  %v10648_v48 = vpop.f32.mrb[47].mxu0  ;;  %v10650_v43 = vpop.f32.mrb[47].mxu1 }
 0x139   :  { %12847 = vst [vmem:[#allocation49_spill] sm:$0xff] %v10648_v48  ;;  %12848 = vst [vmem:[#allocation50_spill] sm:$0xff] %v10650_v43 }
 0x13a   :  { %9137 = vmatmul.mubr.msk.bf16.gmra.mrb[152].mxu0 %vm535_vm0, %v9576_v59  ;;  %9285 = vmatmul.mubr.msk.bf16.gmra.mrb[152].mxu1 %vm535_vm0, %v9577_v49  ;;  %v9580_v59 = vld [vmem:[%s12556_s0 + $0xc8] sm:$0xff]  }
 0x13b   :  { %9140 = vmatprep.mubr.msk.bf16.mxu0 %vm535_vm0, %v9578_v27  ;;  %9288 = vmatprep.mubr.msk.bf16.mxu1 %vm535_vm0, %v9579_v62  ;;  %v9581_v27 = vld [vmem:[%s12556_s0 + $0x110] sm:$0xff]  }
 0x13d   :  { %v10658_v15 = vpop.f32.mrb[48].mxu0  ;;  %v10660_v63 = vpop.f32.mrb[48].mxu1 }
 0x13e   :  { %12849 = vst [vmem:[#allocation51_spill] sm:$0xff] %v10658_v15  ;;  %12850 = vst [vmem:[#allocation52_spill] sm:$0xff] %v10660_v63  ;;  %v10664_v14 = vpop.f32.mrb[49].mxu0  ;;  %v10666_v54 = vpop.f32.mrb[49].mxu1  ;;  %v9583_v63 = vld [vmem:[%s12556_s0 + $0x118] sm:$0xff]  }
 0x13f   :  { %12851 = vst [vmem:[#allocation53_spill] sm:$0xff] %v10664_v14  ;;  %12852 = vst [vmem:[#allocation54_spill] sm:$0xff] %v10666_v54  ;;  %v10676_v49 = vpop.f32.mrb[50].mxu0  ;;  %v10678_v6 = vpop.f32.mrb[50].mxu1  ;;  %v9586_v15 = vld [vmem:[%s12556_s0 + $0x1b8] sm:$0xff]  }
 0x140   :  { %12853 = vst [vmem:[#allocation55_spill] sm:$0xff] %v10676_v49  ;;  %12854 = vst [vmem:[#allocation56_spill] sm:$0xff] %v10678_v6  ;;  %v10688_v43 = vpop.f32.mrb[51].mxu0  ;;  %v10690_v48 = vpop.f32.mrb[51].mxu1 }
 0x141   :  { %12855 = vst [vmem:[#allocation57_spill] sm:$0xff] %v10688_v43  ;;  %12856 = vst [vmem:[#allocation58_spill] sm:$0xff] %v10690_v48 }
 0x142   :  { %9141 = vmatmul.mubr.msk.bf16.gmra.mrb[156].mxu0 %vm535_vm0, %v9580_v59  ;;  %9289 = vmatmul.mubr.msk.bf16.gmra.mrb[156].mxu1 %vm535_vm0, %v9581_v27  ;;  %v9584_v59 = vld [vmem:[%s12556_s0 + $0x1b0] sm:$0xff]  }
 0x143   :  { %9144 = vmatprep.mubr.msk.bf16.mxu0 %vm535_vm0, %v9582_v41  ;;  %9292 = vmatprep.mubr.msk.bf16.mxu1 %vm535_vm0, %v9583_v63  ;;  %v9585_v41 = vld [vmem:[%s12556_s0 + $0x1f8] sm:$0xff]  }
 0x145   :  { %v10698_v54 = vpop.f32.mrb[52].mxu0  ;;  %v10700_v14 = vpop.f32.mrb[52].mxu1 }
 0x146   :  { %12857 = vst [vmem:[#allocation59_spill] sm:$0xff] %v10698_v54  ;;  %12858 = vst [vmem:[#allocation60_spill] sm:$0xff] %v10700_v14  ;;  %v10704_v6 = vpop.f32.mrb[53].mxu0  ;;  %v10706_v49 = vpop.f32.mrb[53].mxu1  ;;  %v9587_v14 = vld [vmem:[%s12556_s0 + $0x200] sm:$0xff]   ;;  %v9590_v54 = vld [vmem:[%s12556_s0 + $0x1c8] sm:$0xff]  }
 0x147   :  { %12859 = vst [vmem:[#allocation61_spill] sm:$0xff] %v10704_v6  ;;  %12860 = vst [vmem:[#allocation62_spill] sm:$0xff] %v10706_v49  ;;  %v10716_v27 = vpop.f32.mrb[54].mxu0  ;;  %v10718_v62 = vpop.f32.mrb[54].mxu1 }
 0x148   :  { %12861 = vst [vmem:[#allocation63_spill] sm:$0xff] %v10716_v27  ;;  %12862 = vst [vmem:[#allocation64_spill] sm:$0xff] %v10718_v62  ;;  %v10728_v48 = vpop.f32.mrb[55].mxu0  ;;  %v10730_v43 = vpop.f32.mrb[55].mxu1 }
 0x149   :  { %12863 = vst [vmem:[#allocation65_spill] sm:$0xff] %v10728_v48  ;;  %12864 = vst [vmem:[#allocation66_spill] sm:$0xff] %v10730_v43 }
 0x14a   :  { %9145 = vmatmul.mubr.msk.bf16.gmra.mrb[160].mxu0 %vm535_vm0, %v9584_v59  ;;  %9293 = vmatmul.mubr.msk.bf16.gmra.mrb[160].mxu1 %vm535_vm0, %v9585_v41  ;;  %v9588_v59 = vld [vmem:[%s12556_s0 + $0x1c0] sm:$0xff]  }
 0x14b   :  { %9148 = vmatprep.mubr.msk.bf16.mxu0 %vm535_vm0, %v9586_v15  ;;  %9296 = vmatprep.mubr.msk.bf16.mxu1 %vm535_vm0, %v9587_v14  ;;  %v9589_v15 = vld [vmem:[%s12556_s0 + $0x208] sm:$0xff]  }
 0x14d   :  { %v10738_v49 = vpop.f32.mrb[56].mxu0  ;;  %v10740_v6 = vpop.f32.mrb[56].mxu1 }
 0x14e   :  { %12865 = vst [vmem:[#allocation67_spill] sm:$0xff] %v10738_v49  ;;  %12866 = vst [vmem:[#allocation68_spill] sm:$0xff] %v10740_v6  ;;  %v10744_v62 = vpop.f32.mrb[57].mxu0  ;;  %v10746_v27 = vpop.f32.mrb[57].mxu1  ;;  %v9591_v6 = vld [vmem:[%s12556_s0 + $0x210] sm:$0xff]   ;;  %v9594_v49 = vld [vmem:[%s12556_s0 + $0x1d8] sm:$0xff]  }
 0x14f   :  { %12867 = vst [vmem:[#allocation69_spill] sm:$0xff] %v10744_v62  ;;  %12868 = vst [vmem:[#allocation70_spill] sm:$0xff] %v10746_v27  ;;  %v10756_v41 = vpop.f32.mrb[58].mxu0  ;;  %v10758_v63 = vpop.f32.mrb[58].mxu1 }
 0x150   :  { %12869 = vst [vmem:[#allocation71_spill] sm:$0xff] %v10756_v41  ;;  %12870 = vst [vmem:[#allocation72_spill] sm:$0xff] %v10758_v63  ;;  %v10768_v43 = vpop.f32.mrb[59].mxu0  ;;  %v10770_v48 = vpop.f32.mrb[59].mxu1 }
 0x151   :  { %12871 = vst [vmem:[#allocation73_spill] sm:$0xff] %v10768_v43  ;;  %12872 = vst [vmem:[#allocation74_spill] sm:$0xff] %v10770_v48 }
 0x152   :  { %9149 = vmatmul.mubr.msk.bf16.gmra.mrb[164].mxu0 %vm535_vm0, %v9588_v59  ;;  %9297 = vmatmul.mubr.msk.bf16.gmra.mrb[164].mxu1 %vm535_vm0, %v9589_v15  ;;  %v9592_v59 = vld [vmem:[%s12556_s0 + $0x1d0] sm:$0xff]  }
 0x153   :  { %9152 = vmatprep.mubr.msk.bf16.mxu0 %vm535_vm0, %v9590_v54  ;;  %9300 = vmatprep.mubr.msk.bf16.mxu1 %vm535_vm0, %v9591_v6  ;;  %v9593_v54 = vld [vmem:[%s12556_s0 + $0x218] sm:$0xff]  }
 0x155   :  { %v10778_v27 = vpop.f32.mrb[60].mxu0  ;;  %v10780_v62 = vpop.f32.mrb[60].mxu1 }
 0x156   :  { %12873 = vst [vmem:[#allocation75_spill] sm:$0xff] %v10778_v27  ;;  %12874 = vst [vmem:[#allocation76_spill] sm:$0xff] %v10780_v62  ;;  %v10784_v63 = vpop.f32.mrb[61].mxu0  ;;  %v10786_v41 = vpop.f32.mrb[61].mxu1  ;;  %v9595_v62 = vld [vmem:[%s12556_s0 + $0x220] sm:$0xff]   ;;  %v9598_v27 = vld [vmem:[%s12556_s0 + $0x1e8] sm:$0xff]  }
 0x157   :  { %12875 = vst [vmem:[#allocation77_spill] sm:$0xff] %v10784_v63  ;;  %12876 = vst [vmem:[#allocation78_spill] sm:$0xff] %v10786_v41  ;;  %v10796_v15 = vpop.f32.mrb[62].mxu0  ;;  %v10798_v14 = vpop.f32.mrb[62].mxu1 }
 0x158   :  { %12877 = vst [vmem:[#allocation79_spill] sm:$0xff] %v10796_v15  ;;  %12878 = vst [vmem:[#allocation80_spill] sm:$0xff] %v10798_v14  ;;  %v10808_v48 = vpop.f32.mrb[63].mxu0  ;;  %v10810_v43 = vpop.f32.mrb[63].mxu1 }
 0x159   :  { %12879 = vst [vmem:[#allocation81_spill] sm:$0xff] %v10808_v48  ;;  %12880 = vst [vmem:[#allocation82_spill] sm:$0xff] %v10810_v43 }
 0x15a   :  { %9153 = vmatmul.mubr.msk.bf16.gmra.mrb[168].mxu0 %vm535_vm0, %v9592_v59  ;;  %9301 = vmatmul.mubr.msk.bf16.gmra.mrb[168].mxu1 %vm535_vm0, %v9593_v54  ;;  %v9596_v59 = vld [vmem:[%s12556_s0 + $0x1e0] sm:$0xff]  }
 0x15b   :  { %9156 = vmatprep.mubr.msk.bf16.mxu0 %vm535_vm0, %v9594_v49  ;;  %9304 = vmatprep.mubr.msk.bf16.mxu1 %vm535_vm0, %v9595_v62  ;;  %v9597_v49 = vld [vmem:[%s12556_s0 + $0x228] sm:$0xff]  }
 0x15d   :  { %v10818_v41 = vpop.f32.mrb[64].mxu0  ;;  %v10820_v63 = vpop.f32.mrb[64].mxu1 }
 0x15e   :  { %12881 = vst [vmem:[#allocation83_spill] sm:$0xff] %v10818_v41  ;;  %12882 = vst [vmem:[#allocation84_spill] sm:$0xff] %v10820_v63  ;;  %v10824_v14 = vpop.f32.mrb[65].mxu0  ;;  %v10826_v15 = vpop.f32.mrb[65].mxu1  ;;  %v9599_v63 = vld [vmem:[%s12556_s0 + $0x230] sm:$0xff]  }
 0x15f   :  { %12883 = vst [vmem:[#allocation85_spill] sm:$0xff] %v10824_v14  ;;  %12884 = vst [vmem:[#allocation86_spill] sm:$0xff] %v10826_v15  ;;  %v10836_v54 = vpop.f32.mrb[66].mxu0  ;;  %v10838_v6 = vpop.f32.mrb[66].mxu1  ;;  %v9602_v41 = vld [vmem:[%s12556_s0 + $0x2d0] sm:$0xff]  }
 0x160   :  { %12885 = vst [vmem:[#allocation87_spill] sm:$0xff] %v10836_v54  ;;  %12886 = vst [vmem:[#allocation88_spill] sm:$0xff] %v10838_v6  ;;  %v10848_v43 = vpop.f32.mrb[67].mxu0  ;;  %v10850_v48 = vpop.f32.mrb[67].mxu1 }
 0x161   :  { %12887 = vst [vmem:[#allocation89_spill] sm:$0xff] %v10848_v43  ;;  %12888 = vst [vmem:[#allocation90_spill] sm:$0xff] %v10850_v48 }
 0x162   :  { %9157 = vmatmul.mubr.msk.bf16.gmra.mrb[172].mxu0 %vm535_vm0, %v9596_v59  ;;  %9305 = vmatmul.mubr.msk.bf16.gmra.mrb[172].mxu1 %vm535_vm0, %v9597_v49  ;;  %v9600_v59 = vld [vmem:[%s12556_s0 + $0x1f0] sm:$0xff]  }
 0x163   :  { %9160 = vmatprep.mubr.msk.bf16.mxu0 %vm535_vm0, %v9598_v27  ;;  %9308 = vmatprep.mubr.msk.bf16.mxu1 %vm535_vm0, %v9599_v63  ;;  %v9601_v27 = vld [vmem:[%s12556_s0 + $0x238] sm:$0xff]  }
 0x165   :  { %v10858_v15 = vpop.f32.mrb[68].mxu0  ;;  %v10860_v14 = vpop.f32.mrb[68].mxu1 }
 0x166   :  { %12889 = vst [vmem:[#allocation91_spill] sm:$0xff] %v10858_v15  ;;  %12890 = vst [vmem:[#allocation92_spill] sm:$0xff] %v10860_v14  ;;  %v10864_v6 = vpop.f32.mrb[69].mxu0  ;;  %v10866_v54 = vpop.f32.mrb[69].mxu1  ;;  %v9603_v14 = vld [vmem:[%s12556_s0 + $0x318] sm:$0xff]   ;;  %v9606_v15 = vld [vmem:[%s12556_s0 + $0x2e0] sm:$0xff]  }
 0x167   :  { %12891 = vst [vmem:[#allocation93_spill] sm:$0xff] %v10864_v6  ;;  %12892 = vst [vmem:[#allocation94_spill] sm:$0xff] %v10866_v54  ;;  %v10876_v49 = vpop.f32.mrb[70].mxu0  ;;  %v10878_v62 = vpop.f32.mrb[70].mxu1 }
 0x168   :  { %12893 = vst [vmem:[#allocation95_spill] sm:$0xff] %v10876_v49  ;;  %12894 = vst [vmem:[#allocation96_spill] sm:$0xff] %v10878_v62  ;;  %v10888_v48 = vpop.f32.mrb[71].mxu0  ;;  %v10890_v43 = vpop.f32.mrb[71].mxu1 }
 0x169   :  { %12895 = vst [vmem:[#allocation97_spill] sm:$0xff] %v10888_v48  ;;  %12896 = vst [vmem:[#allocation98_spill] sm:$0xff] %v10890_v43 }
 0x16a   :  { %9161 = vmatmul.mubr.msk.bf16.gmra.mrb[176].mxu0 %vm535_vm0, %v9600_v59  ;;  %9309 = vmatmul.mubr.msk.bf16.gmra.mrb[176].mxu1 %vm535_vm0, %v9601_v27  ;;  %v9604_v59 = vld [vmem:[%s12556_s0 + $0x2d8] sm:$0xff]  }
 0x16b   :  { %9164 = vmatprep.mubr.msk.bf16.mxu0 %vm535_vm0, %v9602_v41  ;;  %9312 = vmatprep.mubr.msk.bf16.mxu1 %vm535_vm0, %v9603_v14  ;;  %v9605_v41 = vld [vmem:[%s12556_s0 + $0x320] sm:$0xff]  }
 0x16d   :  { %v10898_v54 = vpop.f32.mrb[72].mxu0  ;;  %v10900_v6 = vpop.f32.mrb[72].mxu1 }
 0x16e   :  { %12897 = vst [vmem:[#allocation99_spill] sm:$0xff] %v10898_v54  ;;  %12898 = vst [vmem:[#allocation100_spill] sm:$0xff] %v10900_v6  ;;  %v10904_v62 = vpop.f32.mrb[73].mxu0  ;;  %v10906_v49 = vpop.f32.mrb[73].mxu1  ;;  %v9607_v6 = vld [vmem:[%s12556_s0 + $0x328] sm:$0xff]   ;;  %v9610_v54 = vld [vmem:[%s12556_s0 + $0x2f0] sm:$0xff]  }
 0x16f   :  { %12899 = vst [vmem:[#allocation101_spill] sm:$0xff] %v10904_v62  ;;  %12900 = vst [vmem:[#allocation102_spill] sm:$0xff] %v10906_v49  ;;  %v10916_v27 = vpop.f32.mrb[74].mxu0  ;;  %v10918_v63 = vpop.f32.mrb[74].mxu1 }
 0x170   :  { %12901 = vst [vmem:[#allocation103_spill] sm:$0xff] %v10916_v27  ;;  %12902 = vst [vmem:[#allocation104_spill] sm:$0xff] %v10918_v63  ;;  %v10928_v43 = vpop.f32.mrb[75].mxu0  ;;  %v10930_v48 = vpop.f32.mrb[75].mxu1 }
 0x171   :  { %12903 = vst [vmem:[#allocation105_spill] sm:$0xff] %v10928_v43  ;;  %12904 = vst [vmem:[#allocation106_spill] sm:$0xff] %v10930_v48 }
 0x172   :  { %9165 = vmatmul.mubr.msk.bf16.gmra.mrb[180].mxu0 %vm535_vm0, %v9604_v59  ;;  %9313 = vmatmul.mubr.msk.bf16.gmra.mrb[180].mxu1 %vm535_vm0, %v9605_v41  ;;  %v9608_v59 = vld [vmem:[%s12556_s0 + $0x2e8] sm:$0xff]  }
 0x173   :  { %9168 = vmatprep.mubr.msk.bf16.mxu0 %vm535_vm0, %v9606_v15  ;;  %9316 = vmatprep.mubr.msk.bf16.mxu1 %vm535_vm0, %v9607_v6  ;;  %v9609_v15 = vld [vmem:[%s12556_s0 + $0x330] sm:$0xff]  }
 0x175   :  { %v10938_v49 = vpop.f32.mrb[76].mxu0  ;;  %v10940_v62 = vpop.f32.mrb[76].mxu1 }
 0x176   :  { %12905 = vst [vmem:[#allocation107_spill] sm:$0xff] %v10938_v49  ;;  %12906 = vst [vmem:[#allocation108_spill] sm:$0xff] %v10940_v62  ;;  %v10944_v63 = vpop.f32.mrb[77].mxu0  ;;  %v10946_v27 = vpop.f32.mrb[77].mxu1  ;;  %v9611_v62 = vld [vmem:[%s12556_s0 + $0x338] sm:$0xff]   ;;  %v9614_v49 = vld [vmem:[%s12556_s0 + $0x300] sm:$0xff]  }
 0x177   :  { %12907 = vst [vmem:[#allocation109_spill] sm:$0xff] %v10944_v63  ;;  %12908 = vst [vmem:[#allocation110_spill] sm:$0xff] %v10946_v27  ;;  %v10956_v41 = vpop.f32.mrb[78].mxu0  ;;  %v10958_v14 = vpop.f32.mrb[78].mxu1 }
 0x178   :  { %12909 = vst [vmem:[#allocation111_spill] sm:$0xff] %v10956_v41  ;;  %12910 = vst [vmem:[#allocation112_spill] sm:$0xff] %v10958_v14  ;;  %v10968_v48 = vpop.f32.mrb[79].mxu0  ;;  %v10970_v43 = vpop.f32.mrb[79].mxu1 }
 0x179   :  { %12911 = vst [vmem:[#allocation113_spill] sm:$0xff] %v10968_v48  ;;  %12912 = vst [vmem:[#allocation114_spill] sm:$0xff] %v10970_v43 }
 0x17a   :  { %9169 = vmatmul.mubr.msk.bf16.gmra.mrb[184].mxu0 %vm535_vm0, %v9608_v59  ;;  %9317 = vmatmul.mubr.msk.bf16.gmra.mrb[184].mxu1 %vm535_vm0, %v9609_v15  ;;  %v9612_v59 = vld [vmem:[%s12556_s0 + $0x2f8] sm:$0xff]  }
 0x17b   :  { %9172 = vmatprep.mubr.msk.bf16.mxu0 %vm535_vm0, %v9610_v54  ;;  %9320 = vmatprep.mubr.msk.bf16.mxu1 %vm535_vm0, %v9611_v62  ;;  %v9613_v54 = vld [vmem:[%s12556_s0 + $0x340] sm:$0xff]  }
 0x17d   :  { %v10978_v27 = vpop.f32.mrb[80].mxu0  ;;  %v10980_v63 = vpop.f32.mrb[80].mxu1 }
 0x17e   :  { %12913 = vst [vmem:[#allocation115_spill] sm:$0xff] %v10978_v27  ;;  %12914 = vst [vmem:[#allocation116_spill] sm:$0xff] %v10980_v63  ;;  %v10984_v14 = vpop.f32.mrb[81].mxu0  ;;  %v10986_v41 = vpop.f32.mrb[81].mxu1  ;;  %v9615_v63 = vld [vmem:[%s12556_s0 + $0x348] sm:$0xff]   ;;  %v9618_v27 = vld [vmem:[%s12556_s0 + $0x310] sm:$0xff]  }
 0x17f   :  { %12915 = vst [vmem:[#allocation117_spill] sm:$0xff] %v10984_v14  ;;  %12916 = vst [vmem:[#allocation118_spill] sm:$0xff] %v10986_v41  ;;  %v10996_v15 = vpop.f32.mrb[82].mxu0  ;;  %v10998_v6 = vpop.f32.mrb[82].mxu1 }
 0x180   :  { %12917 = vst [vmem:[#allocation119_spill] sm:$0xff] %v10996_v15  ;;  %12918 = vst [vmem:[#allocation120_spill] sm:$0xff] %v10998_v6  ;;  %v11008_v43 = vpop.f32.mrb[83].mxu0  ;;  %v11010_v48 = vpop.f32.mrb[83].mxu1 }
 0x181   :  { %12919 = vst [vmem:[#allocation121_spill] sm:$0xff] %v11008_v43  ;;  %12920 = vst [vmem:[#allocation122_spill] sm:$0xff] %v11010_v48 }
 0x182   :  { %9173 = vmatmul.mubr.msk.bf16.gmra.mrb[188].mxu0 %vm535_vm0, %v9612_v59  ;;  %9321 = vmatmul.mubr.msk.bf16.gmra.mrb[188].mxu1 %vm535_vm0, %v9613_v54  ;;  %v9616_v59 = vld [vmem:[%s12556_s0 + $0x308] sm:$0xff]  }
 0x183   :  { %9176 = vmatprep.mubr.msk.bf16.mxu0 %vm535_vm0, %v9614_v49  ;;  %9324 = vmatprep.mubr.msk.bf16.mxu1 %vm535_vm0, %v9615_v63  ;;  %v9617_v49 = vld [vmem:[%s12556_s0 + $0x350] sm:$0xff]  }
 0x185   :  { %v11018_v41 = vpop.f32.mrb[84].mxu0  ;;  %v11020_v14 = vpop.f32.mrb[84].mxu1 }
 0x186   :  { %12921 = vst [vmem:[#allocation123_spill] sm:$0xff] %v11018_v41  ;;  %12922 = vst [vmem:[#allocation124_spill] sm:$0xff] %v11020_v14  ;;  %v11024_v6 = vpop.f32.mrb[85].mxu0  ;;  %v11026_v15 = vpop.f32.mrb[85].mxu1  ;;  %v9619_v14 = vld [vmem:[%s12556_s0 + $0x358] sm:$0xff]  }
 0x187   :  { %12923 = vst [vmem:[#allocation125_spill] sm:$0xff] %v11024_v6  ;;  %12924 = vst [vmem:[#allocation126_spill] sm:$0xff] %v11026_v15  ;;  %v11036_v54 = vpop.f32.mrb[86].mxu0  ;;  %v11038_v62 = vpop.f32.mrb[86].mxu1  ;;  %v9622_v41 = vld [vmem:[%s12556_s0 + $0x3f8] sm:$0xff]  }
 0x188   :  { %12925 = vst [vmem:[#allocation127_spill] sm:$0xff] %v11036_v54  ;;  %12926 = vst [vmem:[#allocation128_spill] sm:$0xff] %v11038_v62  ;;  %v11048_v48 = vpop.f32.mrb[87].mxu0  ;;  %v11050_v43 = vpop.f32.mrb[87].mxu1 }
 0x189   :  { %12927 = vst [vmem:[#allocation129_spill] sm:$0xff] %v11048_v48  ;;  %12928 = vst [vmem:[#allocation130_spill] sm:$0xff] %v11050_v43 }
 0x18a   :  { %9177 = vmatmul.mubr.msk.bf16.gmra.mrb[192].mxu0 %vm535_vm0, %v9616_v59  ;;  %9325 = vmatmul.mubr.msk.bf16.gmra.mrb[192].mxu1 %vm535_vm0, %v9617_v49  ;;  %v9620_v59 = vld [vmem:[%s12556_s0 + $0x3f0] sm:$0xff]  }
 0x18b   :  { %9180 = vmatprep.mubr.msk.bf16.mxu0 %vm535_vm0, %v9618_v27  ;;  %9328 = vmatprep.mubr.msk.bf16.mxu1 %vm535_vm0, %v9619_v14  ;;  %v9621_v27 = vld [vmem:[%s12556_s0 + $0x438] sm:$0xff]  }
 0x18d   :  { %v11058_v15 = vpop.f32.mrb[88].mxu0  ;;  %v11060_v6 = vpop.f32.mrb[88].mxu1 }
 0x18e   :  { %12929 = vst [vmem:[#allocation131_spill] sm:$0xff] %v11058_v15  ;;  %12930 = vst [vmem:[#allocation132_spill] sm:$0xff] %v11060_v6  ;;  %v11064_v62 = vpop.f32.mrb[89].mxu0  ;;  %v11066_v54 = vpop.f32.mrb[89].mxu1  ;;  %v9623_v6 = vld [vmem:[%s12556_s0 + $0x440] sm:$0xff]   ;;  %v9626_v15 = vld [vmem:[%s12556_s0 + $0x408] sm:$0xff]  }
 0x18f   :  { %12931 = vst [vmem:[#allocation133_spill] sm:$0xff] %v11064_v62  ;;  %12932 = vst [vmem:[#allocation134_spill] sm:$0xff] %v11066_v54  ;;  %v11076_v49 = vpop.f32.mrb[90].mxu0  ;;  %v11078_v63 = vpop.f32.mrb[90].mxu1 }
 0x190   :  { %12933 = vst [vmem:[#allocation135_spill] sm:$0xff] %v11076_v49  ;;  %12934 = vst [vmem:[#allocation136_spill] sm:$0xff] %v11078_v63  ;;  %v11088_v43 = vpop.f32.mrb[91].mxu0  ;;  %v11090_v48 = vpop.f32.mrb[91].mxu1 }
 0x191   :  { %12935 = vst [vmem:[#allocation137_spill] sm:$0xff] %v11088_v43  ;;  %12936 = vst [vmem:[#allocation138_spill] sm:$0xff] %v11090_v48 }
 0x192   :  { %9181 = vmatmul.mubr.msk.bf16.gmra.mrb[196].mxu0 %vm535_vm0, %v9620_v59  ;;  %9329 = vmatmul.mubr.msk.bf16.gmra.mrb[196].mxu1 %vm535_vm0, %v9621_v27  ;;  %v9624_v59 = vld [vmem:[%s12556_s0 + $0x400] sm:$0xff]  }
 0x193   :  { %9184 = vmatprep.mubr.msk.bf16.mxu0 %vm535_vm0, %v9622_v41  ;;  %9332 = vmatprep.mubr.msk.bf16.mxu1 %vm535_vm0, %v9623_v6  ;;  %v9625_v41 = vld [vmem:[%s12556_s0 + $0x448] sm:$0xff]  }
 0x195   :  { %v11098_v54 = vpop.f32.mrb[92].mxu0  ;;  %v11100_v62 = vpop.f32.mrb[92].mxu1 }
 0x196   :  { %12937 = vst [vmem:[#allocation139_spill] sm:$0xff] %v11098_v54  ;;  %12938 = vst [vmem:[#allocation140_spill] sm:$0xff] %v11100_v62  ;;  %v11104_v63 = vpop.f32.mrb[93].mxu0  ;;  %v11106_v49 = vpop.f32.mrb[93].mxu1  ;;  %v9627_v62 = vld [vmem:[%s12556_s0 + $0x450] sm:$0xff]   ;;  %v9630_v54 = vld [vmem:[%s12556_s0 + $0x418] sm:$0xff]  }
 0x197   :  { %12939 = vst [vmem:[#allocation141_spill] sm:$0xff] %v11104_v63  ;;  %12940 = vst [vmem:[#allocation142_spill] sm:$0xff] %v11106_v49  ;;  %v11116_v27 = vpop.f32.mrb[94].mxu0  ;;  %v11118_v14 = vpop.f32.mrb[94].mxu1 }
 0x198   :  { %12941 = vst [vmem:[#allocation143_spill] sm:$0xff] %v11116_v27  ;;  %12942 = vst [vmem:[#allocation144_spill] sm:$0xff] %v11118_v14  ;;  %v11128_v48 = vpop.f32.mrb[95].mxu0  ;;  %v11130_v43 = vpop.f32.mrb[95].mxu1 }
 0x199   :  { %12943 = vst [vmem:[#allocation145_spill] sm:$0xff] %v11128_v48  ;;  %12944 = vst [vmem:[#allocation146_spill] sm:$0xff] %v11130_v43 }
 0x19a   :  { %9185 = vmatmul.mubr.msk.bf16.gmra.mrb[200].mxu0 %vm535_vm0, %v9624_v59  ;;  %9333 = vmatmul.mubr.msk.bf16.gmra.mrb[200].mxu1 %vm535_vm0, %v9625_v41  ;;  %v9628_v59 = vld [vmem:[%s12556_s0 + $0x410] sm:$0xff]  }
 0x19b   :  { %9188 = vmatprep.mubr.msk.bf16.mxu0 %vm535_vm0, %v9626_v15  ;;  %9336 = vmatprep.mubr.msk.bf16.mxu1 %vm535_vm0, %v9627_v62  ;;  %v9629_v15 = vld [vmem:[%s12556_s0 + $0x458] sm:$0xff]  }
 0x19d   :  { %v11138_v49 = vpop.f32.mrb[96].mxu0  ;;  %v11140_v63 = vpop.f32.mrb[96].mxu1 }
 0x19e   :  { %12945 = vst [vmem:[#allocation147_spill] sm:$0xff] %v11138_v49  ;;  %12946 = vst [vmem:[#allocation148_spill] sm:$0xff] %v11140_v63  ;;  %v11144_v14 = vpop.f32.mrb[97].mxu0  ;;  %v11146_v27 = vpop.f32.mrb[97].mxu1  ;;  %v9631_v63 = vld [vmem:[%s12556_s0 + $0x460] sm:$0xff]   ;;  %v9634_v49 = vld [vmem:[%s12556_s0 + $0x428] sm:$0xff]  }
 0x19f   :  { %12947 = vst [vmem:[#allocation149_spill] sm:$0xff] %v11144_v14  ;;  %12948 = vst [vmem:[#allocation150_spill] sm:$0xff] %v11146_v27  ;;  %v11156_v41 = vpop.f32.mrb[98].mxu0  ;;  %v11158_v6 = vpop.f32.mrb[98].mxu1 }
 0x1a0   :  { %12949 = vst [vmem:[#allocation151_spill] sm:$0xff] %v11156_v41  ;;  %12950 = vst [vmem:[#allocation152_spill] sm:$0xff] %v11158_v6  ;;  %v11168_v43 = vpop.f32.mrb[99].mxu0  ;;  %v11170_v48 = vpop.f32.mrb[99].mxu1 }
 0x1a1   :  { %12951 = vst [vmem:[#allocation153_spill] sm:$0xff] %v11168_v43  ;;  %12952 = vst [vmem:[#allocation154_spill] sm:$0xff] %v11170_v48 }
 0x1a2   :  { %9189 = vmatmul.mubr.msk.bf16.gmra.mrb[204].mxu0 %vm535_vm0, %v9628_v59  ;;  %9337 = vmatmul.mubr.msk.bf16.gmra.mrb[204].mxu1 %vm535_vm0, %v9629_v15  ;;  %v9632_v59 = vld [vmem:[%s12556_s0 + $0x420] sm:$0xff]  }
 0x1a3   :  { %9192 = vmatprep.mubr.msk.bf16.mxu0 %vm535_vm0, %v9630_v54  ;;  %9340 = vmatprep.mubr.msk.bf16.mxu1 %vm535_vm0, %v9631_v63  ;;  %v9633_v54 = vld [vmem:[%s12556_s0 + $0x468] sm:$0xff]  }
 0x1a5   :  { %v11178_v27 = vpop.f32.mrb[100].mxu0  ;;  %v11180_v14 = vpop.f32.mrb[100].mxu1 }
 0x1a6   :  { %12953 = vst [vmem:[#allocation155_spill] sm:$0xff] %v11178_v27  ;;  %12954 = vst [vmem:[#allocation156_spill] sm:$0xff] %v11180_v14  ;;  %v11184_v6 = vpop.f32.mrb[101].mxu0  ;;  %v11186_v41 = vpop.f32.mrb[101].mxu1  ;;  %v9635_v14 = vld [vmem:[%s12556_s0 + $0x470] sm:$0xff]  }
 0x1a7   :  { %12955 = vst [vmem:[#allocation157_spill] sm:$0xff] %v11184_v6  ;;  %12956 = vst [vmem:[#allocation158_spill] sm:$0xff] %v11186_v41  ;;  %v11196_v15 = vpop.f32.mrb[102].mxu0  ;;  %v11198_v62 = vpop.f32.mrb[102].mxu1  ;;  %v9638_v27 = vld [vmem:[%s12556_s0 + $0x510] sm:$0xff]  }
 0x1a8   :  { %12957 = vst [vmem:[#allocation159_spill] sm:$0xff] %v11196_v15  ;;  %12958 = vst [vmem:[#allocation160_spill] sm:$0xff] %v11198_v62  ;;  %v11208_v48 = vpop.f32.mrb[103].mxu0  ;;  %v11210_v43 = vpop.f32.mrb[103].mxu1 }
 0x1a9   :  { %12959 = vst [vmem:[#allocation161_spill] sm:$0xff] %v11208_v48  ;;  %12960 = vst [vmem:[#allocation162_spill] sm:$0xff] %v11210_v43 }
 0x1aa   :  { %9193 = vmatmul.mubr.msk.bf16.gmra.mrb[208].mxu0 %vm535_vm0, %v9632_v59  ;;  %9341 = vmatmul.mubr.msk.bf16.gmra.mrb[208].mxu1 %vm535_vm0, %v9633_v54  ;;  %v9636_v59 = vld [vmem:[%s12556_s0 + $0x430] sm:$0xff]  }
 0x1ab   :  { %9196 = vmatprep.mubr.msk.bf16.mxu0 %vm535_vm0, %v9634_v49  ;;  %9344 = vmatprep.mubr.msk.bf16.mxu1 %vm535_vm0, %v9635_v14  ;;  %v9637_v49 = vld [vmem:[%s12556_s0 + $0x478] sm:$0xff]  }
 0x1ad   :  { %v11218_v41 = vpop.f32.mrb[104].mxu0  ;;  %v11220_v6 = vpop.f32.mrb[104].mxu1 }
 0x1ae   :  { %12961 = vst [vmem:[#allocation163_spill] sm:$0xff] %v11218_v41  ;;  %12962 = vst [vmem:[#allocation164_spill] sm:$0xff] %v11220_v6  ;;  %v11224_v62 = vpop.f32.mrb[105].mxu0  ;;  %v11226_v15 = vpop.f32.mrb[105].mxu1  ;;  %v9639_v6 = vld [vmem:[%s12556_s0 + $0x558] sm:$0xff]   ;;  %v9642_v41 = vld [vmem:[%s12556_s0 + $0x520] sm:$0xff]  }
 0x1af   :  { %12963 = vst [vmem:[#allocation165_spill] sm:$0xff] %v11224_v62  ;;  %12964 = vst [vmem:[#allocation166_spill] sm:$0xff] %v11226_v15  ;;  %v11236_v54 = vpop.f32.mrb[106].mxu0  ;;  %v11238_v63 = vpop.f32.mrb[106].mxu1 }
 0x1b0   :  { %12965 = vst [vmem:[#allocation167_spill] sm:$0xff] %v11236_v54  ;;  %12966 = vst [vmem:[#allocation168_spill] sm:$0xff] %v11238_v63  ;;  %v11248_v43 = vpop.f32.mrb[107].mxu0  ;;  %v11250_v48 = vpop.f32.mrb[107].mxu1 }
 0x1b1   :  { %12967 = vst [vmem:[#allocation169_spill] sm:$0xff] %v11248_v43  ;;  %12968 = vst [vmem:[#allocation170_spill] sm:$0xff] %v11250_v48 }
 0x1b2   :  { %9197 = vmatmul.mubr.msk.bf16.gmra.mrb[212].mxu0 %vm535_vm0, %v9636_v59  ;;  %9345 = vmatmul.mubr.msk.bf16.gmra.mrb[212].mxu1 %vm535_vm0, %v9637_v49  ;;  %v9640_v59 = vld [vmem:[%s12556_s0 + $0x518] sm:$0xff]  }
 0x1b3   :  { %9200 = vmatprep.mubr.msk.bf16.mxu0 %vm535_vm0, %v9638_v27  ;;  %9348 = vmatprep.mubr.msk.bf16.mxu1 %vm535_vm0, %v9639_v6  ;;  %v9641_v27 = vld [vmem:[%s12556_s0 + $0x560] sm:$0xff]  }
 0x1b5   :  { %v11258_v15 = vpop.f32.mrb[108].mxu0  ;;  %v11260_v62 = vpop.f32.mrb[108].mxu1 }
 0x1b6   :  { %12969 = vst [vmem:[#allocation171_spill] sm:$0xff] %v11258_v15  ;;  %12970 = vst [vmem:[#allocation172_spill] sm:$0xff] %v11260_v62  ;;  %v11264_v63 = vpop.f32.mrb[109].mxu0  ;;  %v11266_v54 = vpop.f32.mrb[109].mxu1  ;;  %v9643_v62 = vld [vmem:[%s12556_s0 + $0x568] sm:$0xff]   ;;  %v9646_v15 = vld [vmem:[%s12556_s0 + $0x530] sm:$0xff]  }
 0x1b7   :  { %12971 = vst [vmem:[#allocation173_spill] sm:$0xff] %v11264_v63  ;;  %12972 = vst [vmem:[#allocation174_spill] sm:$0xff] %v11266_v54  ;;  %v11276_v49 = vpop.f32.mrb[110].mxu0  ;;  %v11278_v14 = vpop.f32.mrb[110].mxu1 }
 0x1b8   :  { %12973 = vst [vmem:[#allocation175_spill] sm:$0xff] %v11276_v49  ;;  %12974 = vst [vmem:[#allocation176_spill] sm:$0xff] %v11278_v14  ;;  %v11288_v48 = vpop.f32.mrb[111].mxu0  ;;  %v11290_v43 = vpop.f32.mrb[111].mxu1 }
 0x1b9   :  { %12975 = vst [vmem:[#allocation177_spill] sm:$0xff] %v11288_v48  ;;  %12976 = vst [vmem:[#allocation178_spill] sm:$0xff] %v11290_v43 }
 0x1ba   :  { %9201 = vmatmul.mubr.msk.bf16.gmra.mrb[216].mxu0 %vm535_vm0, %v9640_v59  ;;  %9349 = vmatmul.mubr.msk.bf16.gmra.mrb[216].mxu1 %vm535_vm0, %v9641_v27  ;;  %v9644_v59 = vld [vmem:[%s12556_s0 + $0x528] sm:$0xff]  }
 0x1bb   :  { %9204 = vmatprep.mubr.msk.bf16.mxu0 %vm535_vm0, %v9642_v41  ;;  %9352 = vmatprep.mubr.msk.bf16.mxu1 %vm535_vm0, %v9643_v62  ;;  %v9645_v41 = vld [vmem:[%s12556_s0 + $0x570] sm:$0xff]  }
 0x1bd   :  { %v11298_v54 = vpop.f32.mrb[112].mxu0  ;;  %v11300_v63 = vpop.f32.mrb[112].mxu1 }
 0x1be   :  { %12977 = vst [vmem:[#allocation179_spill] sm:$0xff] %v11298_v54  ;;  %12978 = vst [vmem:[#allocation180_spill] sm:$0xff] %v11300_v63  ;;  %v11304_v14 = vpop.f32.mrb[113].mxu0  ;;  %v11306_v49 = vpop.f32.mrb[113].mxu1  ;;  %v9647_v63 = vld [vmem:[%s12556_s0 + $0x578] sm:$0xff]   ;;  %v9650_v54 = vld [vmem:[%s12556_s0 + $0x540] sm:$0xff]  }
 0x1bf   :  { %12979 = vst [vmem:[#allocation181_spill] sm:$0xff] %v11304_v14  ;;  %12980 = vst [vmem:[#allocation182_spill] sm:$0xff] %v11306_v49  ;;  %v11316_v27 = vpop.f32.mrb[114].mxu0  ;;  %v11318_v6 = vpop.f32.mrb[114].mxu1 }
 0x1c0   :  { %12981 = vst [vmem:[#allocation183_spill] sm:$0xff] %v11316_v27  ;;  %12982 = vst [vmem:[#allocation184_spill] sm:$0xff] %v11318_v6  ;;  %v11328_v43 = vpop.f32.mrb[115].mxu0  ;;  %v11330_v48 = vpop.f32.mrb[115].mxu1 }
 0x1c1   :  { %12983 = vst [vmem:[#allocation185_spill] sm:$0xff] %v11328_v43  ;;  %12984 = vst [vmem:[#allocation186_spill] sm:$0xff] %v11330_v48 }
 0x1c2   :  { %9205 = vmatmul.mubr.msk.bf16.gmra.mrb[220].mxu0 %vm535_vm0, %v9644_v59  ;;  %9353 = vmatmul.mubr.msk.bf16.gmra.mrb[220].mxu1 %vm535_vm0, %v9645_v41  ;;  %v9648_v59 = vld [vmem:[%s12556_s0 + $0x538] sm:$0xff]  }
 0x1c3   :  { %9208 = vmatprep.mubr.msk.bf16.mxu0 %vm535_vm0, %v9646_v15  ;;  %9356 = vmatprep.mubr.msk.bf16.mxu1 %vm535_vm0, %v9647_v63  ;;  %v9649_v15 = vld [vmem:[%s12556_s0 + $0x580] sm:$0xff]  }
 0x1c5   :  { %v11338_v49 = vpop.f32.mrb[116].mxu0  ;;  %v11340_v14 = vpop.f32.mrb[116].mxu1 }
 0x1c6   :  { %12985 = vst [vmem:[#allocation187_spill] sm:$0xff] %v11338_v49  ;;  %12986 = vst [vmem:[#allocation188_spill] sm:$0xff] %v11340_v14  ;;  %v11344_v6 = vpop.f32.mrb[117].mxu0  ;;  %v11346_v27 = vpop.f32.mrb[117].mxu1  ;;  %v9651_v14 = vld [vmem:[%s12556_s0 + $0x588] sm:$0xff]   ;;  %v9654_v49 = vld [vmem:[%s12556_s0 + $0x550] sm:$0xff]  }
 0x1c7   :  { %12987 = vst [vmem:[#allocation189_spill] sm:$0xff] %v11344_v6  ;;  %12988 = vst [vmem:[#allocation190_spill] sm:$0xff] %v11346_v27  ;;  %v11356_v41 = vpop.f32.mrb[118].mxu0  ;;  %v11358_v62 = vpop.f32.mrb[118].mxu1 }
 0x1c8   :  { %12989 = vst [vmem:[#allocation191_spill] sm:$0xff] %v11356_v41  ;;  %12990 = vst [vmem:[#allocation192_spill] sm:$0xff] %v11358_v62  ;;  %v11368_v48 = vpop.f32.mrb[119].mxu0  ;;  %v11370_v43 = vpop.f32.mrb[119].mxu1 }
 0x1c9   :  { %12991 = vst [vmem:[#allocation193_spill] sm:$0xff] %v11368_v48  ;;  %12992 = vst [vmem:[#allocation194_spill] sm:$0xff] %v11370_v43 }
 0x1ca   :  { %9209 = vmatmul.mubr.msk.bf16.gmra.mrb[224].mxu0 %vm535_vm0, %v9648_v59  ;;  %9357 = vmatmul.mubr.msk.bf16.gmra.mrb[224].mxu1 %vm535_vm0, %v9649_v15  ;;  %v9652_v59 = vld [vmem:[%s12556_s0 + $0x548] sm:$0xff]  }
 0x1cb   :  { %9212 = vmatprep.mubr.msk.bf16.mxu0 %vm535_vm0, %v9650_v54  ;;  %9360 = vmatprep.mubr.msk.bf16.mxu1 %vm535_vm0, %v9651_v14  ;;  %v9653_v54 = vld [vmem:[%s12556_s0 + $0x590] sm:$0xff]  }
 0x1cd   :  { %v11378_v27 = vpop.f32.mrb[120].mxu0  ;;  %v11380_v6 = vpop.f32.mrb[120].mxu1 }
 0x1ce   :  { %12993 = vst [vmem:[#allocation195_spill] sm:$0xff] %v11378_v27  ;;  %12994 = vst [vmem:[#allocation196_spill] sm:$0xff] %v11380_v6  ;;  %v11384_v62 = vpop.f32.mrb[121].mxu0  ;;  %v11386_v41 = vpop.f32.mrb[121].mxu1  ;;  %v9655_v6 = vld [vmem:[%s12556_s0 + $0x598] sm:$0xff]  }
 0x1cf   :  { %12995 = vst [vmem:[#allocation197_spill] sm:$0xff] %v11384_v62  ;;  %12996 = vst [vmem:[#allocation198_spill] sm:$0xff] %v11386_v41  ;;  %v11396_v15 = vpop.f32.mrb[122].mxu0  ;;  %v11398_v63 = vpop.f32.mrb[122].mxu1  ;;  %v9658_v27 = vld [vmem:[%s12556_s0 + $0x638] sm:$0xff]  }
 0x1d0   :  { %12997 = vst [vmem:[#allocation199_spill] sm:$0xff] %v11396_v15  ;;  %12998 = vst [vmem:[#allocation200_spill] sm:$0xff] %v11398_v63  ;;  %v11408_v43 = vpop.f32.mrb[123].mxu0  ;;  %v11410_v48 = vpop.f32.mrb[123].mxu1 }
 0x1d1   :  { %12999 = vst [vmem:[#allocation201_spill] sm:$0xff] %v11408_v43  ;;  %13000 = vst [vmem:[#allocation202_spill] sm:$0xff] %v11410_v48 }
 0x1d2   :  { %9213 = vmatmul.mubr.msk.bf16.gmra.mrb[228].mxu0 %vm535_vm0, %v9652_v59  ;;  %9361 = vmatmul.mubr.msk.bf16.gmra.mrb[228].mxu1 %vm535_vm0, %v9653_v54  ;;  %v9656_v59 = vld [vmem:[%s12556_s0 + $0x630] sm:$0xff]  }
 0x1d3   :  { %9216 = vmatprep.mubr.msk.bf16.mxu0 %vm535_vm0, %v9654_v49  ;;  %9364 = vmatprep.mubr.msk.bf16.mxu1 %vm535_vm0, %v9655_v6  ;;  %v9657_v49 = vld [vmem:[%s12556_s0 + $0x678] sm:$0xff]  }
 0x1d5   :  { %v11418_v41 = vpop.f32.mrb[124].mxu0  ;;  %v11420_v62 = vpop.f32.mrb[124].mxu1 }
 0x1d6   :  { %13001 = vst [vmem:[#allocation203_spill] sm:$0xff] %v11418_v41  ;;  %13002 = vst [vmem:[#allocation204_spill] sm:$0xff] %v11420_v62  ;;  %v11424_v63 = vpop.f32.mrb[125].mxu0  ;;  %v11426_v15 = vpop.f32.mrb[125].mxu1  ;;  %v9659_v62 = vld [vmem:[%s12556_s0 + $0x680] sm:$0xff]   ;;  %v9662_v41 = vld [vmem:[%s12556_s0 + $0x648] sm:$0xff]  }
 0x1d7   :  { %13003 = vst [vmem:[#allocation205_spill] sm:$0xff] %v11424_v63  ;;  %13004 = vst [vmem:[#allocation206_spill] sm:$0xff] %v11426_v15  ;;  %v11436_v54 = vpop.f32.mrb[126].mxu0  ;;  %v11438_v14 = vpop.f32.mrb[126].mxu1 }
 0x1d8   :  { %13005 = vst [vmem:[#allocation207_spill] sm:$0xff] %v11436_v54  ;;  %13006 = vst [vmem:[#allocation208_spill] sm:$0xff] %v11438_v14  ;;  %v11448_v48 = vpop.f32.mrb[127].mxu0  ;;  %v11450_v43 = vpop.f32.mrb[127].mxu1 }
 0x1d9   :  { %13007 = vst [vmem:[#allocation209_spill] sm:$0xff] %v11448_v48  ;;  %13008 = vst [vmem:[#allocation210_spill] sm:$0xff] %v11450_v43 }
 0x1da   :  { %9217 = vmatmul.mubr.msk.bf16.gmra.mrb[232].mxu0 %vm535_vm0, %v9656_v59  ;;  %9365 = vmatmul.mubr.msk.bf16.gmra.mrb[232].mxu1 %vm535_vm0, %v9657_v49  ;;  %v9660_v59 = vld [vmem:[%s12556_s0 + $0x640] sm:$0xff]  }
 0x1db   :  { %9220 = vmatprep.mubr.msk.bf16.mxu0 %vm535_vm0, %v9658_v27  ;;  %9368 = vmatprep.mubr.msk.bf16.mxu1 %vm535_vm0, %v9659_v62  ;;  %v9661_v27 = vld [vmem:[%s12556_s0 + $0x688] sm:$0xff]  }
 0x1dd   :  { %v11458_v15 = vpop.f32.mrb[128].mxu0  ;;  %v11460_v63 = vpop.f32.mrb[128].mxu1 }
 0x1de   :  { %13009 = vst [vmem:[#allocation211_spill] sm:$0xff] %v11458_v15  ;;  %13010 = vst [vmem:[#allocation212_spill] sm:$0xff] %v11460_v63  ;;  %v11464_v14 = vpop.f32.mrb[129].mxu0  ;;  %v11466_v54 = vpop.f32.mrb[129].mxu1  ;;  %v9663_v63 = vld [vmem:[%s12556_s0 + $0x690] sm:$0xff]   ;;  %v9666_v15 = vld [vmem:[%s12556_s0 + $0x658] sm:$0xff]  }
 0x1df   :  { %13011 = vst [vmem:[#allocation213_spill] sm:$0xff] %v11464_v14  ;;  %13012 = vst [vmem:[#allocation214_spill] sm:$0xff] %v11466_v54  ;;  %v11476_v49 = vpop.f32.mrb[130].mxu0  ;;  %v11478_v6 = vpop.f32.mrb[130].mxu1 }
 0x1e0   :  { %13013 = vst [vmem:[#allocation215_spill] sm:$0xff] %v11476_v49  ;;  %13014 = vst [vmem:[#allocation216_spill] sm:$0xff] %v11478_v6  ;;  %v11488_v43 = vpop.f32.mrb[131].mxu0  ;;  %v11490_v48 = vpop.f32.mrb[131].mxu1 }
 0x1e1   :  { %13015 = vst [vmem:[#allocation217_spill] sm:$0xff] %v11488_v43  ;;  %13016 = vst [vmem:[#allocation218_spill] sm:$0xff] %v11490_v48 }
 0x1e2   :  { %9221 = vmatmul.mubr.msk.bf16.gmra.mrb[236].mxu0 %vm535_vm0, %v9660_v59  ;;  %9369 = vmatmul.mubr.msk.bf16.gmra.mrb[236].mxu1 %vm535_vm0, %v9661_v27  ;;  %v9664_v59 = vld [vmem:[%s12556_s0 + $0x650] sm:$0xff]  }
 0x1e3   :  { %9224 = vmatprep.mubr.msk.bf16.mxu0 %vm535_vm0, %v9662_v41  ;;  %9372 = vmatprep.mubr.msk.bf16.mxu1 %vm535_vm0, %v9663_v63  ;;  %v9665_v41 = vld [vmem:[%s12556_s0 + $0x698] sm:$0xff]  }
 0x1e5   :  { %v11498_v54 = vpop.f32.mrb[132].mxu0  ;;  %v11500_v14 = vpop.f32.mrb[132].mxu1 }
 0x1e6   :  { %13017 = vst [vmem:[#allocation219_spill] sm:$0xff] %v11498_v54  ;;  %13018 = vst [vmem:[#allocation220_spill] sm:$0xff] %v11500_v14  ;;  %v11504_v6 = vpop.f32.mrb[133].mxu0  ;;  %v11506_v49 = vpop.f32.mrb[133].mxu1  ;;  %v9667_v14 = vld [vmem:[%s12556_s0 + $0x6a0] sm:$0xff]   ;;  %v9670_v54 = vld [vmem:[%s12556_s0 + $0x668] sm:$0xff]  }
 0x1e7   :  { %13019 = vst [vmem:[#allocation221_spill] sm:$0xff] %v11504_v6  ;;  %13020 = vst [vmem:[#allocation222_spill] sm:$0xff] %v11506_v49  ;;  %v11516_v27 = vpop.f32.mrb[134].mxu0  ;;  %v11518_v62 = vpop.f32.mrb[134].mxu1 }
 0x1e8   :  { %13021 = vst [vmem:[#allocation223_spill] sm:$0xff] %v11516_v27  ;;  %13022 = vst [vmem:[#allocation224_spill] sm:$0xff] %v11518_v62  ;;  %v11528_v48 = vpop.f32.mrb[135].mxu0  ;;  %v11530_v43 = vpop.f32.mrb[135].mxu1 }
 0x1e9   :  { %13023 = vst [vmem:[#allocation225_spill] sm:$0xff] %v11528_v48  ;;  %13024 = vst [vmem:[#allocation226_spill] sm:$0xff] %v11530_v43 }
 0x1ea   :  { %9225 = vmatmul.mubr.msk.bf16.gmra.mrb[240].mxu0 %vm535_vm0, %v9664_v59  ;;  %9373 = vmatmul.mubr.msk.bf16.gmra.mrb[240].mxu1 %vm535_vm0, %v9665_v41  ;;  %v9668_v59 = vld [vmem:[%s12556_s0 + $0x660] sm:$0xff]  }
 0x1eb   :  { %9228 = vmatprep.mubr.msk.bf16.mxu0 %vm535_vm0, %v9666_v15  ;;  %9376 = vmatprep.mubr.msk.bf16.mxu1 %vm535_vm0, %v9667_v14  ;;  %v9669_v15 = vld [vmem:[%s12556_s0 + $0x6a8] sm:$0xff]  }
 0x1ed   :  { %v11538_v49 = vpop.f32.mrb[136].mxu0  ;;  %v11540_v6 = vpop.f32.mrb[136].mxu1 }
 0x1ee   :  { %13025 = vst [vmem:[#allocation227_spill] sm:$0xff] %v11538_v49  ;;  %13026 = vst [vmem:[#allocation228_spill] sm:$0xff] %v11540_v6  ;;  %v11544_v62 = vpop.f32.mrb[137].mxu0  ;;  %v11546_v27 = vpop.f32.mrb[137].mxu1  ;;  %v9671_v6 = vld [vmem:[%s12556_s0 + $0x6b0] sm:$0xff]  }
 0x1ef   :  { %13027 = vst [vmem:[#allocation229_spill] sm:$0xff] %v11544_v62  ;;  %13028 = vst [vmem:[#allocation230_spill] sm:$0xff] %v11546_v27  ;;  %v11556_v41 = vpop.f32.mrb[138].mxu0  ;;  %v11558_v63 = vpop.f32.mrb[138].mxu1  ;;  %v9674_v49 = vld [vmem:[%s12556_s0 + $0x750] sm:$0xff]  }
 0x1f0   :  { %13029 = vst [vmem:[#allocation231_spill] sm:$0xff] %v11556_v41  ;;  %13030 = vst [vmem:[#allocation232_spill] sm:$0xff] %v11558_v63  ;;  %v11568_v43 = vpop.f32.mrb[139].mxu0  ;;  %v11570_v48 = vpop.f32.mrb[139].mxu1 }
 0x1f1   :  { %13031 = vst [vmem:[#allocation233_spill] sm:$0xff] %v11568_v43  ;;  %13032 = vst [vmem:[#allocation234_spill] sm:$0xff] %v11570_v48 }
 0x1f2   :  { %9229 = vmatmul.mubr.msk.bf16.gmra.mrb[244].mxu0 %vm535_vm0, %v9668_v59  ;;  %9377 = vmatmul.mubr.msk.bf16.gmra.mrb[244].mxu1 %vm535_vm0, %v9669_v15  ;;  %v9672_v59 = vld [vmem:[%s12556_s0 + $0x670] sm:$0xff]  }
 0x1f3   :  { %9232 = vmatprep.mubr.msk.bf16.mxu0 %vm535_vm0, %v9670_v54  ;;  %9380 = vmatprep.mubr.msk.bf16.mxu1 %vm535_vm0, %v9671_v6  ;;  %v9673_v54 = vld [vmem:[%s12556_s0 + $0x6b8] sm:$0xff]  }
 0x1f4   :  { %v9676_v6 = vld [vmem:[%s12556_s0 + $0x758] sm:$0xff]  }
 0x1f5   :  { %v11578_v27 = vpop.f32.mrb[140].mxu0  ;;  %v11580_v62 = vpop.f32.mrb[140].mxu1 }
 0x1f6   :  { %13033 = vst [vmem:[#allocation235_spill] sm:$0xff] %v11578_v27  ;;  %13034 = vst [vmem:[#allocation236_spill] sm:$0xff] %v11580_v62  ;;  %v11584_v63 = vpop.f32.mrb[141].mxu0  ;;  %v11586_v41 = vpop.f32.mrb[141].mxu1  ;;  %v9675_v62 = vld [vmem:[%s12556_s0 + $0x798] sm:$0xff]   ;;  %v13041_v27 = vmax.f32 %v10184_v50, %v10186_v51 }
 0x1f7   :  { %13035 = vst [vmem:[#allocation237_spill] sm:$0xff] %v11584_v63  ;;  %13036 = vst [vmem:[#allocation238_spill] sm:$0xff] %v11586_v41  ;;  %v11596_v15 = vpop.f32.mrb[142].mxu0  ;;  %v11598_v14 = vpop.f32.mrb[142].mxu1 }
 0x1f8   :  { %13037 = vst [vmem:[#allocation239_spill] sm:$0xff] %v11596_v15  ;;  %13038 = vst [vmem:[#allocation240_spill] sm:$0xff] %v11598_v14  ;;  %v11608_v48 = vpop.f32.mrb[143].mxu0  ;;  %v11610_v43 = vpop.f32.mrb[143].mxu1 }
 0x1f9   :  { %13039 = vst [vmem:[#allocation241_spill] sm:$0xff] %v11608_v48  ;;  %13040 = vst [vmem:[#allocation242_spill] sm:$0xff] %v11610_v43  ;;  %v13043_v48 = vmax.f32 %v10194_v55, %v10196_v56 }
 0x1fa   :  { %9233 = vmatmul.mubr.msk.bf16.gmra.mrb[248].mxu0 %vm535_vm0, %v9672_v59  ;;  %9381 = vmatmul.mubr.msk.bf16.gmra.mrb[248].mxu1 %vm535_vm0, %v9673_v54  ;;  %v9677_v59 = vld [vmem:[%s12556_s0 + $0x7a0] sm:$0xff]   ;;  %v9679_v54 = vld [vmem:[%s12556_s0 + $0x7a8] sm:$0xff]  }
 0x1fb   :  { %9236 = vmatprep.mubr.msk.bf16.mxu0 %vm535_vm0, %v9674_v49  ;;  %9384 = vmatprep.mubr.msk.bf16.mxu1 %vm535_vm0, %v9675_v62  ;;  %v11630_v62 = vld [vmem:[%s12557_s2] ss:$0 sm:$0xff]  ;;  %v13042_v49 = vmax.f32 %v10188_v52, %v10190_v53  ;;  %v13044_v52 = vmax.f32 %v10206_v60, %v10208_v61 }
 0x1fd   :  { %v9130_v41 = vpop.f32.mrb[144].mxu0  ;;  %v9278_v63 = vpop.f32.mrb[144].mxu1 }
 0x1fe   :  { %v4167_v14 = vmax.f32 %v13041_v27, %v9130_v41  ;;  %v3590_v15 = vpop.f32.mrb[145].mxu0  ;;  %v5064_v42 = vpop.f32.mrb[145].mxu1  ;;  %v9678_v41 = vld [vmem:[%s12556_s0 + $0x760] sm:$0xff]  }
 0x1ff   :  { %v4165_v50 = vmax.f32 %v13042_v49, %v3590_v15  ;;  %v9131_v51 = vpop.f32.mrb[146].mxu0  ;;  %v9279_v27 = vpop.f32.mrb[146].mxu1 }
 0x200   :  { %v5641_v43 = vmax.f32 %v4167_v14, %v9278_v63  ;;  %v4168_v11 = vmax.f32 %v13043_v48, %v9131_v51  ;;  %v3593_v38 = vpop.f32.mrb[147].mxu0  ;;  %v5067_v22 = vpop.f32.mrb[147].mxu1  ;;  %v13045_v48 = vmax.f32 %v10224_v2, %v10226_v3  ;;  %v13046_v51 = vmax.f32 %v10228_v4, %v10230_v5  ;;  %v9682_v2 = vld [vmem:[%s12556_s0 + $0x770] sm:$0xff]   ;;  %v9683_v3 = vld [vmem:[%s12556_s0 + $0x7b8] sm:$0xff]  }
 0x201   :  { %v5639_v30 = vmax.f32 %v4165_v50, %v5064_v42  ;;  %v4166_v53 = vmax.f32 %v13044_v52, %v3593_v38 }
 0x202   :  { %v5792_v15 = vadd.f32 %v11630_v62, %v5641_v43  ;;  %v5642_v49 = vmax.f32 %v4168_v11, %v9279_v27  ;;  %9237 = vmatmul.mubr.msk.bf16.gmra.mrb[252].mxu0 %vm535_vm0, %v9676_v6  ;;  %9385 = vmatmul.mubr.msk.bf16.gmra.mrb[252].mxu1 %vm535_vm0, %v9677_v59 }
 0x203   :  { %v5790_v63 = vadd.f32 %v11630_v62, %v5639_v30  ;;  %v5640_v14 = vmax.f32 %v4166_v53, %v5067_v22  ;;  %9240 = vmatprep.mubr.msk.bf16.mxu0 %vm535_vm0, %v9678_v41  ;;  %9388 = vmatprep.mubr.msk.bf16.mxu1 %vm535_vm0, %v9679_v54  ;;  %v9680_v22 = vld [vmem:[%s12556_s0 + $0x768] sm:$0xff]   ;;  %v9681_v30 = vld [vmem:[%s12556_s0 + $0x7b0] sm:$0xff]  }
 0x204   :  { %v5793_v55 = vadd.f32 %v11630_v62, %v5642_v49  ;;  %v5936_v38 = vmax.f32 %v5792_v15, 0.0  ;;  %v13047_v15 = vmax.f32 %v10234_v7, %v10236_v8 }
 0x205   :  { %v5791_v56 = vadd.f32 %v11630_v62, %v5640_v14  ;;  %v9134_v60 = vpop.f32.mrb[148].mxu0  ;;  %v9282_v61 = vpop.f32.mrb[148].mxu1  ;;  %v5934_v59 = vmax.f32 %v5790_v63, 0.0 }
 0x206   :  { %v5937_v43 = vmax.f32 %v5793_v55, 0.0  ;;  %v4171_v11 = vmax.f32 %v13045_v48, %v9134_v60  ;;  %v3606_v42 = vpop.f32.mrb[149].mxu0  ;;  %v5080_v6 = vpop.f32.mrb[149].mxu1  ;;  %v13048_v55 = vmax.f32 %v10246_v12, %v10248_v13 }
 0x207   :  { %v5935_v50 = vmax.f32 %v5791_v56, 0.0  ;;  %v4169_v27 = vmax.f32 %v13046_v51, %v3606_v42  ;;  %v9135_v41 = vpop.f32.mrb[150].mxu0  ;;  %v9283_v54 = vpop.f32.mrb[150].mxu1  ;;  %v13049_v42 = vmax.f32 %v10264_v18, %v10266_v19  ;;  %v9686_v18 = vld [vmem:[%s12556_s0 + $0x780] sm:$0xff]   ;;  %v9687_v19 = vld [vmem:[%s12556_s0 + $0x7c8] sm:$0xff]  }
 0x208   :  { %v8109_v52 = vpack.c.bf16 %v5937_v43, %v5936_v38  ;;  %v5645_v53 = vmax.f32 %v4171_v11, %v9282_v61  ;;  %v4172_v49 = vmax.f32 %v13047_v15, %v9135_v41  ;;  %v3609_v63 = vpop.f32.mrb[151].mxu0  ;;  %v5083_v14 = vpop.f32.mrb[151].mxu1  ;;  %v13050_v41 = vmax.f32 %v10268_v20, %v10270_v21 }
 0x209   :  { %v8104_v4 = vpack.c.bf16 %v5935_v50, %v5934_v59  ;;  %v5643_v5 = vmax.f32 %v4169_v27, %v5080_v6  ;;  %v4170_v56 = vmax.f32 %v13048_v55, %v3609_v63  ;;  %v9684_v59 = vld [vmem:[%s12556_s0 + $0x778] sm:$0xff]   ;;  %v9685_v50 = vld [vmem:[%s12556_s0 + $0x7c0] sm:$0xff]   ;;  %v13051_v15 = vmax.f32 %v10274_v23, %v10276_v24 }
 0x20a   :  { %8461 = vst [vmem:[%s12558_s3 + $0x8] sm:$0xff] %v8109_v52   ;;  %v5796_v60 = vadd.f32 %v11630_v62, %v5645_v53  ;;  %v5646_v38 = vmax.f32 %v4172_v49, %v9283_v54  ;;  %9241 = vmatmul.mubr.msk.bf16.gmra.mrb[0].mxu0 %vm535_vm0, %v9680_v22  ;;  %9389 = vmatmul.mubr.msk.bf16.gmra.mrb[0].mxu1 %vm535_vm0, %v9681_v30 }
 0x20b   :  { %8105 = vst [vmem:[%s12558_s3] sm:$0xff] %v8104_v4   ;;  %v5794_v7 = vadd.f32 %v11630_v62, %v5643_v5  ;;  %v5644_v8 = vmax.f32 %v4170_v56, %v5083_v14  ;;  %9244 = vmatprep.mubr.msk.bf16.mxu0 %vm535_vm0, %v9682_v2  ;;  %9392 = vmatprep.mubr.msk.bf16.mxu1 %vm535_vm0, %v9683_v3 }
 0x20c   :  { %v5797_v12 = vadd.f32 %v11630_v62, %v5646_v38  ;;  %v5940_v48 = vmax.f32 %v5796_v60, 0.0  ;;  %v13052_v4 = vmax.f32 %v10286_v28, %v10288_v29 }
 0x20d   :  { %v5795_v13 = vadd.f32 %v11630_v62, %v5644_v8  ;;  %v9138_v61 = vpop.f32.mrb[152].mxu0  ;;  %v9286_v43 = vpop.f32.mrb[152].mxu1  ;;  %v5938_v51 = vmax.f32 %v5794_v7, 0.0 }
 0x20e   :  { %v5941_v11 = vmax.f32 %v5797_v12, 0.0  ;;  %v4175_v6 = vmax.f32 %v13049_v42, %v9138_v61  ;;  %v3622_v22 = vpop.f32.mrb[153].mxu0  ;;  %v5096_v30 = vpop.f32.mrb[153].mxu1  ;;  %v13053_v12 = vmax.f32 %v10304_v34, %v10306_v35  ;;  %v9690_v34 = vld [vmem:[%s12556_s0 + $0x790] sm:$0xff]   ;;  %v9691_v35 = vld [vmem:[%s12556_s0 + $0x7d8] sm:$0xff]  }
 0x20f   :  { %v5939_v27 = vmax.f32 %v5795_v13, 0.0  ;;  %v4173_v54 = vmax.f32 %v13050_v41, %v3622_v22  ;;  %v9139_v2 = vpop.f32.mrb[154].mxu0  ;;  %v9287_v3 = vpop.f32.mrb[154].mxu1  ;;  %v13054_v22 = vmax.f32 %v10308_v36, %v10310_v37  ;;  %v13055_v41 = vmax.f32 %v10314_v39, %v10316_v40 }
 0x210   :  { %v8119_v52 = vpack.c.bf16 %v5941_v11, %v5940_v48  ;;  %v5649_v53 = vmax.f32 %v4175_v6, %v9286_v43  ;;  %v4176_v49 = vmax.f32 %v13051_v15, %v9139_v2  ;;  %v3625_v63 = vpop.f32.mrb[155].mxu0  ;;  %v5099_v14 = vpop.f32.mrb[155].mxu1  ;;  %v9688_v48 = vld [vmem:[%s12556_s0 + $0x788] sm:$0xff]   ;;  %v9689_v11 = vld [vmem:[%s12556_s0 + $0x7d0] sm:$0xff]  }
 0x211   :  { %v8114_v20 = vpack.c.bf16 %v5939_v27, %v5938_v51  ;;  %v5647_v21 = vmax.f32 %v4173_v54, %v5096_v30  ;;  %v4174_v5 = vmax.f32 %v13052_v4, %v3625_v63 }
 0x212   :  { %8463 = vst [vmem:[%s12558_s3 + $0x18] sm:$0xff] %v8119_v52   ;;  %v5800_v55 = vadd.f32 %v11630_v62, %v5649_v53  ;;  %v5650_v56 = vmax.f32 %v4176_v49, %v9287_v3  ;;  %9245 = vmatmul.mubr.msk.bf16.gmra.mrb[4].mxu0 %vm535_vm0, %v9684_v59  ;;  %9393 = vmatmul.mubr.msk.bf16.gmra.mrb[4].mxu1 %vm535_vm0, %v9685_v50 }
 0x213   :  { %8462 = vst [vmem:[%s12558_s3 + $0x10] sm:$0xff] %v8114_v20   ;;  %v5798_v23 = vadd.f32 %v11630_v62, %v5647_v21  ;;  %v5648_v24 = vmax.f32 %v4174_v5, %v5099_v14  ;;  %9248 = vmatprep.mubr.msk.bf16.mxu0 %vm535_vm0, %v9686_v18  ;;  %9396 = vmatprep.mubr.msk.bf16.mxu1 %vm535_vm0, %v9687_v19 }
 0x214   :  { %v5801_v28 = vadd.f32 %v11630_v62, %v5650_v56  ;;  %v5944_v7 = vmax.f32 %v5800_v55, 0.0  ;;  %v13056_v18 = vmax.f32 %v10326_v44, %v10328_v45  ;;  %v13057_v20 = vmax.f32 %v10344_v57, %v10346_v58  ;;  %v9692_v55 = vld [vmem:[%s12556_s0 + $0x870] sm:$0xff]   ;;  %v9693_v56 = vld [vmem:[%s12556_s0 + $0x8b8] sm:$0xff]   ;;  %v9695_v58 = vld [vmem:[%s12556_s0 + $0x8c0] sm:$0xff]  }
 0x215   :  { %v5799_v29 = vadd.f32 %v11630_v62, %v5648_v24  ;;  %v9142_v60 = vpop.f32.mrb[156].mxu0  ;;  %v9290_v38 = vpop.f32.mrb[156].mxu1  ;;  %v5942_v42 = vmax.f32 %v5798_v23, 0.0  ;;  %v9694_v57 = vld [vmem:[%s12556_s0 + $0x878] sm:$0xff]  }
 0x216   :  { %v5945_v8 = vmax.f32 %v5801_v28, 0.0  ;;  %v4179_v13 = vmax.f32 %v13053_v12, %v9142_v60  ;;  %v3638_v61 = vpop.f32.mrb[157].mxu0  ;;  %v5112_v43 = vpop.f32.mrb[157].mxu1  ;;  %v13058_v28 = vmax.f32 %v10348_v0, %v10350_v1  ;;  %v13059_v12 = vmax.f32 %v10354_v10, %v10356_v16 }
 0x217   :  { %v5943_v6 = vmax.f32 %v5799_v29, 0.0  ;;  %v4177_v30 = vmax.f32 %v13054_v22, %v3638_v61  ;;  %v9143_v59 = vpop.f32.mrb[158].mxu0  ;;  %v9291_v50 = vpop.f32.mrb[158].mxu1 }
 0x218   :  { %v8129_v51 = vpack.c.bf16 %v5945_v8, %v5944_v7  ;;  %v5653_v27 = vmax.f32 %v4179_v13, %v9290_v38  ;;  %v4180_v54 = vmax.f32 %v13055_v41, %v9143_v59  ;;  %v3641_v2 = vpop.f32.mrb[159].mxu0  ;;  %v5115_v3 = vpop.f32.mrb[159].mxu1  ;;  %v9696_v41 = vld [vmem:[%s12556_s0 + $0x880] sm:$0xff]  }
 0x219   :  { %v8124_v36 = vpack.c.bf16 %v5943_v6, %v5942_v42  ;;  %v5651_v37 = vmax.f32 %v4177_v30, %v5112_v43  ;;  %v4178_v19 = vmax.f32 %v13056_v18, %v3641_v2 }
 0x21a   :  { %8465 = vst [vmem:[%s12558_s3 + $0x28] sm:$0xff] %v8129_v51   ;;  %v5804_v52 = vadd.f32 %v11630_v62, %v5653_v27  ;;  %v5654_v53 = vmax.f32 %v4180_v54, %v9291_v50  ;;  %9249 = vmatmul.mubr.msk.bf16.gmra.mrb[8].mxu0 %vm535_vm0, %v9688_v48  ;;  %9397 = vmatmul.mubr.msk.bf16.gmra.mrb[8].mxu1 %vm535_vm0, %v9689_v11  ;;  %v9697_v54 = vld [vmem:[%s12556_s0 + $0x8c8] sm:$0xff]  }
 0x21b   :  { %8464 = vst [vmem:[%s12558_s3 + $0x20] sm:$0xff] %v8124_v36   ;;  %v5802_v39 = vadd.f32 %v11630_v62, %v5651_v37  ;;  %v5652_v40 = vmax.f32 %v4178_v19, %v5115_v3  ;;  %9252 = vmatprep.mubr.msk.bf16.mxu0 %vm535_vm0, %v9690_v34  ;;  %9400 = vmatprep.mubr.msk.bf16.mxu1 %vm535_vm0, %v9691_v35 }
 0x21c   :  { %v5805_v44 = vadd.f32 %v11630_v62, %v5654_v53  ;;  %v5948_v63 = vmax.f32 %v5804_v52, 0.0  ;;  %v13060_v48 = vmax.f32 %v10366_v32, %v10368_v33  ;;  %v13061_v34 = vmax.f32 %v10378_v9, %v10380_v26  ;;  %v9698_v9 = vld [vmem:[%s12556_s0 + $0x888] sm:$0xff]   ;;  %v9699_v26 = vld [vmem:[%s12556_s0 + $0x8d0] sm:$0xff]  }
 0x21d   :  { %v5803_v45 = vadd.f32 %v11630_v62, %v5652_v40  ;;  %v9146_v15 = vpop.f32.mrb[160].mxu0  ;;  %v9294_v49 = vpop.f32.mrb[160].mxu1  ;;  %v5946_v23 = vmax.f32 %v5802_v39, 0.0  ;;  %v13062_v36 = vmax.f32 %v10382_v47, %v10384_v46  ;;  %v13063_v39 = vmax.f32 %v10394_v17, %v10396_v25 }
 0x21e   :  { %v5949_v14 = vmax.f32 %v5805_v44, 0.0  ;;  %v4183_v21 = vmax.f32 %v13057_v20, %v9146_v15  ;;  %v3654_v4 = vpop.f32.mrb[161].mxu0  ;;  %v5128_v5 = vpop.f32.mrb[161].mxu1  ;;  %v13064_v15 = vld [vmem:[#allocation2_spill] sm:$0xff] }
 0x21f   :  { %v5947_v24 = vmax.f32 %v5803_v45, 0.0  ;;  %v4181_v29 = vmax.f32 %v13058_v28, %v3654_v4  ;;  %v9147_v60 = vpop.f32.mrb[162].mxu0  ;;  %v9295_v38 = vpop.f32.mrb[162].mxu1 }
 0x220   :  { %v8139_v7 = vpack.c.bf16 %v5949_v14, %v5948_v63  ;;  %v5657_v8 = vmax.f32 %v4183_v21, %v9294_v49  ;;  %v4184_v13 = vmax.f32 %v13059_v12, %v9147_v60  ;;  %v3657_v61 = vpop.f32.mrb[163].mxu0  ;;  %v5131_v43 = vpop.f32.mrb[163].mxu1  ;;  %v13065_v49 = vmax.f32 %v10406_v31, %v13064_v15  ;;  %v13069_v12 = vld [vmem:[#allocation5_spill] sm:$0xff] }
 0x221   :  { %v8134_v0 = vpack.c.bf16 %v5947_v24, %v5946_v23  ;;  %v5655_v1 = vmax.f32 %v4181_v29, %v5128_v5  ;;  %v4182_v11 = vmax.f32 %v13060_v48, %v3657_v61  ;;  %v13066_v23 = vld [vmem:[#allocation3_spill] sm:$0xff]  ;;  %v13067_v24 = vld [vmem:[#allocation4_spill] sm:$0xff]  ;;  %v9702_v48 = vld [vmem:[%s12556_s0 + $0x898] sm:$0xff]  }
 0x222   :  { %8467 = vst [vmem:[%s12558_s3 + $0x38] sm:$0xff] %v8139_v7   ;;  %v5808_v42 = vadd.f32 %v11630_v62, %v5657_v8  ;;  %v5658_v6 = vmax.f32 %v4184_v13, %v9295_v38  ;;  %9253 = vmatmul.mubr.msk.bf16.gmra.mrb[12].mxu0 %vm535_vm0, %v9692_v55  ;;  %9401 = vmatmul.mubr.msk.bf16.gmra.mrb[12].mxu1 %vm535_vm0, %v9693_v56  ;;  %v13070_v13 = vld [vmem:[#allocation6_spill] sm:$0xff] }
 0x223   :  { %8466 = vst [vmem:[%s12558_s3 + $0x30] sm:$0xff] %v8134_v0   ;;  %v5806_v10 = vadd.f32 %v11630_v62, %v5655_v1  ;;  %v5656_v16 = vmax.f32 %v4182_v11, %v5131_v43  ;;  %9256 = vmatprep.mubr.msk.bf16.mxu0 %vm535_vm0, %v9694_v57  ;;  %9404 = vmatprep.mubr.msk.bf16.mxu1 %vm535_vm0, %v9695_v58  ;;  %v9700_v57 = vld [vmem:[%s12556_s0 + $0x890] sm:$0xff]   ;;  %v9701_v58 = vld [vmem:[%s12556_s0 + $0x8d8] sm:$0xff]   ;;  %v9703_v11 = vld [vmem:[%s12556_s0 + $0x8e0] sm:$0xff]  }
 0x224   :  { %v5809_v32 = vadd.f32 %v11630_v62, %v5658_v6  ;;  %v5952_v59 = vmax.f32 %v5808_v42, 0.0  ;;  %v13068_v28 = vmax.f32 %v13066_v23, %v13067_v24  ;;  %v13071_v61 = vmax.f32 %v13069_v12, %v13070_v13  ;;  %v13085_v23 = vld [vmem:[#allocation16_spill] sm:$0xff] }
 0x225   :  { %v5807_v33 = vadd.f32 %v11630_v62, %v5656_v16  ;;  %v9150_v22 = vpop.f32.mrb[164].mxu0  ;;  %v9298_v30 = vpop.f32.mrb[164].mxu1  ;;  %v5950_v2 = vmax.f32 %v5806_v10, 0.0  ;;  %v13072_v10 = vld [vmem:[#allocation7_spill] sm:$0xff]  ;;  %v13073_v16 = vld [vmem:[#allocation8_spill] sm:$0xff] }
 0x226   :  { %v5953_v50 = vmax.f32 %v5809_v32, 0.0  ;;  %v4187_v35 = vmax.f32 %v13061_v34, %v9150_v22  ;;  %v3670_v51 = vpop.f32.mrb[165].mxu0  ;;  %v5144_v27 = vpop.f32.mrb[165].mxu1  ;;  %v13074_v32 = vmax.f32 %v13072_v10, %v13073_v16  ;;  %v13075_v34 = vld [vmem:[#allocation9_spill] sm:$0xff]  ;;  %v13090_v16 = vld [vmem:[#allocation19_spill] sm:$0xff] }
 0x227   :  { %v5951_v3 = vmax.f32 %v5807_v33, 0.0  ;;  %v4185_v37 = vmax.f32 %v13062_v36, %v3670_v51  ;;  %v9151_v18 = vpop.f32.mrb[166].mxu0  ;;  %v9299_v19 = vpop.f32.mrb[166].mxu1 }
 0x228   :  { %v8149_v52 = vpack.c.bf16 %v5953_v50, %v5952_v59  ;;  %v5661_v53 = vmax.f32 %v4187_v35, %v9298_v30  ;;  %v4188_v40 = vmax.f32 %v13063_v39, %v9151_v18  ;;  %v3673_v44 = vpop.f32.mrb[167].mxu0  ;;  %v5147_v45 = vpop.f32.mrb[167].mxu1  ;;  %v13076_v35 = vld [vmem:[#allocation10_spill] sm:$0xff] }
 0x229   :  { %v8144_v46 = vpack.c.bf16 %v5951_v3, %v5950_v2  ;;  %v5659_v47 = vmax.f32 %v4185_v37, %v5144_v27  ;;  %v4186_v63 = vmax.f32 %v13065_v49, %v3673_v44  ;;  %v13077_v51 = vmax.f32 %v13075_v34, %v13076_v35  ;;  %v9709_v34 = vld [vmem:[%s12556_s0 + $0x8f8] sm:$0xff]  }
 0x22a   :  { %8469 = vst [vmem:[%s12558_s3 + $0x48] sm:$0xff] %v8149_v52   ;;  %v5812_v14 = vadd.f32 %v11630_v62, %v5661_v53  ;;  %v5662_v20 = vmax.f32 %v4188_v40, %v9299_v19  ;;  %9257 = vmatmul.mubr.msk.bf16.gmra.mrb[16].mxu0 %vm535_vm0, %v9696_v41  ;;  %9405 = vmatmul.mubr.msk.bf16.gmra.mrb[16].mxu1 %vm535_vm0, %v9697_v54  ;;  %v13078_v52 = vld [vmem:[#allocation11_spill] sm:$0xff]  ;;  %v13079_v53 = vld [vmem:[#allocation12_spill] sm:$0xff] }
 0x22b   :  { %8468 = vst [vmem:[%s12558_s3 + $0x40] sm:$0xff] %v8144_v46   ;;  %v5810_v17 = vadd.f32 %v11630_v62, %v5659_v47  ;;  %v5660_v25 = vmax.f32 %v4186_v63, %v5147_v45  ;;  %9260 = vmatprep.mubr.msk.bf16.mxu0 %vm535_vm0, %v9698_v9  ;;  %9408 = vmatprep.mubr.msk.bf16.mxu1 %vm535_vm0, %v9699_v26  ;;  %v9704_v46 = vld [vmem:[%s12556_s0 + $0x8a0] sm:$0xff]   ;;  %v9705_v47 = vld [vmem:[%s12556_s0 + $0x8e8] sm:$0xff]   ;;  %v13081_v63 = vld [vmem:[#allocation13_spill] sm:$0xff] }
 0x22c   :  { %v5813_v31 = vadd.f32 %v11630_v62, %v5662_v20  ;;  %v5956_v55 = vmax.f32 %v5812_v14, 0.0  ;;  %v13080_v39 = vmax.f32 %v13078_v52, %v13079_v53  ;;  %v13082_v14 = vld [vmem:[#allocation14_spill] sm:$0xff] }
 0x22d   :  { %v5811_v21 = vadd.f32 %v11630_v62, %v5660_v25  ;;  %v9154_v4 = vpop.f32.mrb[168].mxu0  ;;  %v9302_v5 = vpop.f32.mrb[168].mxu1  ;;  %v5954_v7 = vmax.f32 %v5810_v17, 0.0  ;;  %v13083_v20 = vmax.f32 %v13081_v63, %v13082_v14 }
 0x22e   :  { %v5957_v56 = vmax.f32 %v5813_v31, 0.0  ;;  %v4191_v29 = vmax.f32 %v13068_v28, %v9154_v4  ;;  %v3686_v60 = vpop.f32.mrb[169].mxu0  ;;  %v5160_v38 = vpop.f32.mrb[169].mxu1  ;;  %v9707_v4 = vld [vmem:[%s12556_s0 + $0x8f0] sm:$0xff]  }
 0x22f   :  { %v5955_v8 = vmax.f32 %v5811_v21, 0.0  ;;  %v4189_v43 = vmax.f32 %v13071_v61, %v3686_v60  ;;  %v9155_v0 = vpop.f32.mrb[170].mxu0  ;;  %v9303_v1 = vpop.f32.mrb[170].mxu1  ;;  %v9706_v21 = vld [vmem:[%s12556_s0 + $0x8a8] sm:$0xff]  }
 0x230   :  { %v8159_v42 = vpack.c.bf16 %v5957_v56, %v5956_v55  ;;  %v5665_v6 = vmax.f32 %v4191_v29, %v9302_v5  ;;  %v4192_v33 = vmax.f32 %v13074_v32, %v9155_v0  ;;  %v3689_v22 = vpop.f32.mrb[171].mxu0  ;;  %v5163_v30 = vpop.f32.mrb[171].mxu1  ;;  %v13084_v56 = vld [vmem:[#allocation15_spill] sm:$0xff]  ;;  %v13091_v32 = vld [vmem:[#allocation20_spill] sm:$0xff] }
 0x231   :  { %v8154_v59 = vpack.c.bf16 %v5955_v8, %v5954_v7  ;;  %v5663_v50 = vmax.f32 %v4189_v43, %v5160_v38  ;;  %v4190_v27 = vmax.f32 %v13077_v51, %v3689_v22  ;;  %v13086_v24 = vmax.f32 %v13084_v56, %v13085_v23  ;;  %v13088_v7 = vld [vmem:[#allocation18_spill] sm:$0xff]  ;;  %v13103_v56 = vld [vmem:[#allocation28_spill] sm:$0xff] }
 0x232   :  { %8471 = vst [vmem:[%s12558_s3 + $0x58] sm:$0xff] %v8159_v42   ;;  %v5816_v41 = vadd.f32 %v11630_v62, %v5665_v6  ;;  %v5666_v54 = vmax.f32 %v4192_v33, %v9303_v1  ;;  %9261 = vmatmul.mubr.msk.bf16.gmra.mrb[20].mxu0 %vm535_vm0, %v9700_v57  ;;  %9409 = vmatmul.mubr.msk.bf16.gmra.mrb[20].mxu1 %vm535_vm0, %v9701_v58  ;;  %v13087_v58 = vld [vmem:[#allocation17_spill] sm:$0xff] }
 0x233   :  { %8470 = vst [vmem:[%s12558_s3 + $0x50] sm:$0xff] %v8154_v59   ;;  %v5814_v2 = vadd.f32 %v11630_v62, %v5663_v50  ;;  %v5664_v3 = vmax.f32 %v4190_v27, %v5163_v30  ;;  %9264 = vmatprep.mubr.msk.bf16.mxu0 %vm535_vm0, %v9702_v48  ;;  %9412 = vmatprep.mubr.msk.bf16.mxu1 %vm535_vm0, %v9703_v11  ;;  %v9708_v50 = vld [vmem:[%s12556_s0 + $0x8b0] sm:$0xff]   ;;  %v13093_v27 = vld [vmem:[#allocation21_spill] sm:$0xff] }
 0x234   :  { %v5817_v36 = vadd.f32 %v11630_v62, %v5666_v54  ;;  %v5960_v9 = vmax.f32 %v5816_v41, 0.0  ;;  %v13089_v8 = vmax.f32 %v13087_v58, %v13088_v7  ;;  %v13092_v33 = vmax.f32 %v13090_v16, %v13091_v32  ;;  %v13094_v41 = vld [vmem:[#allocation22_spill] sm:$0xff]  ;;  %v13111_v32 = vld [vmem:[#allocation33_spill] sm:$0xff] }
 0x235   :  { %v5815_v37 = vadd.f32 %v11630_v62, %v5664_v3  ;;  %v9158_v18 = vpop.f32.mrb[172].mxu0  ;;  %v9306_v19 = vpop.f32.mrb[172].mxu1  ;;  %v5958_v15 = vmax.f32 %v5814_v2, 0.0  ;;  %v13095_v54 = vmax.f32 %v13093_v27, %v13094_v41  ;;  %v13106_v58 = vld [vmem:[#allocation30_spill] sm:$0xff] }
 0x236   :  { %v5961_v26 = vmax.f32 %v5817_v36, 0.0  ;;  %v4195_v40 = vmax.f32 %v13080_v39, %v9158_v18  ;;  %v3702_v44 = vpop.f32.mrb[173].mxu0  ;;  %v5176_v45 = vpop.f32.mrb[173].mxu1 }
 0x237   :  { %v5959_v49 = vmax.f32 %v5815_v37, 0.0  ;;  %v4193_v17 = vmax.f32 %v13083_v20, %v3702_v44  ;;  %v9159_v25 = vpop.f32.mrb[174].mxu0  ;;  %v9307_v31 = vpop.f32.mrb[174].mxu1 }
 0x238   :  { %v8169_v5 = vpack.c.bf16 %v5961_v26, %v5960_v9  ;;  %v5669_v55 = vmax.f32 %v4195_v40, %v9306_v19  ;;  %v4196_v28 = vmax.f32 %v13086_v24, %v9159_v25  ;;  %v3705_v29 = vpop.f32.mrb[175].mxu0  ;;  %v5179_v60 = vpop.f32.mrb[175].mxu1  ;;  %v13096_v19 = vld [vmem:[#allocation23_spill] sm:$0xff]  ;;  %v13097_v9 = vld [vmem:[#allocation24_spill] sm:$0xff] }
 0x239   :  { %v8164_v38 = vpack.c.bf16 %v5959_v49, %v5958_v15  ;;  %v5667_v57 = vmax.f32 %v4193_v17, %v5176_v45  ;;  %v4194_v12 = vmax.f32 %v13089_v8, %v3705_v29  ;;  %v13098_v26 = vmax.f32 %v13096_v19, %v13097_v9  ;;  %v13099_v45 = vld [vmem:[#allocation25_spill] sm:$0xff] }
 0x23a   :  { %8473 = vst [vmem:[%s12558_s3 + $0x68] sm:$0xff] %v8169_v5   ;;  %v5820_v13 = vadd.f32 %v11630_v62, %v5669_v55  ;;  %v5670_v61 = vmax.f32 %v4196_v28, %v9307_v31  ;;  %9265 = vmatmul.mubr.msk.bf16.gmra.mrb[24].mxu0 %vm535_vm0, %v9704_v46  ;;  %9413 = vmatmul.mubr.msk.bf16.gmra.mrb[24].mxu1 %vm535_vm0, %v9705_v47  ;;  %v13100_v46 = vld [vmem:[#allocation26_spill] sm:$0xff]  ;;  %v13102_v55 = vld [vmem:[#allocation27_spill] sm:$0xff] }
 0x23b   :  { %8472 = vst [vmem:[%s12558_s3 + $0x60] sm:$0xff] %v8164_v38   ;;  %v5818_v43 = vadd.f32 %v11630_v62, %v5667_v57  ;;  %v5668_v0 = vmax.f32 %v4194_v12, %v5179_v60  ;;  %9268 = vmatprep.mubr.msk.bf16.mxu0 %vm535_vm0, %v9706_v21  ;;  %9416 = vmatprep.mubr.msk.bf16.mxu1 %vm535_vm0, %v9707_v4  ;;  %v13105_v57 = vld [vmem:[#allocation29_spill] sm:$0xff] }
 0x23c   :  { %v5821_v1 = vadd.f32 %v11630_v62, %v5670_v61  ;;  %v5964_v6 = vmax.f32 %v5820_v13, 0.0  ;;  %v13101_v47 = vmax.f32 %v13099_v45, %v13100_v46  ;;  %v13104_v23 = vmax.f32 %v13102_v55, %v13103_v56  ;;  %v13124_v55 = vld [vmem:[#allocation42_spill] sm:$0xff] }
 0x23d   :  { %v5819_v48 = vadd.f32 %v11630_v62, %v5668_v0  ;;  %v9162_v11 = vpop.f32.mrb[176].mxu0  ;;  %v9310_v42 = vpop.f32.mrb[176].mxu1  ;;  %v5962_v35 = vmax.f32 %v5818_v43, 0.0  ;;  %v13107_v7 = vmax.f32 %v13105_v57, %v13106_v58  ;;  %v13108_v0 = vld [vmem:[#allocation31_spill] sm:$0xff] }
 0x23e   :  { %v5965_v10 = vmax.f32 %v5821_v1, 0.0  ;;  %v4199_v22 = vmax.f32 %v13092_v33, %v9162_v11  ;;  %v3718_v30 = vpop.f32.mrb[177].mxu0  ;;  %v5192_v59 = vpop.f32.mrb[177].mxu1  ;;  %v13109_v1 = vld [vmem:[#allocation32_spill] sm:$0xff]  ;;  %v13112_v33 = vld [vmem:[#allocation34_spill] sm:$0xff] }
 0x23f   :  { %v5963_v51 = vmax.f32 %v5819_v48, 0.0  ;;  %v4197_v2 = vmax.f32 %v13095_v54, %v3718_v30  ;;  %v9163_v3 = vpop.f32.mrb[178].mxu0  ;;  %v9311_v36 = vpop.f32.mrb[178].mxu1  ;;  %v13110_v48 = vmax.f32 %v13108_v0, %v13109_v1 }
 0x240   :  { %v8179_v37 = vpack.c.bf16 %v5965_v10, %v5964_v6  ;;  %v5673_v18 = vmax.f32 %v4199_v22, %v9310_v42  ;;  %v4200_v52 = vmax.f32 %v13098_v26, %v9163_v3  ;;  %v3721_v53 = vpop.f32.mrb[179].mxu0  ;;  %v5195_v39 = vpop.f32.mrb[179].mxu1  ;;  %v13113_v22 = vmax.f32 %v13111_v32, %v13112_v33 }
 0x241   :  { %v8174_v40 = vpack.c.bf16 %v5963_v51, %v5962_v35  ;;  %v5671_v44 = vmax.f32 %v4197_v2, %v5192_v59  ;;  %v4198_v15 = vmax.f32 %v13101_v47, %v3721_v53 }
 0x242   :  { %8475 = vst [vmem:[%s12558_s3 + $0x78] sm:$0xff] %v8179_v37   ;;  %v5824_v49 = vadd.f32 %v11630_v62, %v5673_v18  ;;  %v5674_v63 = vmax.f32 %v4200_v52, %v9311_v36  ;;  %9269 = vmatmul.mubr.msk.bf16.gmra.mrb[28].mxu0 %vm535_vm0, %v9708_v50  ;;  %9417 = vmatmul.mubr.msk.bf16.gmra.mrb[28].mxu1 %vm535_vm0, %v9709_v34  ;;  %v13114_v36 = vld [vmem:[#allocation35_spill] sm:$0xff]  ;;  %v13115_v37 = vld [vmem:[#allocation36_spill] sm:$0xff] }
 0x243   :  { %8474 = vst [vmem:[%s12558_s3 + $0x70] sm:$0xff] %v8174_v40   ;;  %v5822_v14 = vadd.f32 %v11630_v62, %v5671_v44  ;;  %v5672_v20 = vmax.f32 %v4198_v15, %v5195_v39  ;;  %v13116_v18 = vmax.f32 %v13114_v36, %v13115_v37  ;;  %v13117_v39 = vld [vmem:[#allocation37_spill] sm:$0xff]  ;;  %v13118_v40 = vld [vmem:[#allocation38_spill] sm:$0xff] }
 0x244   :  { %v5825_v17 = vadd.f32 %v11630_v62, %v5674_v63  ;;  %v5968_v4 = vmax.f32 %v5824_v49, 0.0  ;;  %v13119_v44 = vmax.f32 %v13117_v39, %v13118_v40  ;;  %v13120_v63 = vld [vmem:[#allocation39_spill] sm:$0xff]  ;;  %v13136_v36 = vld [vmem:[#allocation50_spill] sm:$0xff] }
 0x245   :  { %v5823_v25 = vadd.f32 %v11630_v62, %v5672_v20  ;;  %v9166_v31 = vpop.f32.mrb[180].mxu0  ;;  %v9314_v21 = vpop.f32.mrb[180].mxu1  ;;  %v5966_v60 = vmax.f32 %v5822_v14, 0.0  ;;  %v13121_v14 = vld [vmem:[#allocation40_spill] sm:$0xff] }
 0x246   :  { %v5969_v5 = vmax.f32 %v5825_v17, 0.0  ;;  %v4203_v24 = vmax.f32 %v13104_v23, %v9166_v31  ;;  %v3734_v28 = vpop.f32.mrb[181].mxu0  ;;  %v5208_v29 = vpop.f32.mrb[181].mxu1  ;;  %v13122_v20 = vmax.f32 %v13120_v63, %v13121_v14 }
 0x247   :  { %v5967_v38 = vmax.f32 %v5823_v25, 0.0  ;;  %v4201_v8 = vmax.f32 %v13107_v7, %v3734_v28  ;;  %v9167_v12 = vpop.f32.mrb[182].mxu0  ;;  %v9315_v13 = vpop.f32.mrb[182].mxu1 }
 0x248   :  { %v8189_v61 = vpack.c.bf16 %v5969_v5, %v5968_v4  ;;  %v5677_v43 = vmax.f32 %v4203_v24, %v9314_v21  ;;  %v4204_v11 = vmax.f32 %v13110_v48, %v9167_v12  ;;  %v3737_v42 = vpop.f32.mrb[183].mxu0  ;;  %v5211_v6 = vpop.f32.mrb[183].mxu1  ;;  %v13123_v5 = vld [vmem:[#allocation41_spill] sm:$0xff] }
 0x249   :  { %v8184_v10 = vpack.c.bf16 %v5967_v38, %v5966_v60  ;;  %v5675_v16 = vmax.f32 %v4201_v8, %v5208_v29  ;;  %v4202_v30 = vmax.f32 %v13113_v22, %v3737_v42  ;;  %v13125_v56 = vmax.f32 %v13123_v5, %v13124_v55 }
 0x24a   :  { %8477 = vst [vmem:[%s12558_s3 + $0x88] sm:$0xff] %v8189_v61   ;;  %v5828_v59 = vadd.f32 %v11630_v62, %v5677_v43  ;;  %v5678_v50 = vmax.f32 %v4204_v11, %v9315_v13  ;;  %v13126_v13 = vld [vmem:[#allocation43_spill] sm:$0xff]  ;;  %v13127_v61 = vld [vmem:[#allocation44_spill] sm:$0xff] }
 0x24b   :  { %8476 = vst [vmem:[%s12558_s3 + $0x80] sm:$0xff] %v8184_v10   ;;  %v5826_v34 = vadd.f32 %v11630_v62, %v5675_v16  ;;  %v5676_v35 = vmax.f32 %v4202_v30, %v5211_v6  ;;  %v13128_v43 = vmax.f32 %v13126_v13, %v13127_v61  ;;  %v13129_v6 = vld [vmem:[#allocation45_spill] sm:$0xff]  ;;  %v13130_v10 = vld [vmem:[#allocation46_spill] sm:$0xff] }
 0x24c   :  { %v5829_v51 = vadd.f32 %v11630_v62, %v5678_v50  ;;  %v5972_v2 = vmax.f32 %v5828_v59, 0.0  ;;  %v13131_v16 = vmax.f32 %v13129_v6, %v13130_v10  ;;  %v13132_v50 = vld [vmem:[#allocation47_spill] sm:$0xff]  ;;  %v13148_v13 = vld [vmem:[#allocation58_spill] sm:$0xff] }
 0x24d   :  { %v5827_v27 = vadd.f32 %v11630_v62, %v5676_v35  ;;  %v9170_v41 = vpop.f32.mrb[184].mxu0  ;;  %v9318_v54 = vpop.f32.mrb[184].mxu1  ;;  %v5970_v52 = vmax.f32 %v5826_v34, 0.0  ;;  %v13133_v34 = vld [vmem:[#allocation48_spill] sm:$0xff] }
 0x24e   :  { %v5973_v3 = vmax.f32 %v5829_v51, 0.0  ;;  %v4207_v19 = vmax.f32 %v13116_v18, %v9170_v41  ;;  %v3750_v9 = vpop.f32.mrb[185].mxu0  ;;  %v5224_v26 = vpop.f32.mrb[185].mxu1  ;;  %v13134_v35 = vmax.f32 %v13132_v50, %v13133_v34 }
 0x24f   :  { %v5971_v53 = vmax.f32 %v5827_v27, 0.0  ;;  %v4205_v45 = vmax.f32 %v13119_v44, %v3750_v9  ;;  %v9171_v46 = vpop.f32.mrb[186].mxu0  ;;  %v9319_v47 = vpop.f32.mrb[186].mxu1 }
 0x250   :  { %v8199_v15 = vpack.c.bf16 %v5973_v3, %v5972_v2  ;;  %v5681_v49 = vmax.f32 %v4207_v19, %v9318_v54  ;;  %v4208_v17 = vmax.f32 %v13122_v20, %v9171_v46  ;;  %v3753_v25 = vpop.f32.mrb[187].mxu0  ;;  %v5227_v31 = vpop.f32.mrb[187].mxu1  ;;  %v13135_v3 = vld [vmem:[#allocation49_spill] sm:$0xff] }
 0x251   :  { %v8194_v21 = vpack.c.bf16 %v5971_v53, %v5970_v52  ;;  %v5679_v4 = vmax.f32 %v4205_v45, %v5224_v26  ;;  %v4206_v23 = vmax.f32 %v13125_v56, %v3753_v25  ;;  %v13137_v37 = vmax.f32 %v13135_v3, %v13136_v36 }
 0x252   :  { %8479 = vst [vmem:[%s12558_s3 + $0x98] sm:$0xff] %v8199_v15   ;;  %v5832_v24 = vadd.f32 %v11630_v62, %v5681_v49  ;;  %v5682_v28 = vmax.f32 %v4208_v17, %v9319_v47  ;;  %v13138_v47 = vld [vmem:[#allocation51_spill] sm:$0xff]  ;;  %v13139_v15 = vld [vmem:[#allocation52_spill] sm:$0xff] }
 0x253   :  { %8478 = vst [vmem:[%s12558_s3 + $0x90] sm:$0xff] %v8194_v21   ;;  %v5830_v29 = vadd.f32 %v11630_v62, %v5679_v4  ;;  %v5680_v60 = vmax.f32 %v4206_v23, %v5227_v31  ;;  %v13140_v49 = vmax.f32 %v13138_v47, %v13139_v15  ;;  %v13141_v31 = vld [vmem:[#allocation53_spill] sm:$0xff]  ;;  %v13142_v21 = vld [vmem:[#allocation54_spill] sm:$0xff] }
 0x254   :  { %v5833_v38 = vadd.f32 %v11630_v62, %v5682_v28  ;;  %v5976_v8 = vmax.f32 %v5832_v24, 0.0  ;;  %v13143_v4 = vmax.f32 %v13141_v31, %v13142_v21  ;;  %v13144_v28 = vld [vmem:[#allocation55_spill] sm:$0xff]  ;;  %v13160_v47 = vld [vmem:[#allocation66_spill] sm:$0xff] }
 0x255   :  { %v5831_v57 = vadd.f32 %v11630_v62, %v5680_v60  ;;  %v9174_v58 = vpop.f32.mrb[188].mxu0  ;;  %v9322_v7 = vpop.f32.mrb[188].mxu1  ;;  %v5974_v11 = vmax.f32 %v5830_v29, 0.0  ;;  %v13145_v29 = vld [vmem:[#allocation56_spill] sm:$0xff] }
 0x256   :  { %v5977_v12 = vmax.f32 %v5833_v38, 0.0  ;;  %v4211_v0 = vmax.f32 %v13128_v43, %v9174_v58  ;;  %v3766_v1 = vpop.f32.mrb[189].mxu0  ;;  %v5240_v48 = vpop.f32.mrb[189].mxu1  ;;  %v13146_v60 = vmax.f32 %v13144_v28, %v13145_v29 }
 0x257   :  { %v5975_v42 = vmax.f32 %v5831_v57, 0.0  ;;  %v4209_v32 = vmax.f32 %v13131_v16, %v3766_v1  ;;  %v9175_v33 = vpop.f32.mrb[190].mxu0  ;;  %v9323_v22 = vpop.f32.mrb[190].mxu1 }
 0x258   :  { %v8209_v30 = vpack.c.bf16 %v5977_v12, %v5976_v8  ;;  %v5685_v59 = vmax.f32 %v4211_v0, %v9322_v7  ;;  %v4212_v51 = vmax.f32 %v13134_v35, %v9175_v33  ;;  %v3769_v27 = vpop.f32.mrb[191].mxu0  ;;  %v5243_v41 = vpop.f32.mrb[191].mxu1  ;;  %v13147_v12 = vld [vmem:[#allocation57_spill] sm:$0xff] }
 0x259   :  { %v8204_v54 = vpack.c.bf16 %v5975_v42, %v5974_v11  ;;  %v5683_v2 = vmax.f32 %v4209_v32, %v5240_v48  ;;  %v4210_v18 = vmax.f32 %v13137_v37, %v3769_v27  ;;  %v13149_v61 = vmax.f32 %v13147_v12, %v13148_v13 }
 0x25a   :  { %8481 = vst [vmem:[%s12558_s3 + $0xa8] sm:$0xff] %v8209_v30   ;;  %v5836_v19 = vadd.f32 %v11630_v62, %v5685_v59  ;;  %v5686_v9 = vmax.f32 %v4212_v51, %v9323_v22  ;;  %v13150_v22 = vld [vmem:[#allocation59_spill] sm:$0xff]  ;;  %v13151_v30 = vld [vmem:[#allocation60_spill] sm:$0xff] }
 0x25b   :  { %8480 = vst [vmem:[%s12558_s3 + $0xa0] sm:$0xff] %v8204_v54   ;;  %v5834_v26 = vadd.f32 %v11630_v62, %v5683_v2  ;;  %v5684_v52 = vmax.f32 %v4210_v18, %v5243_v41  ;;  %v13152_v59 = vmax.f32 %v13150_v22, %v13151_v30  ;;  %v13153_v41 = vld [vmem:[#allocation61_spill] sm:$0xff]  ;;  %v13154_v54 = vld [vmem:[#allocation62_spill] sm:$0xff] }
 0x25c   :  { %v5837_v53 = vadd.f32 %v11630_v62, %v5686_v9  ;;  %v5980_v45 = vmax.f32 %v5836_v19, 0.0  ;;  %v13155_v2 = vmax.f32 %v13153_v41, %v13154_v54  ;;  %v13156_v9 = vld [vmem:[#allocation63_spill] sm:$0xff]  ;;  %v13172_v22 = vld [vmem:[#allocation74_spill] sm:$0xff] }
 0x25d   :  { %v5835_v39 = vadd.f32 %v11630_v62, %v5684_v52  ;;  %v9178_v40 = vpop.f32.mrb[192].mxu0  ;;  %v9326_v44 = vpop.f32.mrb[192].mxu1  ;;  %v5978_v17 = vmax.f32 %v5834_v26, 0.0  ;;  %v13157_v26 = vld [vmem:[#allocation64_spill] sm:$0xff] }
 0x25e   :  { %v5981_v46 = vmax.f32 %v5837_v53, 0.0  ;;  %v4215_v63 = vmax.f32 %v13140_v49, %v9178_v40  ;;  %v3782_v14 = vpop.f32.mrb[193].mxu0  ;;  %v5256_v20 = vpop.f32.mrb[193].mxu1  ;;  %v13158_v52 = vmax.f32 %v13156_v9, %v13157_v26 }
 0x25f   :  { %v5979_v25 = vmax.f32 %v5835_v39, 0.0  ;;  %v4213_v5 = vmax.f32 %v13143_v4, %v3782_v14  ;;  %v9179_v55 = vpop.f32.mrb[194].mxu0  ;;  %v9327_v56 = vpop.f32.mrb[194].mxu1 }
 0x260   :  { %v8219_v23 = vpack.c.bf16 %v5981_v46, %v5980_v45  ;;  %v5689_v24 = vmax.f32 %v4215_v63, %v9326_v44  ;;  %v4216_v38 = vmax.f32 %v13146_v60, %v9179_v55  ;;  %v3785_v57 = vpop.f32.mrb[195].mxu0  ;;  %v5259_v58 = vpop.f32.mrb[195].mxu1  ;;  %v13159_v46 = vld [vmem:[#allocation65_spill] sm:$0xff] }
 0x261   :  { %v8214_v7 = vpack.c.bf16 %v5979_v25, %v5978_v17  ;;  %v5687_v8 = vmax.f32 %v4213_v5, %v5256_v20  ;;  %v4214_v43 = vmax.f32 %v13149_v61, %v3785_v57  ;;  %v13161_v15 = vmax.f32 %v13159_v46, %v13160_v47 }
 0x262   :  { %8483 = vst [vmem:[%s12558_s3 + $0xb8] sm:$0xff] %v8219_v23   ;;  %v5840_v0 = vadd.f32 %v11630_v62, %v5689_v24  ;;  %v5690_v1 = vmax.f32 %v4216_v38, %v9327_v56  ;;  %v13162_v56 = vld [vmem:[#allocation67_spill] sm:$0xff]  ;;  %v13163_v23 = vld [vmem:[#allocation68_spill] sm:$0xff] }
 0x263   :  { %8482 = vst [vmem:[%s12558_s3 + $0xb0] sm:$0xff] %v8214_v7   ;;  %v5838_v48 = vadd.f32 %v11630_v62, %v5687_v8  ;;  %v5688_v11 = vmax.f32 %v4214_v43, %v5259_v58  ;;  %v13164_v24 = vmax.f32 %v13162_v56, %v13163_v23  ;;  %v13165_v58 = vld [vmem:[#allocation69_spill] sm:$0xff]  ;;  %v13166_v7 = vld [vmem:[#allocation70_spill] sm:$0xff] }
 0x264   :  { %v5841_v42 = vadd.f32 %v11630_v62, %v5690_v1  ;;  %v5984_v32 = vmax.f32 %v5840_v0, 0.0  ;;  %v13167_v8 = vmax.f32 %v13165_v58, %v13166_v7  ;;  %v13168_v1 = vld [vmem:[#allocation71_spill] sm:$0xff]  ;;  %v13184_v56 = vld [vmem:[#allocation82_spill] sm:$0xff] }
 0x265   :  { %v5839_v6 = vadd.f32 %v11630_v62, %v5688_v11  ;;  %v9182_v10 = vpop.f32.mrb[196].mxu0  ;;  %v9330_v16 = vpop.f32.mrb[196].mxu1  ;;  %v5982_v51 = vmax.f32 %v5838_v48, 0.0  ;;  %v13169_v48 = vld [vmem:[#allocation72_spill] sm:$0xff] }
 0x266   :  { %v5985_v33 = vmax.f32 %v5841_v42, 0.0  ;;  %v4219_v50 = vmax.f32 %v13152_v59, %v9182_v10  ;;  %v3798_v34 = vpop.f32.mrb[197].mxu0  ;;  %v5272_v35 = vpop.f32.mrb[197].mxu1  ;;  %v13170_v11 = vmax.f32 %v13168_v1, %v13169_v48 }
 0x267   :  { %v5983_v27 = vmax.f32 %v5839_v6, 0.0  ;;  %v4217_v3 = vmax.f32 %v13155_v2, %v3798_v34  ;;  %v9183_v36 = vpop.f32.mrb[198].mxu0  ;;  %v9331_v37 = vpop.f32.mrb[198].mxu1 }
 0x268   :  { %v8229_v18 = vpack.c.bf16 %v5985_v33, %v5984_v32  ;;  %v5693_v19 = vmax.f32 %v4219_v50, %v9330_v16  ;;  %v4220_v53 = vmax.f32 %v13158_v52, %v9183_v36  ;;  %v3801_v39 = vpop.f32.mrb[199].mxu0  ;;  %v5275_v40 = vpop.f32.mrb[199].mxu1  ;;  %v13171_v33 = vld [vmem:[#allocation73_spill] sm:$0xff] }
 0x269   :  { %v8224_v44 = vpack.c.bf16 %v5983_v27, %v5982_v51  ;;  %v5691_v45 = vmax.f32 %v4217_v3, %v5272_v35  ;;  %v4218_v49 = vmax.f32 %v13161_v15, %v3801_v39  ;;  %v13173_v30 = vmax.f32 %v13171_v33, %v13172_v22 }
 0x26a   :  { %8485 = vst [vmem:[%s12558_s3 + $0xc8] sm:$0xff] %v8229_v18   ;;  %v5844_v63 = vadd.f32 %v11630_v62, %v5693_v19  ;;  %v5694_v14 = vmax.f32 %v4220_v53, %v9331_v37  ;;  %v13174_v37 = vld [vmem:[#allocation75_spill] sm:$0xff]  ;;  %v13175_v18 = vld [vmem:[#allocation76_spill] sm:$0xff] }
 0x26b   :  { %8484 = vst [vmem:[%s12558_s3 + $0xc0] sm:$0xff] %v8224_v44   ;;  %v5842_v20 = vadd.f32 %v11630_v62, %v5691_v45  ;;  %v5692_v17 = vmax.f32 %v4218_v49, %v5275_v40  ;;  %v13176_v19 = vmax.f32 %v13174_v37, %v13175_v18  ;;  %v13177_v40 = vld [vmem:[#allocation77_spill] sm:$0xff]  ;;  %v13178_v44 = vld [vmem:[#allocation78_spill] sm:$0xff] }
 0x26c   :  { %v5845_v25 = vadd.f32 %v11630_v62, %v5694_v14  ;;  %v5988_v5 = vmax.f32 %v5844_v63, 0.0  ;;  %v13179_v45 = vmax.f32 %v13177_v40, %v13178_v44  ;;  %v13180_v14 = vld [vmem:[#allocation79_spill] sm:$0xff] }
 0x26d   :  { %v5843_v31 = vadd.f32 %v11630_v62, %v5692_v17  ;;  %v9186_v21 = vpop.f32.mrb[200].mxu0  ;;  %v9334_v4 = vpop.f32.mrb[200].mxu1  ;;  %v5986_v38 = vmax.f32 %v5842_v20, 0.0  ;;  %v13181_v20 = vld [vmem:[#allocation80_spill] sm:$0xff] }
 0x26e   :  { %v5989_v55 = vmax.f32 %v5845_v25, 0.0  ;;  %v4223_v28 = vmax.f32 %v13164_v24, %v9186_v21  ;;  %v3814_v29 = vpop.f32.mrb[201].mxu0  ;;  %v5288_v60 = vpop.f32.mrb[201].mxu1  ;;  %v13182_v17 = vmax.f32 %v13180_v14, %v13181_v20 }
 0x26f   :  { %v5987_v57 = vmax.f32 %v5843_v31, 0.0  ;;  %v4221_v12 = vmax.f32 %v13167_v8, %v3814_v29  ;;  %v9187_v13 = vpop.f32.mrb[202].mxu0  ;;  %v9335_v61 = vpop.f32.mrb[202].mxu1 }
 0x270   :  { %v8239_v43 = vpack.c.bf16 %v5989_v55, %v5988_v5  ;;  %v5697_v0 = vmax.f32 %v4223_v28, %v9334_v4  ;;  %v4224_v42 = vmax.f32 %v13170_v11, %v9187_v13  ;;  %v3817_v6 = vpop.f32.mrb[203].mxu0  ;;  %v5291_v10 = vpop.f32.mrb[203].mxu1  ;;  %v13183_v55 = vld [vmem:[#allocation81_spill] sm:$0xff] }
 0x271   :  { %v8234_v16 = vpack.c.bf16 %v5987_v57, %v5986_v38  ;;  %v5695_v32 = vmax.f32 %v4221_v12, %v5288_v60  ;;  %v4222_v59 = vmax.f32 %v13173_v30, %v3817_v6  ;;  %v13185_v23 = vmax.f32 %v13183_v55, %v13184_v56 }
 0x272   :  { %8487 = vst [vmem:[%s12558_s3 + $0xd8] sm:$0xff] %v8239_v43   ;;  %v5848_v50 = vadd.f32 %v11630_v62, %v5697_v0  ;;  %v5698_v34 = vmax.f32 %v4224_v42, %v9335_v61  ;;  %v13186_v61 = vld [vmem:[#allocation83_spill] sm:$0xff]  ;;  %v13187_v43 = vld [vmem:[#allocation84_spill] sm:$0xff] }
 0x273   :  { %8486 = vst [vmem:[%s12558_s3 + $0xd0] sm:$0xff] %v8234_v16   ;;  %v5846_v35 = vadd.f32 %v11630_v62, %v5695_v32  ;;  %v5696_v51 = vmax.f32 %v4222_v59, %v5291_v10  ;;  %v13188_v0 = vmax.f32 %v13186_v61, %v13187_v43  ;;  %v13189_v10 = vld [vmem:[#allocation85_spill] sm:$0xff]  ;;  %v13190_v16 = vld [vmem:[#allocation86_spill] sm:$0xff] }
 0x274   :  { %v5849_v27 = vadd.f32 %v11630_v62, %v5698_v34  ;;  %v5992_v3 = vmax.f32 %v5848_v50, 0.0  ;;  %v13191_v32 = vmax.f32 %v13189_v10, %v13190_v16  ;;  %v13192_v50 = vld [vmem:[#allocation87_spill] sm:$0xff]  ;;  %v13193_v34 = vld [vmem:[#allocation88_spill] sm:$0xff]  ;;  %v13208_v61 = vld [vmem:[#allocation98_spill] sm:$0xff] }
 0x275   :  { %v5847_v41 = vadd.f32 %v11630_v62, %v5696_v51  ;;  %v9190_v54 = vpop.f32.mrb[204].mxu0  ;;  %v9338_v2 = vpop.f32.mrb[204].mxu1  ;;  %v5990_v53 = vmax.f32 %v5846_v35, 0.0  ;;  %v13194_v35 = vmax.f32 %v13192_v50, %v13193_v34 }
 0x276   :  { %v5993_v36 = vmax.f32 %v5849_v27, 0.0  ;;  %v4227_v9 = vmax.f32 %v13176_v19, %v9190_v54  ;;  %v3830_v26 = vpop.f32.mrb[205].mxu0  ;;  %v5304_v52 = vpop.f32.mrb[205].mxu1  ;;  %v12123_v19 = vld [vmem:[%s12557_s2] ss:$0 sm:$0xff] }
 0x277   :  { %v5991_v39 = vmax.f32 %v5847_v41, 0.0  ;;  %v4225_v46 = vmax.f32 %v13179_v45, %v3830_v26  ;;  %v9191_v47 = vpop.f32.mrb[206].mxu0  ;;  %v9339_v15 = vpop.f32.mrb[206].mxu1 }
 0x278   :  { %v8249_v49 = vpack.c.bf16 %v5993_v36, %v5992_v3  ;;  %v5701_v63 = vmax.f32 %v4227_v9, %v9338_v2  ;;  %v4228_v25 = vmax.f32 %v13182_v17, %v9191_v47  ;;  %v3833_v31 = vpop.f32.mrb[207].mxu0  ;;  %v5307_v21 = vpop.f32.mrb[207].mxu1  ;;  %v13195_v3 = vld [vmem:[#allocation89_spill] sm:$0xff]  ;;  %v13196_v36 = vld [vmem:[#allocation90_spill] sm:$0xff] }
 0x279   :  { %v8244_v4 = vpack.c.bf16 %v5991_v39, %v5990_v53  ;;  %v5699_v5 = vmax.f32 %v4225_v46, %v5304_v52  ;;  %v4226_v24 = vmax.f32 %v13185_v23, %v3833_v31  ;;  %v13197_v37 = vmax.f32 %v13195_v3, %v13196_v36 }
 0x27a   :  { %8489 = vst [vmem:[%s12558_s3 + $0xe8] sm:$0xff] %v8249_v49   ;;  %v5852_v28 = vadd.f32 %v11630_v62, %v5701_v63  ;;  %v5702_v29 = vmax.f32 %v4228_v25, %v9339_v15  ;;  %v13198_v15 = vld [vmem:[#allocation91_spill] sm:$0xff]  ;;  %v13199_v49 = vld [vmem:[#allocation92_spill] sm:$0xff] }
 0x27b   :  { %8488 = vst [vmem:[%s12558_s3 + $0xe0] sm:$0xff] %v8244_v4   ;;  %v5850_v60 = vadd.f32 %v11630_v62, %v5699_v5  ;;  %v5700_v38 = vmax.f32 %v4226_v24, %v5307_v21  ;;  %v13200_v63 = vmax.f32 %v13198_v15, %v13199_v49  ;;  %v13201_v21 = vld [vmem:[#allocation93_spill] sm:$0xff]  ;;  %v13202_v4 = vld [vmem:[#allocation94_spill] sm:$0xff] }
 0x27c   :  { %v5853_v57 = vadd.f32 %v11630_v62, %v5702_v29  ;;  %v5996_v12 = vmax.f32 %v5852_v28, 0.0  ;;  %v13203_v5 = vmax.f32 %v13201_v21, %v13202_v4  ;;  %v13204_v29 = vld [vmem:[#allocation95_spill] sm:$0xff]  ;;  %v13220_v15 = vld [vmem:[#allocation106_spill] sm:$0xff] }
 0x27d   :  { %v5851_v58 = vadd.f32 %v11630_v62, %v5700_v38  ;;  %v9194_v7 = vpop.f32.mrb[208].mxu0  ;;  %v9342_v8 = vpop.f32.mrb[208].mxu1  ;;  %v5994_v42 = vmax.f32 %v5850_v60, 0.0  ;;  %v13205_v60 = vld [vmem:[#allocation96_spill] sm:$0xff] }
 0x27e   :  { %v5997_v13 = vmax.f32 %v5853_v57, 0.0  ;;  %v4231_v1 = vmax.f32 %v13188_v0, %v9194_v7  ;;  %v3846_v48 = vpop.f32.mrb[209].mxu0  ;;  %v5320_v11 = vpop.f32.mrb[209].mxu1  ;;  %v13206_v38 = vmax.f32 %v13204_v29, %v13205_v60 }
 0x27f   :  { %v5995_v6 = vmax.f32 %v5851_v58, 0.0  ;;  %v4229_v33 = vmax.f32 %v13191_v32, %v3846_v48  ;;  %v9195_v22 = vpop.f32.mrb[210].mxu0  ;;  %v9343_v30 = vpop.f32.mrb[210].mxu1 }
 0x280   :  { %v8259_v59 = vpack.c.bf16 %v5997_v13, %v5996_v12  ;;  %v5705_v62 = vmax.f32 %v4231_v1, %v9342_v8  ;;  %v4232_v51 = vmax.f32 %v13194_v35, %v9195_v22  ;;  %v3849_v27 = vpop.f32.mrb[211].mxu0  ;;  %v5323_v41 = vpop.f32.mrb[211].mxu1  ;;  %v13207_v13 = vld [vmem:[#allocation97_spill] sm:$0xff] }
 0x281   :  { %v8254_v54 = vpack.c.bf16 %v5995_v6, %v5994_v42  ;;  %v5703_v2 = vmax.f32 %v4229_v33, %v5320_v11  ;;  %v4230_v18 = vmax.f32 %v13197_v37, %v3849_v27  ;;  %v13209_v43 = vmax.f32 %v13207_v13, %v13208_v61 }
 0x282   :  { %8491 = vst [vmem:[%s12558_s3 + $0xf8] sm:$0xff] %v8259_v59   ;;  %v5856_v9 = vadd.f32 %v12123_v19, %v5705_v62  ;;  %v5706_v26 = vmax.f32 %v4232_v51, %v9343_v30  ;;  %v13210_v30 = vld [vmem:[#allocation99_spill] sm:$0xff]  ;;  %v13211_v59 = vld [vmem:[#allocation100_spill] sm:$0xff] }
 0x283   :  { %8490 = vst [vmem:[%s12558_s3 + $0xf0] sm:$0xff] %v8254_v54   ;;  %v5854_v52 = vadd.f32 %v12123_v19, %v5703_v2  ;;  %v5704_v53 = vmax.f32 %v4230_v18, %v5323_v41  ;;  %v13212_v62 = vmax.f32 %v13210_v30, %v13211_v59  ;;  %v13213_v41 = vld [vmem:[#allocation101_spill] sm:$0xff]  ;;  %v13214_v54 = vld [vmem:[#allocation102_spill] sm:$0xff] }
 0x284   :  { %v5857_v39 = vadd.f32 %v12123_v19, %v5706_v26  ;;  %v6000_v46 = vmax.f32 %v5856_v9, 0.0  ;;  %v13215_v2 = vmax.f32 %v13213_v41, %v13214_v54  ;;  %v13216_v26 = vld [vmem:[#allocation103_spill] sm:$0xff]  ;;  %v13232_v30 = vld [vmem:[#allocation114_spill] sm:$0xff] }
 0x285   :  { %v5855_v40 = vadd.f32 %v12123_v19, %v5704_v53  ;;  %v9198_v44 = vpop.f32.mrb[212].mxu0  ;;  %v9346_v45 = vpop.f32.mrb[212].mxu1  ;;  %v5998_v25 = vmax.f32 %v5854_v52, 0.0  ;;  %v13217_v52 = vld [vmem:[#allocation104_spill] sm:$0xff] }
 0x286   :  { %v6001_v47 = vmax.f32 %v5857_v39, 0.0  ;;  %v4235_v14 = vmax.f32 %v13200_v63, %v9198_v44  ;;  %v3862_v20 = vpop.f32.mrb[213].mxu0  ;;  %v5336_v17 = vpop.f32.mrb[213].mxu1  ;;  %v13218_v53 = vmax.f32 %v13216_v26, %v13217_v52 }
 0x287   :  { %v5999_v31 = vmax.f32 %v5855_v40, 0.0  ;;  %v4233_v55 = vmax.f32 %v13203_v5, %v3862_v20  ;;  %v9199_v56 = vpop.f32.mrb[214].mxu0  ;;  %v9347_v23 = vpop.f32.mrb[214].mxu1 }
 0x288   :  { %v8269_v24 = vpack.c.bf16 %v6001_v47, %v6000_v46  ;;  %v5709_v28 = vmax.f32 %v4235_v14, %v9346_v45  ;;  %v4236_v57 = vmax.f32 %v13206_v38, %v9199_v56  ;;  %v3865_v58 = vpop.f32.mrb[215].mxu0  ;;  %v5339_v7 = vpop.f32.mrb[215].mxu1  ;;  %v13219_v47 = vld [vmem:[#allocation105_spill] sm:$0xff] }
 0x289   :  { %v8264_v8 = vpack.c.bf16 %v5999_v31, %v5998_v25  ;;  %v5707_v12 = vmax.f32 %v4233_v55, %v5336_v17  ;;  %v4234_v0 = vmax.f32 %v13209_v43, %v3865_v58  ;;  %v13221_v49 = vmax.f32 %v13219_v47, %v13220_v15 }
 0x28a   :  { %8493 = vst [vmem:[%s12558_s3 + $0x108] sm:$0xff] %v8269_v24   ;;  %v5860_v1 = vadd.f32 %v12123_v19, %v5709_v28  ;;  %v5710_v48 = vmax.f32 %v4236_v57, %v9347_v23  ;;  %v13222_v23 = vld [vmem:[#allocation107_spill] sm:$0xff]  ;;  %v13223_v24 = vld [vmem:[#allocation108_spill] sm:$0xff] }
 0x28b   :  { %8492 = vst [vmem:[%s12558_s3 + $0x100] sm:$0xff] %v8264_v8   ;;  %v5858_v11 = vadd.f32 %v12123_v19, %v5707_v12  ;;  %v5708_v42 = vmax.f32 %v4234_v0, %v5339_v7  ;;  %v13224_v28 = vmax.f32 %v13222_v23, %v13223_v24  ;;  %v13225_v7 = vld [vmem:[#allocation109_spill] sm:$0xff]  ;;  %v13226_v8 = vld [vmem:[#allocation110_spill] sm:$0xff] }
 0x28c   :  { %v5861_v6 = vadd.f32 %v12123_v19, %v5710_v48  ;;  %v6004_v33 = vmax.f32 %v5860_v1, 0.0  ;;  %v13227_v12 = vmax.f32 %v13225_v7, %v13226_v8  ;;  %v13228_v48 = vld [vmem:[#allocation111_spill] sm:$0xff]  ;;  %v13244_v23 = vld [vmem:[#allocation122_spill] sm:$0xff] }
 0x28d   :  { %v5859_v10 = vadd.f32 %v12123_v19, %v5708_v42  ;;  %v9202_v16 = vpop.f32.mrb[216].mxu0  ;;  %v9350_v32 = vpop.f32.mrb[216].mxu1  ;;  %v6002_v51 = vmax.f32 %v5858_v11, 0.0  ;;  %v13229_v11 = vld [vmem:[#allocation112_spill] sm:$0xff] }
 0x28e   :  { %v6005_v22 = vmax.f32 %v5861_v6, 0.0  ;;  %v4239_v50 = vmax.f32 %v13212_v62, %v9202_v16  ;;  %v3878_v34 = vpop.f32.mrb[217].mxu0  ;;  %v5352_v35 = vpop.f32.mrb[217].mxu1  ;;  %v13230_v42 = vmax.f32 %v13228_v48, %v13229_v11 }
 0x28f   :  { %v6003_v27 = vmax.f32 %v5859_v10, 0.0  ;;  %v4237_v3 = vmax.f32 %v13215_v2, %v3878_v34  ;;  %v9203_v36 = vpop.f32.mrb[218].mxu0  ;;  %v9351_v37 = vpop.f32.mrb[218].mxu1 }
 0x290   :  { %v8279_v18 = vpack.c.bf16 %v6005_v22, %v6004_v33  ;;  %v5713_v9 = vmax.f32 %v4239_v50, %v9350_v32  ;;  %v4240_v39 = vmax.f32 %v13218_v53, %v9203_v36  ;;  %v3881_v40 = vpop.f32.mrb[219].mxu0  ;;  %v5355_v44 = vpop.f32.mrb[219].mxu1  ;;  %v13231_v22 = vld [vmem:[#allocation113_spill] sm:$0xff] }
 0x291   :  { %v8274_v45 = vpack.c.bf16 %v6003_v27, %v6002_v51  ;;  %v5711_v46 = vmax.f32 %v4237_v3, %v5352_v35  ;;  %v4238_v63 = vmax.f32 %v13221_v49, %v3881_v40  ;;  %v13233_v59 = vmax.f32 %v13231_v22, %v13232_v30 }
 0x292   :  { %8495 = vst [vmem:[%s12558_s3 + $0x118] sm:$0xff] %v8279_v18   ;;  %v5864_v14 = vadd.f32 %v12123_v19, %v5713_v9  ;;  %v5714_v20 = vmax.f32 %v4240_v39, %v9351_v37  ;;  %v13234_v37 = vld [vmem:[#allocation115_spill] sm:$0xff]  ;;  %v13235_v18 = vld [vmem:[#allocation116_spill] sm:$0xff] }
 0x293   :  { %8494 = vst [vmem:[%s12558_s3 + $0x110] sm:$0xff] %v8274_v45   ;;  %v5862_v17 = vadd.f32 %v12123_v19, %v5711_v46  ;;  %v5712_v25 = vmax.f32 %v4238_v63, %v5355_v44  ;;  %v13236_v9 = vmax.f32 %v13234_v37, %v13235_v18  ;;  %v13237_v44 = vld [vmem:[#allocation117_spill] sm:$0xff]  ;;  %v13238_v45 = vld [vmem:[#allocation118_spill] sm:$0xff] }
 0x294   :  { %v5865_v31 = vadd.f32 %v12123_v19, %v5714_v20  ;;  %v6008_v55 = vmax.f32 %v5864_v14, 0.0  ;;  %v13239_v46 = vmax.f32 %v13237_v44, %v13238_v45  ;;  %v13240_v20 = vld [vmem:[#allocation119_spill] sm:$0xff]  ;;  %v13256_v37 = vld [vmem:[#allocation130_spill] sm:$0xff] }
 0x295   :  { %v5863_v21 = vadd.f32 %v12123_v19, %v5712_v25  ;;  %v9206_v4 = vpop.f32.mrb[220].mxu0  ;;  %v9354_v5 = vpop.f32.mrb[220].mxu1  ;;  %v6006_v57 = vmax.f32 %v5862_v17, 0.0  ;;  %v13241_v17 = vld [vmem:[#allocation120_spill] sm:$0xff] }
 0x296   :  { %v6009_v56 = vmax.f32 %v5865_v31, 0.0  ;;  %v4243_v29 = vmax.f32 %v13224_v28, %v9206_v4  ;;  %v3894_v60 = vpop.f32.mrb[221].mxu0  ;;  %v5368_v38 = vpop.f32.mrb[221].mxu1  ;;  %v13242_v25 = vmax.f32 %v13240_v20, %v13241_v17 }
 0x297   :  { %v6007_v58 = vmax.f32 %v5863_v21, 0.0  ;;  %v4241_v13 = vmax.f32 %v13227_v12, %v3894_v60  ;;  %v9207_v61 = vpop.f32.mrb[222].mxu0  ;;  %v9355_v43 = vpop.f32.mrb[222].mxu1 }
 0x298   :  { %v8289_v0 = vpack.c.bf16 %v6009_v56, %v6008_v55  ;;  %v5717_v1 = vmax.f32 %v4243_v29, %v9354_v5  ;;  %v4244_v6 = vmax.f32 %v13230_v42, %v9207_v61  ;;  %v3897_v10 = vpop.f32.mrb[223].mxu0  ;;  %v5371_v16 = vpop.f32.mrb[223].mxu1  ;;  %v13243_v56 = vld [vmem:[#allocation121_spill] sm:$0xff] }
 0x299   :  { %v8284_v32 = vpack.c.bf16 %v6007_v58, %v6006_v57  ;;  %v5715_v33 = vmax.f32 %v4241_v13, %v5368_v38  ;;  %v4242_v62 = vmax.f32 %v13233_v59, %v3897_v10  ;;  %v13245_v24 = vmax.f32 %v13243_v56, %v13244_v23 }
 0x29a   :  { %8497 = vst [vmem:[%s12558_s3 + $0x128] sm:$0xff] %v8289_v0   ;;  %v5868_v50 = vadd.f32 %v12123_v19, %v5717_v1  ;;  %v5718_v34 = vmax.f32 %v4244_v6, %v9355_v43  ;;  %v13246_v43 = vld [vmem:[#allocation123_spill] sm:$0xff]  ;;  %v13247_v0 = vld [vmem:[#allocation124_spill] sm:$0xff] }
 0x29b   :  { %8496 = vst [vmem:[%s12558_s3 + $0x120] sm:$0xff] %v8284_v32   ;;  %v5866_v35 = vadd.f32 %v12123_v19, %v5715_v33  ;;  %v5716_v51 = vmax.f32 %v4242_v62, %v5371_v16  ;;  %v13248_v1 = vmax.f32 %v13246_v43, %v13247_v0  ;;  %v13249_v16 = vld [vmem:[#allocation125_spill] sm:$0xff]  ;;  %v13250_v32 = vld [vmem:[#allocation126_spill] sm:$0xff] }
 0x29c   :  { %v5869_v27 = vadd.f32 %v12123_v19, %v5718_v34  ;;  %v6012_v3 = vmax.f32 %v5868_v50, 0.0  ;;  %v13251_v33 = vmax.f32 %v13249_v16, %v13250_v32  ;;  %v13252_v34 = vld [vmem:[#allocation127_spill] sm:$0xff]  ;;  %v13268_v43 = vld [vmem:[#allocation138_spill] sm:$0xff] }
 0x29d   :  { %v5867_v41 = vadd.f32 %v12123_v19, %v5716_v51  ;;  %v9210_v54 = vpop.f32.mrb[224].mxu0  ;;  %v9358_v2 = vpop.f32.mrb[224].mxu1  ;;  %v6010_v39 = vmax.f32 %v5866_v35, 0.0  ;;  %v13253_v35 = vld [vmem:[#allocation128_spill] sm:$0xff] }
 0x29e   :  { %v6013_v36 = vmax.f32 %v5869_v27, 0.0  ;;  %v4247_v26 = vmax.f32 %v13236_v9, %v9210_v54  ;;  %v3910_v52 = vpop.f32.mrb[225].mxu0  ;;  %v5384_v53 = vpop.f32.mrb[225].mxu1  ;;  %v13254_v51 = vmax.f32 %v13252_v34, %v13253_v35 }
 0x29f   :  { %v6011_v40 = vmax.f32 %v5867_v41, 0.0  ;;  %v4245_v47 = vmax.f32 %v13239_v46, %v3910_v52  ;;  %v9211_v15 = vpop.f32.mrb[226].mxu0  ;;  %v9359_v49 = vpop.f32.mrb[226].mxu1 }
 0x2a0   :  { %v8299_v63 = vpack.c.bf16 %v6013_v36, %v6012_v3  ;;  %v5721_v14 = vmax.f32 %v4247_v26, %v9358_v2  ;;  %v4248_v31 = vmax.f32 %v13242_v25, %v9211_v15  ;;  %v3913_v21 = vpop.f32.mrb[227].mxu0  ;;  %v5387_v4 = vpop.f32.mrb[227].mxu1  ;;  %v13255_v36 = vld [vmem:[#allocation129_spill] sm:$0xff] }
 0x2a1   :  { %v8294_v5 = vpack.c.bf16 %v6011_v40, %v6010_v39  ;;  %v5719_v55 = vmax.f32 %v4245_v47, %v5384_v53  ;;  %v4246_v28 = vmax.f32 %v13245_v24, %v3913_v21  ;;  %v13257_v18 = vmax.f32 %v13255_v36, %v13256_v37 }
 0x2a2   :  { %8499 = vst [vmem:[%s12558_s3 + $0x138] sm:$0xff] %v8299_v63   ;;  %v5872_v29 = vadd.f32 %v12123_v19, %v5721_v14  ;;  %v5722_v60 = vmax.f32 %v4248_v31, %v9359_v49  ;;  %v13258_v49 = vld [vmem:[#allocation131_spill] sm:$0xff]  ;;  %v13259_v63 = vld [vmem:[#allocation132_spill] sm:$0xff] }
 0x2a3   :  { %8498 = vst [vmem:[%s12558_s3 + $0x130] sm:$0xff] %v8294_v5   ;;  %v5870_v38 = vadd.f32 %v12123_v19, %v5719_v55  ;;  %v5720_v57 = vmax.f32 %v4246_v28, %v5387_v4  ;;  %v13260_v14 = vmax.f32 %v13258_v49, %v13259_v63  ;;  %v13261_v4 = vld [vmem:[#allocation133_spill] sm:$0xff]  ;;  %v13262_v5 = vld [vmem:[#allocation134_spill] sm:$0xff] }
 0x2a4   :  { %v5873_v58 = vadd.f32 %v12123_v19, %v5722_v60  ;;  %v6016_v13 = vmax.f32 %v5872_v29, 0.0  ;;  %v13263_v55 = vmax.f32 %v13261_v4, %v13262_v5  ;;  %v13264_v60 = vld [vmem:[#allocation135_spill] sm:$0xff]  ;;  %v13280_v49 = vld [vmem:[#allocation146_spill] sm:$0xff] }
 0x2a5   :  { %v5871_v7 = vadd.f32 %v12123_v19, %v5720_v57  ;;  %v9214_v8 = vpop.f32.mrb[228].mxu0  ;;  %v9362_v12 = vpop.f32.mrb[228].mxu1  ;;  %v6014_v6 = vmax.f32 %v5870_v38, 0.0  ;;  %v13265_v38 = vld [vmem:[#allocation136_spill] sm:$0xff] }
 0x2a6   :  { %v6017_v61 = vmax.f32 %v5873_v58, 0.0  ;;  %v4251_v48 = vmax.f32 %v13248_v1, %v9214_v8  ;;  %v3926_v11 = vpop.f32.mrb[229].mxu0  ;;  %v5400_v42 = vpop.f32.mrb[229].mxu1  ;;  %v13266_v57 = vmax.f32 %v13264_v60, %v13265_v38 }
 0x2a7   :  { %v6015_v10 = vmax.f32 %v5871_v7, 0.0  ;;  %v4249_v22 = vmax.f32 %v13251_v33, %v3926_v11  ;;  %v9215_v30 = vpop.f32.mrb[230].mxu0  ;;  %v9363_v59 = vpop.f32.mrb[230].mxu1 }
 0x2a8   :  { %v8309_v62 = vpack.c.bf16 %v6017_v61, %v6016_v13  ;;  %v5725_v50 = vmax.f32 %v4251_v48, %v9362_v12  ;;  %v4252_v27 = vmax.f32 %v13254_v51, %v9215_v30  ;;  %v3929_v41 = vpop.f32.mrb[231].mxu0  ;;  %v5403_v54 = vpop.f32.mrb[231].mxu1  ;;  %v13267_v61 = vld [vmem:[#allocation137_spill] sm:$0xff] }
 0x2a9   :  { %v8304_v2 = vpack.c.bf16 %v6015_v10, %v6014_v6  ;;  %v5723_v3 = vmax.f32 %v4249_v22, %v5400_v42  ;;  %v4250_v9 = vmax.f32 %v13257_v18, %v3929_v41  ;;  %v13269_v0 = vmax.f32 %v13267_v61, %v13268_v43 }
 0x2aa   :  { %8501 = vst [vmem:[%s12558_s3 + $0x148] sm:$0xff] %v8309_v62   ;;  %v5876_v26 = vadd.f32 %v12123_v19, %v5725_v50  ;;  %v5726_v52 = vmax.f32 %v4252_v27, %v9363_v59  ;;  %v13270_v59 = vld [vmem:[#allocation139_spill] sm:$0xff]  ;;  %v13271_v62 = vld [vmem:[#allocation140_spill] sm:$0xff] }
 0x2ab   :  { %8500 = vst [vmem:[%s12558_s3 + $0x140] sm:$0xff] %v8304_v2   ;;  %v5874_v53 = vadd.f32 %v12123_v19, %v5723_v3  ;;  %v5724_v39 = vmax.f32 %v4250_v9, %v5403_v54  ;;  %v13272_v50 = vmax.f32 %v13270_v59, %v13271_v62  ;;  %v13273_v54 = vld [vmem:[#allocation141_spill] sm:$0xff]  ;;  %v13274_v2 = vld [vmem:[#allocation142_spill] sm:$0xff] }
 0x2ac   :  { %v5877_v40 = vadd.f32 %v12123_v19, %v5726_v52  ;;  %v6020_v47 = vmax.f32 %v5876_v26, 0.0  ;;  %v13275_v3 = vmax.f32 %v13273_v54, %v13274_v2  ;;  %v13276_v52 = vld [vmem:[#allocation143_spill] sm:$0xff]  ;;  %v13292_v59 = vld [vmem:[#allocation154_spill] sm:$0xff] }
 0x2ad   :  { %v5875_v44 = vadd.f32 %v12123_v19, %v5724_v39  ;;  %v9218_v45 = vpop.f32.mrb[232].mxu0  ;;  %v9366_v46 = vpop.f32.mrb[232].mxu1  ;;  %v6018_v31 = vmax.f32 %v5874_v53, 0.0  ;;  %v13277_v53 = vld [vmem:[#allocation144_spill] sm:$0xff] }
 0x2ae   :  { %v6021_v15 = vmax.f32 %v5877_v40, 0.0  ;;  %v4255_v20 = vmax.f32 %v13260_v14, %v9218_v45  ;;  %v3942_v17 = vpop.f32.mrb[233].mxu0  ;;  %v5416_v25 = vpop.f32.mrb[233].mxu1  ;;  %v13278_v39 = vmax.f32 %v13276_v52, %v13277_v53 }
 0x2af   :  { %v6019_v21 = vmax.f32 %v5875_v44, 0.0  ;;  %v4253_v56 = vmax.f32 %v13263_v55, %v3942_v17  ;;  %v9219_v23 = vpop.f32.mrb[234].mxu0  ;;  %v9367_v24 = vpop.f32.mrb[234].mxu1 }
 0x2b0   :  { %v8319_v28 = vpack.c.bf16 %v6021_v15, %v6020_v47  ;;  %v5729_v29 = vmax.f32 %v4255_v20, %v9366_v46  ;;  %v4256_v58 = vmax.f32 %v13266_v57, %v9219_v23  ;;  %v3945_v7 = vpop.f32.mrb[235].mxu0  ;;  %v5419_v8 = vpop.f32.mrb[235].mxu1  ;;  %v13279_v15 = vld [vmem:[#allocation145_spill] sm:$0xff] }
 0x2b1   :  { %v8314_v12 = vpack.c.bf16 %v6019_v21, %v6018_v31  ;;  %v5727_v13 = vmax.f32 %v4253_v56, %v5416_v25  ;;  %v4254_v1 = vmax.f32 %v13269_v0, %v3945_v7  ;;  %v13281_v63 = vmax.f32 %v13279_v15, %v13280_v49 }
 0x2b2   :  { %8503 = vst [vmem:[%s12558_s3 + $0x158] sm:$0xff] %v8319_v28   ;;  %v5880_v48 = vadd.f32 %v12123_v19, %v5729_v29  ;;  %v5730_v11 = vmax.f32 %v4256_v58, %v9367_v24  ;;  %v13282_v24 = vld [vmem:[#allocation147_spill] sm:$0xff]  ;;  %v13283_v28 = vld [vmem:[#allocation148_spill] sm:$0xff] }
 0x2b3   :  { %8502 = vst [vmem:[%s12558_s3 + $0x150] sm:$0xff] %v8314_v12   ;;  %v5878_v42 = vadd.f32 %v12123_v19, %v5727_v13  ;;  %v5728_v6 = vmax.f32 %v4254_v1, %v5419_v8  ;;  %v13284_v29 = vmax.f32 %v13282_v24, %v13283_v28  ;;  %v13285_v8 = vld [vmem:[#allocation149_spill] sm:$0xff]  ;;  %v13286_v12 = vld [vmem:[#allocation150_spill] sm:$0xff] }
 0x2b4   :  { %v5881_v10 = vadd.f32 %v12123_v19, %v5730_v11  ;;  %v6024_v22 = vmax.f32 %v5880_v48, 0.0  ;;  %v13287_v13 = vmax.f32 %v13285_v8, %v13286_v12  ;;  %v13288_v11 = vld [vmem:[#allocation151_spill] sm:$0xff]  ;;  %v13304_v24 = vld [vmem:[#allocation162_spill] sm:$0xff] }
 0x2b5   :  { %v5879_v16 = vadd.f32 %v12123_v19, %v5728_v6  ;;  %v9222_v32 = vpop.f32.mrb[236].mxu0  ;;  %v9370_v33 = vpop.f32.mrb[236].mxu1  ;;  %v6022_v27 = vmax.f32 %v5878_v42, 0.0  ;;  %v13289_v42 = vld [vmem:[#allocation152_spill] sm:$0xff] }
 0x2b6   :  { %v6025_v30 = vmax.f32 %v5881_v10, 0.0  ;;  %v4259_v34 = vmax.f32 %v13272_v50, %v9222_v32  ;;  %v3958_v35 = vpop.f32.mrb[237].mxu0  ;;  %v5432_v51 = vpop.f32.mrb[237].mxu1  ;;  %v13290_v6 = vmax.f32 %v13288_v11, %v13289_v42 }
 0x2b7   :  { %v6023_v41 = vmax.f32 %v5879_v16, 0.0  ;;  %v4257_v36 = vmax.f32 %v13275_v3, %v3958_v35  ;;  %v9223_v37 = vpop.f32.mrb[238].mxu0  ;;  %v9371_v18 = vpop.f32.mrb[238].mxu1 }
 0x2b8   :  { %v8329_v9 = vpack.c.bf16 %v6025_v30, %v6024_v22  ;;  %v5733_v26 = vmax.f32 %v4259_v34, %v9370_v33  ;;  %v4260_v40 = vmax.f32 %v13278_v39, %v9223_v37  ;;  %v3961_v44 = vpop.f32.mrb[239].mxu0  ;;  %v5435_v45 = vpop.f32.mrb[239].mxu1  ;;  %v13291_v30 = vld [vmem:[#allocation153_spill] sm:$0xff] }
 0x2b9   :  { %v8324_v46 = vpack.c.bf16 %v6023_v41, %v6022_v27  ;;  %v5731_v47 = vmax.f32 %v4257_v36, %v5432_v51  ;;  %v4258_v14 = vmax.f32 %v13281_v63, %v3961_v44  ;;  %v13293_v62 = vmax.f32 %v13291_v30, %v13292_v59 }
 0x2ba   :  { %8505 = vst [vmem:[%s12558_s3 + $0x168] sm:$0xff] %v8329_v9   ;;  %v5884_v20 = vadd.f32 %v12123_v19, %v5733_v26  ;;  %v5734_v17 = vmax.f32 %v4260_v40, %v9371_v18  ;;  %v13294_v18 = vld [vmem:[#allocation155_spill] sm:$0xff]  ;;  %v13295_v9 = vld [vmem:[#allocation156_spill] sm:$0xff] }
 0x2bb   :  { %8504 = vst [vmem:[%s12558_s3 + $0x160] sm:$0xff] %v8324_v46   ;;  %v5882_v25 = vadd.f32 %v12123_v19, %v5731_v47  ;;  %v5732_v31 = vmax.f32 %v4258_v14, %v5435_v45  ;;  %v13296_v26 = vmax.f32 %v13294_v18, %v13295_v9  ;;  %v13297_v45 = vld [vmem:[#allocation157_spill] sm:$0xff]  ;;  %v13298_v46 = vld [vmem:[#allocation158_spill] sm:$0xff] }
 0x2bc   :  { %v5885_v21 = vadd.f32 %v12123_v19, %v5734_v17  ;;  %v6028_v56 = vmax.f32 %v5884_v20, 0.0  ;;  %v13299_v47 = vmax.f32 %v13297_v45, %v13298_v46  ;;  %v13300_v17 = vld [vmem:[#allocation159_spill] sm:$0xff]  ;;  %v13316_v18 = vld [vmem:[#allocation170_spill] sm:$0xff] }
 0x2bd   :  { %v5883_v4 = vadd.f32 %v12123_v19, %v5732_v31  ;;  %v9226_v5 = vpop.f32.mrb[240].mxu0  ;;  %v9374_v55 = vpop.f32.mrb[240].mxu1  ;;  %v6026_v58 = vmax.f32 %v5882_v25, 0.0  ;;  %v13301_v25 = vld [vmem:[#allocation160_spill] sm:$0xff] }
 0x2be   :  { %v6029_v23 = vmax.f32 %v5885_v21, 0.0  ;;  %v4263_v60 = vmax.f32 %v13284_v29, %v9226_v5  ;;  %v3974_v38 = vpop.f32.mrb[241].mxu0  ;;  %v5448_v57 = vpop.f32.mrb[241].mxu1  ;;  %v13302_v31 = vmax.f32 %v13300_v17, %v13301_v25 }
 0x2bf   :  { %v6027_v7 = vmax.f32 %v5883_v4, 0.0  ;;  %v4261_v61 = vmax.f32 %v13287_v13, %v3974_v38  ;;  %v9227_v43 = vpop.f32.mrb[242].mxu0  ;;  %v9375_v0 = vpop.f32.mrb[242].mxu1 }
 0x2c0   :  { %v8339_v1 = vpack.c.bf16 %v6029_v23, %v6028_v56  ;;  %v5737_v48 = vmax.f32 %v4263_v60, %v9374_v55  ;;  %v4264_v10 = vmax.f32 %v13290_v6, %v9227_v43  ;;  %v3977_v16 = vpop.f32.mrb[243].mxu0  ;;  %v5451_v32 = vpop.f32.mrb[243].mxu1  ;;  %v13303_v23 = vld [vmem:[#allocation161_spill] sm:$0xff] }
 0x2c1   :  { %v8334_v33 = vpack.c.bf16 %v6027_v7, %v6026_v58  ;;  %v5735_v22 = vmax.f32 %v4261_v61, %v5448_v57  ;;  %v4262_v50 = vmax.f32 %v13293_v62, %v3977_v16  ;;  %v13305_v28 = vmax.f32 %v13303_v23, %v13304_v24 }
 0x2c2   :  { %8507 = vst [vmem:[%s12558_s3 + $0x178] sm:$0xff] %v8339_v1   ;;  %v5888_v34 = vadd.f32 %v12123_v19, %v5737_v48  ;;  %v5738_v35 = vmax.f32 %v4264_v10, %v9375_v0  ;;  %v13306_v0 = vld [vmem:[#allocation163_spill] sm:$0xff]  ;;  %v13307_v1 = vld [vmem:[#allocation164_spill] sm:$0xff] }
 0x2c3   :  { %8506 = vst [vmem:[%s12558_s3 + $0x170] sm:$0xff] %v8334_v33   ;;  %v5886_v51 = vadd.f32 %v12123_v19, %v5735_v22  ;;  %v5736_v27 = vmax.f32 %v4262_v50, %v5451_v32  ;;  %v13308_v48 = vmax.f32 %v13306_v0, %v13307_v1  ;;  %v13309_v32 = vld [vmem:[#allocation165_spill] sm:$0xff]  ;;  %v13310_v33 = vld [vmem:[#allocation166_spill] sm:$0xff] }
 0x2c4   :  { %v5889_v41 = vadd.f32 %v12123_v19, %v5738_v35  ;;  %v6032_v36 = vmax.f32 %v5888_v34, 0.0  ;;  %v13311_v22 = vmax.f32 %v13309_v32, %v13310_v33  ;;  %v13312_v35 = vld [vmem:[#allocation167_spill] sm:$0xff]  ;;  %v13328_v0 = vld [vmem:[#allocation178_spill] sm:$0xff] }
 0x2c5   :  { %v5887_v54 = vadd.f32 %v12123_v19, %v5736_v27  ;;  %v9230_v2 = vpop.f32.mrb[244].mxu0  ;;  %v9378_v3 = vpop.f32.mrb[244].mxu1  ;;  %v6030_v40 = vmax.f32 %v5886_v51, 0.0  ;;  %v13313_v51 = vld [vmem:[#allocation168_spill] sm:$0xff] }
 0x2c6   :  { %v6033_v37 = vmax.f32 %v5889_v41, 0.0  ;;  %v4267_v52 = vmax.f32 %v13296_v26, %v9230_v2  ;;  %v3990_v53 = vpop.f32.mrb[245].mxu0  ;;  %v5464_v39 = vpop.f32.mrb[245].mxu1  ;;  %v13314_v27 = vmax.f32 %v13312_v35, %v13313_v51 }
 0x2c7   :  { %v6031_v44 = vmax.f32 %v5887_v54, 0.0  ;;  %v4265_v15 = vmax.f32 %v13299_v47, %v3990_v53  ;;  %v9231_v49 = vpop.f32.mrb[246].mxu0  ;;  %v9379_v63 = vpop.f32.mrb[246].mxu1 }
 0x2c8   :  { %v8349_v14 = vpack.c.bf16 %v6033_v37, %v6032_v36  ;;  %v5741_v20 = vmax.f32 %v4267_v52, %v9378_v3  ;;  %v4268_v21 = vmax.f32 %v13302_v31, %v9231_v49  ;;  %v3993_v4 = vpop.f32.mrb[247].mxu0  ;;  %v5467_v5 = vpop.f32.mrb[247].mxu1  ;;  %v13315_v37 = vld [vmem:[#allocation169_spill] sm:$0xff] }
 0x2c9   :  { %v8344_v55 = vpack.c.bf16 %v6031_v44, %v6030_v40  ;;  %v5739_v56 = vmax.f32 %v4265_v15, %v5464_v39  ;;  %v4266_v29 = vmax.f32 %v13305_v28, %v3993_v4  ;;  %v13317_v9 = vmax.f32 %v13315_v37, %v13316_v18 }
 0x2ca   :  { %8509 = vst [vmem:[%s12558_s3 + $0x188] sm:$0xff] %v8349_v14   ;;  %v5892_v60 = vadd.f32 %v12123_v19, %v5741_v20  ;;  %v5742_v38 = vmax.f32 %v4268_v21, %v9379_v63  ;;  %v13318_v63 = vld [vmem:[#allocation171_spill] sm:$0xff]  ;;  %v13319_v14 = vld [vmem:[#allocation172_spill] sm:$0xff] }
 0x2cb   :  { %8508 = vst [vmem:[%s12558_s3 + $0x180] sm:$0xff] %v8344_v55   ;;  %v5890_v57 = vadd.f32 %v12123_v19, %v5739_v56  ;;  %v5740_v58 = vmax.f32 %v4266_v29, %v5467_v5  ;;  %v13320_v20 = vmax.f32 %v13318_v63, %v13319_v14  ;;  %v13321_v5 = vld [vmem:[#allocation173_spill] sm:$0xff]  ;;  %v13322_v55 = vld [vmem:[#allocation174_spill] sm:$0xff] }
 0x2cc   :  { %v5893_v7 = vadd.f32 %v12123_v19, %v5742_v38  ;;  %v6036_v61 = vmax.f32 %v5892_v60, 0.0  ;;  %v13323_v56 = vmax.f32 %v13321_v5, %v13322_v55  ;;  %v13324_v38 = vld [vmem:[#allocation175_spill] sm:$0xff]  ;;  %v13340_v63 = vld [vmem:[#allocation186_spill] sm:$0xff] }
 0x2cd   :  { %v5891_v8 = vadd.f32 %v12123_v19, %v5740_v58  ;;  %v9234_v12 = vpop.f32.mrb[248].mxu0  ;;  %v9382_v13 = vpop.f32.mrb[248].mxu1  ;;  %v6034_v10 = vmax.f32 %v5890_v57, 0.0  ;;  %v13325_v57 = vld [vmem:[#allocation176_spill] sm:$0xff] }
 0x2ce   :  { %v6037_v43 = vmax.f32 %v5893_v7, 0.0  ;;  %v4271_v11 = vmax.f32 %v13308_v48, %v9234_v12  ;;  %v4006_v42 = vpop.f32.mrb[249].mxu0  ;;  %v5480_v6 = vpop.f32.mrb[249].mxu1  ;;  %v13326_v58 = vmax.f32 %v13324_v38, %v13325_v57 }
 0x2cf   :  { %v6035_v16 = vmax.f32 %v5891_v8, 0.0  ;;  %v4269_v30 = vmax.f32 %v13311_v22, %v4006_v42  ;;  %v9235_v59 = vpop.f32.mrb[250].mxu0  ;;  %v9383_v62 = vpop.f32.mrb[250].mxu1 }
 0x2d0   :  { %v8359_v50 = vpack.c.bf16 %v6037_v43, %v6036_v61  ;;  %v5745_v34 = vmax.f32 %v4271_v11, %v9382_v13  ;;  %v4272_v41 = vmax.f32 %v13314_v27, %v9235_v59  ;;  %v4009_v54 = vpop.f32.mrb[251].mxu0  ;;  %v5483_v2 = vpop.f32.mrb[251].mxu1  ;;  %v13327_v43 = vld [vmem:[#allocation177_spill] sm:$0xff] }
 0x2d1   :  { %v8354_v3 = vpack.c.bf16 %v6035_v16, %v6034_v10  ;;  %v5743_v36 = vmax.f32 %v4269_v30, %v5480_v6  ;;  %v4270_v26 = vmax.f32 %v13317_v9, %v4009_v54  ;;  %v13329_v1 = vmax.f32 %v13327_v43, %v13328_v0 }
 0x2d2   :  { %8511 = vst [vmem:[%s12558_s3 + $0x198] sm:$0xff] %v8359_v50   ;;  %v5896_v52 = vadd.f32 %v12123_v19, %v5745_v34  ;;  %v5746_v53 = vmax.f32 %v4272_v41, %v9383_v62  ;;  %v13330_v62 = vld [vmem:[#allocation179_spill] sm:$0xff]  ;;  %v13331_v50 = vld [vmem:[#allocation180_spill] sm:$0xff] }
 0x2d3   :  { %8510 = vst [vmem:[%s12558_s3 + $0x190] sm:$0xff] %v8354_v3   ;;  %v5894_v39 = vadd.f32 %v12123_v19, %v5743_v36  ;;  %v5744_v40 = vmax.f32 %v4270_v26, %v5483_v2  ;;  %v13332_v34 = vmax.f32 %v13330_v62, %v13331_v50  ;;  %v13333_v2 = vld [vmem:[#allocation181_spill] sm:$0xff]  ;;  %v13334_v3 = vld [vmem:[#allocation182_spill] sm:$0xff] }
 0x2d4   :  { %v5897_v44 = vadd.f32 %v12123_v19, %v5746_v53  ;;  %v6040_v15 = vmax.f32 %v5896_v52, 0.0  ;;  %v13335_v36 = vmax.f32 %v13333_v2, %v13334_v3  ;;  %v13336_v53 = vld [vmem:[#allocation183_spill] sm:$0xff]  ;;  %v13352_v62 = vld [vmem:[#allocation194_spill] sm:$0xff] }
 0x2d5   :  { %v5895_v45 = vadd.f32 %v12123_v19, %v5744_v40  ;;  %v9238_v46 = vpop.f32.mrb[252].mxu0  ;;  %v9386_v47 = vpop.f32.mrb[252].mxu1  ;;  %v6038_v21 = vmax.f32 %v5894_v39, 0.0  ;;  %v13337_v39 = vld [vmem:[#allocation184_spill] sm:$0xff] }
 0x2d6   :  { %v6041_v49 = vmax.f32 %v5897_v44, 0.0  ;;  %v4275_v17 = vmax.f32 %v13320_v20, %v9238_v46  ;;  %v4022_v25 = vpop.f32.mrb[253].mxu0  ;;  %v5496_v31 = vpop.f32.mrb[253].mxu1  ;;  %v13338_v40 = vmax.f32 %v13336_v53, %v13337_v39 }
 0x2d7   :  { %v6039_v4 = vmax.f32 %v5895_v45, 0.0  ;;  %v4273_v23 = vmax.f32 %v13323_v56, %v4022_v25  ;;  %v9239_v24 = vpop.f32.mrb[254].mxu0  ;;  %v9387_v28 = vpop.f32.mrb[254].mxu1 }
 0x2d8   :  { %v8369_v29 = vpack.c.bf16 %v6041_v49, %v6040_v15  ;;  %v5749_v60 = vmax.f32 %v4275_v17, %v9386_v47  ;;  %v4276_v7 = vmax.f32 %v13326_v58, %v9239_v24  ;;  %v4025_v8 = vpop.f32.mrb[255].mxu0  ;;  %v5499_v12 = vpop.f32.mrb[255].mxu1  ;;  %v13339_v49 = vld [vmem:[#allocation185_spill] sm:$0xff] }
 0x2d9   :  { %v8364_v13 = vpack.c.bf16 %v6039_v4, %v6038_v21  ;;  %v5747_v61 = vmax.f32 %v4273_v23, %v5496_v31  ;;  %v4274_v48 = vmax.f32 %v13329_v1, %v4025_v8  ;;  %v13341_v14 = vmax.f32 %v13339_v49, %v13340_v63 }
 0x2da   :  { %8513 = vst [vmem:[%s12558_s3 + $0x1a8] sm:$0xff] %v8369_v29   ;;  %v5900_v11 = vadd.f32 %v12123_v19, %v5749_v60  ;;  %v5750_v42 = vmax.f32 %v4276_v7, %v9387_v28  ;;  %v13342_v28 = vld [vmem:[#allocation187_spill] sm:$0xff]  ;;  %v13343_v29 = vld [vmem:[#allocation188_spill] sm:$0xff] }
 0x2db   :  { %8512 = vst [vmem:[%s12558_s3 + $0x1a0] sm:$0xff] %v8364_v13   ;;  %v5898_v6 = vadd.f32 %v12123_v19, %v5747_v61  ;;  %v5748_v10 = vmax.f32 %v4274_v48, %v5499_v12  ;;  %v13344_v60 = vmax.f32 %v13342_v28, %v13343_v29  ;;  %v13345_v12 = vld [vmem:[#allocation189_spill] sm:$0xff]  ;;  %v13346_v13 = vld [vmem:[#allocation190_spill] sm:$0xff] }
 0x2dc   :  { %v5901_v16 = vadd.f32 %v12123_v19, %v5750_v42  ;;  %v6044_v30 = vmax.f32 %v5900_v11, 0.0  ;;  %v13347_v61 = vmax.f32 %v13345_v12, %v13346_v13  ;;  %v13348_v42 = vld [vmem:[#allocation191_spill] sm:$0xff]  ;;  %v13364_v28 = vld [vmem:[#allocation202_spill] sm:$0xff] }
 0x2dd   :  { %v5899_v32 = vadd.f32 %v12123_v19, %v5748_v10  ;;  %v9242_v33 = vpop.f32.mrb[0].mxu0  ;;  %v9390_v22 = vpop.f32.mrb[0].mxu1  ;;  %v6042_v41 = vmax.f32 %v5898_v6, 0.0  ;;  %v13349_v6 = vld [vmem:[#allocation192_spill] sm:$0xff] }
 0x2de   :  { %v6045_v59 = vmax.f32 %v5901_v16, 0.0  ;;  %v4279_v35 = vmax.f32 %v13332_v34, %v9242_v33  ;;  %v4038_v51 = vpop.f32.mrb[1].mxu0  ;;  %v5512_v27 = vpop.f32.mrb[1].mxu1  ;;  %v13350_v10 = vmax.f32 %v13348_v42, %v13349_v6 }
 0x2df   :  { %v6043_v54 = vmax.f32 %v5899_v32, 0.0  ;;  %v4277_v37 = vmax.f32 %v13335_v36, %v4038_v51  ;;  %v9243_v18 = vpop.f32.mrb[2].mxu0  ;;  %v9391_v9 = vpop.f32.mrb[2].mxu1 }
 0x2e0   :  { %v8379_v26 = vpack.c.bf16 %v6045_v59, %v6044_v30  ;;  %v5753_v52 = vmax.f32 %v4279_v35, %v9390_v22  ;;  %v4280_v44 = vmax.f32 %v13338_v40, %v9243_v18  ;;  %v4041_v45 = vpop.f32.mrb[3].mxu0  ;;  %v5515_v46 = vpop.f32.mrb[3].mxu1  ;;  %v13351_v59 = vld [vmem:[#allocation193_spill] sm:$0xff] }
 0x2e1   :  { %v8374_v47 = vpack.c.bf16 %v6043_v54, %v6042_v41  ;;  %v5751_v15 = vmax.f32 %v4277_v37, %v5512_v27  ;;  %v4278_v20 = vmax.f32 %v13341_v14, %v4041_v45  ;;  %v13353_v50 = vmax.f32 %v13351_v59, %v13352_v62 }
 0x2e2   :  { %8515 = vst [vmem:[%s12558_s3 + $0x1b8] sm:$0xff] %v8379_v26   ;;  %v5904_v17 = vadd.f32 %v12123_v19, %v5753_v52  ;;  %v5754_v25 = vmax.f32 %v4280_v44, %v9391_v9  ;;  %v13354_v9 = vld [vmem:[#allocation195_spill] sm:$0xff]  ;;  %v13355_v26 = vld [vmem:[#allocation196_spill] sm:$0xff] }
 0x2e3   :  { %8514 = vst [vmem:[%s12558_s3 + $0x1b0] sm:$0xff] %v8374_v47   ;;  %v5902_v31 = vadd.f32 %v12123_v19, %v5751_v15  ;;  %v5752_v21 = vmax.f32 %v4278_v20, %v5515_v46  ;;  %v13356_v52 = vmax.f32 %v13354_v9, %v13355_v26  ;;  %v13357_v46 = vld [vmem:[#allocation197_spill] sm:$0xff]  ;;  %v13358_v47 = vld [vmem:[#allocation198_spill] sm:$0xff] }
 0x2e4   :  { %v5905_v4 = vadd.f32 %v12123_v19, %v5754_v25  ;;  %v6048_v23 = vmax.f32 %v5904_v17, 0.0  ;;  %v13359_v15 = vmax.f32 %v13357_v46, %v13358_v47  ;;  %v13360_v25 = vld [vmem:[#allocation199_spill] sm:$0xff]  ;;  %v13376_v9 = vld [vmem:[#allocation210_spill] sm:$0xff] }
 0x2e5   :  { %v5903_v5 = vadd.f32 %v12123_v19, %v5752_v21  ;;  %v9246_v55 = vpop.f32.mrb[4].mxu0  ;;  %v9394_v56 = vpop.f32.mrb[4].mxu1  ;;  %v6046_v7 = vmax.f32 %v5902_v31, 0.0  ;;  %v13361_v31 = vld [vmem:[#allocation200_spill] sm:$0xff] }
 0x2e6   :  { %v6049_v24 = vmax.f32 %v5905_v4, 0.0  ;;  %v4283_v38 = vmax.f32 %v13344_v60, %v9246_v55  ;;  %v4054_v57 = vpop.f32.mrb[5].mxu0  ;;  %v5528_v58 = vpop.f32.mrb[5].mxu1  ;;  %v13362_v21 = vmax.f32 %v13360_v25, %v13361_v31 }
 0x2e7   :  { %v6047_v8 = vmax.f32 %v5903_v5, 0.0  ;;  %v4281_v43 = vmax.f32 %v13347_v61, %v4054_v57  ;;  %v9247_v0 = vpop.f32.mrb[6].mxu0  ;;  %v9395_v1 = vpop.f32.mrb[6].mxu1 }
 0x2e8   :  { %v8389_v48 = vpack.c.bf16 %v6049_v24, %v6048_v23  ;;  %v5757_v11 = vmax.f32 %v4283_v38, %v9394_v56  ;;  %v4284_v16 = vmax.f32 %v13350_v10, %v9247_v0  ;;  %v4057_v32 = vpop.f32.mrb[7].mxu0  ;;  %v5531_v33 = vpop.f32.mrb[7].mxu1  ;;  %v13363_v24 = vld [vmem:[#allocation201_spill] sm:$0xff] }
 0x2e9   :  { %v8384_v22 = vpack.c.bf16 %v6047_v8, %v6046_v7  ;;  %v5755_v30 = vmax.f32 %v4281_v43, %v5528_v58  ;;  %v4282_v34 = vmax.f32 %v13353_v50, %v4057_v32  ;;  %v13365_v29 = vmax.f32 %v13363_v24, %v13364_v28 }
 0x2ea   :  { %8517 = vst [vmem:[%s12558_s3 + $0x1c8] sm:$0xff] %v8389_v48   ;;  %v5908_v35 = vadd.f32 %v12123_v19, %v5757_v11  ;;  %v5758_v51 = vmax.f32 %v4284_v16, %v9395_v1  ;;  %v13366_v1 = vld [vmem:[#allocation203_spill] sm:$0xff]  ;;  %v13367_v48 = vld [vmem:[#allocation204_spill] sm:$0xff] }
 0x2eb   :  { %8516 = vst [vmem:[%s12558_s3 + $0x1c0] sm:$0xff] %v8384_v22   ;;  %v5906_v27 = vadd.f32 %v12123_v19, %v5755_v30  ;;  %v5756_v41 = vmax.f32 %v4282_v34, %v5531_v33  ;;  %v13368_v11 = vmax.f32 %v13366_v1, %v13367_v48  ;;  %v13369_v33 = vld [vmem:[#allocation205_spill] sm:$0xff]  ;;  %v13370_v22 = vld [vmem:[#allocation206_spill] sm:$0xff] }
 0x2ec   :  { %v5909_v54 = vadd.f32 %v12123_v19, %v5758_v51  ;;  %v6052_v37 = vmax.f32 %v5908_v35, 0.0  ;;  %v13371_v30 = vmax.f32 %v13369_v33, %v13370_v22  ;;  %v13372_v51 = vld [vmem:[#allocation207_spill] sm:$0xff]  ;;  %v13388_v1 = vld [vmem:[#allocation218_spill] sm:$0xff] }
 0x2ed   :  { %v5907_v2 = vadd.f32 %v12123_v19, %v5756_v41  ;;  %v9250_v3 = vpop.f32.mrb[8].mxu0  ;;  %v9398_v36 = vpop.f32.mrb[8].mxu1  ;;  %v6050_v44 = vmax.f32 %v5906_v27, 0.0  ;;  %v13373_v27 = vld [vmem:[#allocation208_spill] sm:$0xff] }
 0x2ee   :  { %v6053_v18 = vmax.f32 %v5909_v54, 0.0  ;;  %v4287_v53 = vmax.f32 %v13356_v52, %v9250_v3  ;;  %v4070_v39 = vpop.f32.mrb[9].mxu0  ;;  %v5544_v40 = vpop.f32.mrb[9].mxu1  ;;  %v13374_v41 = vmax.f32 %v13372_v51, %v13373_v27 }
 0x2ef   :  { %v6051_v45 = vmax.f32 %v5907_v2, 0.0  ;;  %v4285_v49 = vmax.f32 %v13359_v15, %v4070_v39  ;;  %v9251_v63 = vpop.f32.mrb[10].mxu0  ;;  %v9399_v14 = vpop.f32.mrb[10].mxu1 }
 0x2f0   :  { %v8399_v20 = vpack.c.bf16 %v6053_v18, %v6052_v37  ;;  %v5761_v17 = vmax.f32 %v4287_v53, %v9398_v36  ;;  %v4288_v4 = vmax.f32 %v13362_v21, %v9251_v63  ;;  %v4073_v5 = vpop.f32.mrb[11].mxu0  ;;  %v5547_v55 = vpop.f32.mrb[11].mxu1  ;;  %v13375_v18 = vld [vmem:[#allocation209_spill] sm:$0xff] }
 0x2f1   :  { %v8394_v56 = vpack.c.bf16 %v6051_v45, %v6050_v44  ;;  %v5759_v23 = vmax.f32 %v4285_v49, %v5544_v40  ;;  %v4286_v60 = vmax.f32 %v13365_v29, %v4073_v5  ;;  %v13377_v26 = vmax.f32 %v13375_v18, %v13376_v9 }
 0x2f2   :  { %8519 = vst [vmem:[%s12558_s3 + $0x1d8] sm:$0xff] %v8399_v20   ;;  %v5912_v38 = vadd.f32 %v12123_v19, %v5761_v17  ;;  %v5762_v57 = vmax.f32 %v4288_v4, %v9399_v14  ;;  %v13378_v14 = vld [vmem:[#allocation211_spill] sm:$0xff]  ;;  %v13379_v20 = vld [vmem:[#allocation212_spill] sm:$0xff] }
 0x2f3   :  { %8518 = vst [vmem:[%s12558_s3 + $0x1d0] sm:$0xff] %v8394_v56   ;;  %v5910_v58 = vadd.f32 %v12123_v19, %v5759_v23  ;;  %v5760_v7 = vmax.f32 %v4286_v60, %v5547_v55  ;;  %v13380_v17 = vmax.f32 %v13378_v14, %v13379_v20  ;;  %v13381_v55 = vld [vmem:[#allocation213_spill] sm:$0xff]  ;;  %v13382_v56 = vld [vmem:[#allocation214_spill] sm:$0xff] }
 0x2f4   :  { %v5913_v8 = vadd.f32 %v12123_v19, %v5762_v57  ;;  %v6056_v43 = vmax.f32 %v5912_v38, 0.0  ;;  %v13383_v23 = vmax.f32 %v13381_v55, %v13382_v56  ;;  %v13384_v57 = vld [vmem:[#allocation215_spill] sm:$0xff]  ;;  %v13400_v14 = vld [vmem:[#allocation226_spill] sm:$0xff] }
 0x2f5   :  { %v5911_v12 = vadd.f32 %v12123_v19, %v5760_v7  ;;  %v9254_v13 = vpop.f32.mrb[12].mxu0  ;;  %v9402_v61 = vpop.f32.mrb[12].mxu1  ;;  %v6054_v16 = vmax.f32 %v5910_v58, 0.0  ;;  %v13385_v58 = vld [vmem:[#allocation216_spill] sm:$0xff] }
 0x2f6   :  { %v6057_v0 = vmax.f32 %v5913_v8, 0.0  ;;  %v4291_v42 = vmax.f32 %v13368_v11, %v9254_v13  ;;  %v4086_v6 = vpop.f32.mrb[13].mxu0  ;;  %v5560_v10 = vpop.f32.mrb[13].mxu1  ;;  %v13386_v7 = vmax.f32 %v13384_v57, %v13385_v58 }
 0x2f7   :  { %v6055_v32 = vmax.f32 %v5911_v12, 0.0  ;;  %v4289_v59 = vmax.f32 %v13371_v30, %v4086_v6  ;;  %v9255_v62 = vpop.f32.mrb[14].mxu0  ;;  %v9403_v50 = vpop.f32.mrb[14].mxu1 }
 0x2f8   :  { %v8409_v34 = vpack.c.bf16 %v6057_v0, %v6056_v43  ;;  %v5765_v35 = vmax.f32 %v4291_v42, %v9402_v61  ;;  %v4292_v54 = vmax.f32 %v13374_v41, %v9255_v62  ;;  %v4089_v2 = vpop.f32.mrb[15].mxu0  ;;  %v5563_v3 = vpop.f32.mrb[15].mxu1  ;;  %v13387_v0 = vld [vmem:[#allocation217_spill] sm:$0xff] }
 0x2f9   :  { %v8404_v36 = vpack.c.bf16 %v6055_v32, %v6054_v16  ;;  %v5763_v37 = vmax.f32 %v4289_v59, %v5560_v10  ;;  %v4290_v52 = vmax.f32 %v13377_v26, %v4089_v2  ;;  %v13389_v48 = vmax.f32 %v13387_v0, %v13388_v1 }
 0x2fa   :  { %8521 = vst [vmem:[%s12558_s3 + $0x1e8] sm:$0xff] %v8409_v34   ;;  %v5916_v53 = vadd.f32 %v12123_v19, %v5765_v35  ;;  %v5766_v39 = vmax.f32 %v4292_v54, %v9403_v50  ;;  %v13390_v50 = vld [vmem:[#allocation219_spill] sm:$0xff]  ;;  %v13391_v34 = vld [vmem:[#allocation220_spill] sm:$0xff] }
 0x2fb   :  { %8520 = vst [vmem:[%s12558_s3 + $0x1e0] sm:$0xff] %v8404_v36   ;;  %v5914_v40 = vadd.f32 %v12123_v19, %v5763_v37  ;;  %v5764_v44 = vmax.f32 %v4290_v52, %v5563_v3  ;;  %v13392_v35 = vmax.f32 %v13390_v50, %v13391_v34  ;;  %v13393_v3 = vld [vmem:[#allocation221_spill] sm:$0xff]  ;;  %v13394_v36 = vld [vmem:[#allocation222_spill] sm:$0xff] }
 0x2fc   :  { %v5917_v45 = vadd.f32 %v12123_v19, %v5766_v39  ;;  %v6060_v49 = vmax.f32 %v5916_v53, 0.0  ;;  %v13395_v37 = vmax.f32 %v13393_v3, %v13394_v36  ;;  %v13396_v39 = vld [vmem:[#allocation223_spill] sm:$0xff]  ;;  %v13412_v50 = vld [vmem:[#allocation234_spill] sm:$0xff] }
 0x2fd   :  { %v5915_v46 = vadd.f32 %v12123_v19, %v5764_v44  ;;  %v9258_v47 = vpop.f32.mrb[16].mxu0  ;;  %v9406_v15 = vpop.f32.mrb[16].mxu1  ;;  %v6058_v4 = vmax.f32 %v5914_v40, 0.0  ;;  %v13397_v40 = vld [vmem:[#allocation224_spill] sm:$0xff] }
 0x2fe   :  { %v6061_v63 = vmax.f32 %v5917_v45, 0.0  ;;  %v4295_v25 = vmax.f32 %v13380_v17, %v9258_v47  ;;  %v4102_v31 = vpop.f32.mrb[17].mxu0  ;;  %v5576_v21 = vpop.f32.mrb[17].mxu1  ;;  %v13398_v44 = vmax.f32 %v13396_v39, %v13397_v40 }
 0x2ff   :  { %v6059_v5 = vmax.f32 %v5915_v46, 0.0  ;;  %v4293_v24 = vmax.f32 %v13383_v23, %v4102_v31  ;;  %v9259_v28 = vpop.f32.mrb[18].mxu0  ;;  %v9407_v29 = vpop.f32.mrb[18].mxu1 }
 0x300   :  { %v8419_v60 = vpack.c.bf16 %v6061_v63, %v6060_v49  ;;  %v5769_v38 = vmax.f32 %v4295_v25, %v9406_v15  ;;  %v4296_v8 = vmax.f32 %v13386_v7, %v9259_v28  ;;  %v4105_v12 = vpop.f32.mrb[19].mxu0  ;;  %v5579_v13 = vpop.f32.mrb[19].mxu1  ;;  %v13399_v63 = vld [vmem:[#allocation225_spill] sm:$0xff] }
 0x301   :  { %v8414_v61 = vpack.c.bf16 %v6059_v5, %v6058_v4  ;;  %v5767_v43 = vmax.f32 %v4293_v24, %v5576_v21  ;;  %v4294_v11 = vmax.f32 %v13389_v48, %v4105_v12  ;;  %v13401_v20 = vmax.f32 %v13399_v63, %v13400_v14 }
 0x302   :  { %8523 = vst [vmem:[%s12558_s3 + $0x1f8] sm:$0xff] %v8419_v60   ;;  %v5920_v42 = vadd.f32 %v12123_v19, %v5769_v38  ;;  %v5770_v6 = vmax.f32 %v4296_v8, %v9407_v29  ;;  %v13402_v29 = vld [vmem:[#allocation227_spill] sm:$0xff]  ;;  %v13403_v60 = vld [vmem:[#allocation228_spill] sm:$0xff] }
 0x303   :  { %8522 = vst [vmem:[%s12558_s3 + $0x1f0] sm:$0xff] %v8414_v61   ;;  %v5918_v10 = vadd.f32 %v12123_v19, %v5767_v43  ;;  %v5768_v16 = vmax.f32 %v4294_v11, %v5579_v13  ;;  %v13404_v38 = vmax.f32 %v13402_v29, %v13403_v60  ;;  %v13405_v13 = vld [vmem:[#allocation229_spill] sm:$0xff]  ;;  %v13406_v61 = vld [vmem:[#allocation230_spill] sm:$0xff] }
 0x304   :  { %v5921_v32 = vadd.f32 %v12123_v19, %v5770_v6  ;;  %v6064_v59 = vmax.f32 %v5920_v42, 0.0  ;;  %v13407_v43 = vmax.f32 %v13405_v13, %v13406_v61  ;;  %v13408_v6 = vld [vmem:[#allocation231_spill] sm:$0xff] }
 0x305   :  { %v5919_v33 = vadd.f32 %v12123_v19, %v5768_v16  ;;  %v9262_v22 = vpop.f32.mrb[20].mxu0  ;;  %v9410_v30 = vpop.f32.mrb[20].mxu1  ;;  %v6062_v54 = vmax.f32 %v5918_v10, 0.0  ;;  %v13409_v10 = vld [vmem:[#allocation232_spill] sm:$0xff] }
 0x306   :  { %v6065_v62 = vmax.f32 %v5921_v32, 0.0  ;;  %v4299_v51 = vmax.f32 %v13392_v35, %v9262_v22  ;;  %v4118_v27 = vpop.f32.mrb[21].mxu0  ;;  %v5592_v41 = vpop.f32.mrb[21].mxu1  ;;  %v13410_v16 = vmax.f32 %v13408_v6, %v13409_v10 }
 0x307   :  { %v6063_v2 = vmax.f32 %v5919_v33, 0.0  ;;  %v4297_v18 = vmax.f32 %v13395_v37, %v4118_v27  ;;  %v9263_v9 = vpop.f32.mrb[22].mxu0  ;;  %v9411_v26 = vpop.f32.mrb[22].mxu1 }
 0x308   :  { %v8429_v52 = vpack.c.bf16 %v6065_v62, %v6064_v59  ;;  %v5773_v53 = vmax.f32 %v4299_v51, %v9410_v30  ;;  %v4300_v45 = vmax.f32 %v13398_v44, %v9263_v9  ;;  %v4121_v46 = vpop.f32.mrb[23].mxu0  ;;  %v5595_v47 = vpop.f32.mrb[23].mxu1  ;;  %v13411_v62 = vld [vmem:[#allocation233_spill] sm:$0xff] }
 0x309   :  { %v8424_v15 = vpack.c.bf16 %v6063_v2, %v6062_v54  ;;  %v5771_v49 = vmax.f32 %v4297_v18, %v5592_v41  ;;  %v4298_v17 = vmax.f32 %v13401_v20, %v4121_v46  ;;  %v13413_v34 = vmax.f32 %v13411_v62, %v13412_v50 }
 0x30a   :  { %8525 = vst [vmem:[%s12558_s3 + $0x208] sm:$0xff] %v8429_v52   ;;  %v5924_v25 = vadd.f32 %v12123_v19, %v5773_v53  ;;  %v5774_v31 = vmax.f32 %v4300_v45, %v9411_v26  ;;  %v13414_v26 = vld [vmem:[#allocation235_spill] sm:$0xff]  ;;  %v13415_v52 = vld [vmem:[#allocation236_spill] sm:$0xff] }
 0x30b   :  { %8524 = vst [vmem:[%s12558_s3 + $0x200] sm:$0xff] %v8424_v15   ;;  %v5922_v21 = vadd.f32 %v12123_v19, %v5771_v49  ;;  %v5772_v4 = vmax.f32 %v4298_v17, %v5595_v47  ;;  %v13416_v53 = vmax.f32 %v13414_v26, %v13415_v52  ;;  %v13417_v47 = vld [vmem:[#allocation237_spill] sm:$0xff]  ;;  %v13418_v15 = vld [vmem:[#allocation238_spill] sm:$0xff] }
 0x30c   :  { %v5925_v5 = vadd.f32 %v12123_v19, %v5774_v31  ;;  %v6068_v24 = vmax.f32 %v5924_v25, 0.0  ;;  %v13419_v49 = vmax.f32 %v13417_v47, %v13418_v15  ;;  %v13420_v25 = vld [vmem:[#allocation239_spill] sm:$0xff]  ;;  %v13421_v31 = vld [vmem:[#allocation240_spill] sm:$0xff] }
 0x30d   :  { %v5923_v55 = vadd.f32 %v12123_v19, %v5772_v4  ;;  %v9266_v56 = vpop.f32.mrb[24].mxu0  ;;  %v9414_v23 = vpop.f32.mrb[24].mxu1  ;;  %v6066_v8 = vmax.f32 %v5922_v21, 0.0  ;;  %v13422_v21 = vmax.f32 %v13420_v25, %v13421_v31 }
 0x30e   :  { %v6069_v28 = vmax.f32 %v5925_v5, 0.0  ;;  %v4303_v57 = vmax.f32 %v13404_v38, %v9266_v56  ;;  %v4134_v58 = vpop.f32.mrb[25].mxu0  ;;  %v5608_v7 = vpop.f32.mrb[25].mxu1  ;;  %v9711_v38 = vld [vmem:[%s12557_s2] ss:$0 sm:$0xff] }
 0x30f   :  { %v6067_v12 = vmax.f32 %v5923_v55, 0.0  ;;  %v4301_v0 = vmax.f32 %v13407_v43, %v4134_v58  ;;  %v9267_v1 = vpop.f32.mrb[26].mxu0  ;;  %v9415_v48 = vpop.f32.mrb[26].mxu1 }
 0x310   :  { %v8439_v11 = vpack.c.bf16 %v6069_v28, %v6068_v24  ;;  %v5777_v42 = vmax.f32 %v4303_v57, %v9414_v23  ;;  %v4304_v32 = vmax.f32 %v13410_v16, %v9267_v1  ;;  %v4137_v33 = vpop.f32.mrb[27].mxu0  ;;  %v5611_v22 = vpop.f32.mrb[27].mxu1  ;;  %v13423_v24 = vld [vmem:[#allocation241_spill] sm:$0xff]  ;;  %v13424_v28 = vld [vmem:[#allocation242_spill] sm:$0xff] }
 0x311   :  { %v8434_v30 = vpack.c.bf16 %v6067_v12, %v6066_v8  ;;  %v5775_v59 = vmax.f32 %v4301_v0, %v5608_v7  ;;  %v4302_v35 = vmax.f32 %v13413_v34, %v4137_v33  ;;  %v13425_v29 = vmax.f32 %v13423_v24, %v13424_v28 }
 0x312   :  { %8527 = vst [vmem:[%s12558_s3 + $0x218] sm:$0xff] %v8439_v11   ;;  %v5928_v51 = vadd.f32 %v12123_v19, %v5777_v42  ;;  %v5778_v27 = vmax.f32 %v4304_v32, %v9415_v48 }
 0x313   :  { %8526 = vst [vmem:[%s12558_s3 + $0x210] sm:$0xff] %v8434_v30   ;;  %v5926_v41 = vadd.f32 %v12123_v19, %v5775_v59  ;;  %v5776_v54 = vmax.f32 %v4302_v35, %v5611_v22 }
 0x314   :  { %v5929_v2 = vadd.f32 %v12123_v19, %v5778_v27  ;;  %v6072_v18 = vmax.f32 %v5928_v51, 0.0 }
 0x315   :  { %v5927_v3 = vadd.f32 %v12123_v19, %v5776_v54  ;;  %v9270_v36 = vpop.f32.mrb[28].mxu0  ;;  %v9418_v37 = vpop.f32.mrb[28].mxu1  ;;  %v6070_v45 = vmax.f32 %v5926_v41, 0.0 }
 0x316   :  { %v6073_v9 = vmax.f32 %v5929_v2, 0.0  ;;  %v4307_v39 = vmax.f32 %v13416_v53, %v9270_v36  ;;  %v4150_v40 = vpop.f32.mrb[29].mxu0  ;;  %v5624_v44 = vpop.f32.mrb[29].mxu1 }
 0x317   :  { %v6071_v46 = vmax.f32 %v5927_v3, 0.0  ;;  %v4305_v63 = vmax.f32 %v13419_v49, %v4150_v40  ;;  %v9271_v14 = vpop.f32.mrb[30].mxu0  ;;  %v9419_v20 = vpop.f32.mrb[30].mxu1 }
 0x318   :  { %v8449_v17 = vpack.c.bf16 %v6073_v9, %v6072_v18  ;;  %v5781_v19 = vmax.f32 %v4307_v39, %v9418_v37  ;;  %v4308_v4 = vmax.f32 %v13422_v21, %v9271_v14  ;;  %v4153_v5 = vpop.f32.mrb[31].mxu0  ;;  %v5627_v55 = vpop.f32.mrb[31].mxu1 }
 0x319   :  { %v8444_v56 = vpack.c.bf16 %v6071_v46, %v6070_v45  ;;  %v5779_v23 = vmax.f32 %v4305_v63, %v5624_v44  ;;  %v4306_v60 = vmax.f32 %v13425_v29, %v4153_v5 }
 0x31a   :  { %8529 = vst [vmem:[%s12558_s3 + $0x228] sm:$0xff] %v8449_v17   ;;  %v5932_v57 = vadd.f32 %v9711_v38, %v5781_v19  ;;  %v5782_v58 = vmax.f32 %v4308_v4, %v9419_v20 }
 0x31b   :  { %8528 = vst [vmem:[%s12558_s3 + $0x220] sm:$0xff] %v8444_v56   ;;  %v5930_v7 = vadd.f32 %v9711_v38, %v5779_v23  ;;  %v5780_v8 = vmax.f32 %v4306_v60, %v5627_v55 }
 0x31c   :  { %v5933_v12 = vadd.f32 %v9711_v38, %v5782_v58  ;;  %v6076_v61 = vmax.f32 %v5932_v57, 0.0 }
 0x31d   :  { %v5931_v13 = vadd.f32 %v9711_v38, %v5780_v8  ;;  %v6074_v0 = vmax.f32 %v5930_v7, 0.0 }
 0x31e   :  { %v6077_v43 = vmax.f32 %v5933_v12, 0.0 }
 0x31f   :  { %v6075_v1 = vmax.f32 %v5931_v13, 0.0 }
 0x320   :  { %v8459_v48 = vpack.c.bf16 %v6077_v43, %v6076_v61 }
 0x321   :  { %v8454_v11 = vpack.c.bf16 %v6075_v1, %v6074_v0 }
 0x322   :  { %8531 = vst [vmem:[%s12558_s3 + $0x238] sm:$0xff] %v8459_v48  }
 0x323   :  { %8530 = vst [vmem:[%s12558_s3 + $0x230] sm:$0xff] %v8454_v11  }

// kernel: forward.4
= control target key start
LH: loop header
LB: loop body
LE: loop exit
PB: predicated region body
PF: predicated region fallthrough
CT: control target
= control target key end

     0   :  { %s2186_s1 = inlined_call_operand.vmem [shape: bf16[256,128], index: 1, kind: input, shape index: {}]   ;;  %s2187_s0 = inlined_call_operand.vmem [shape: bf16[8,4,16,256], index: 0, kind: input, shape index: {}]   ;;  %s2188_s2 = inlined_call_operand.vmem [shape: f32[1,128], index: 2, kind: input, shape index: {}]   ;;  %s2189_s3 = inlined_call_operand.vmem [shape: bf16[8,16,128], index: 3, kind: output, shape index: {}]  }
   0x1   :  { %v1553_v0 = vld [vmem:[%s2186_s1 + $0x40] sm:$0xff]   ;;  %v1555_v2 = vld [vmem:[%s2186_s1 + $0x48] sm:$0xff]   ;;  %v1700_v4 = vld [vmem:[%s2186_s1 + $0x50] sm:$0xff]  }
   0x2   :  { %v1554_v1 = vld [vmem:[%s2186_s1] sm:$0xff]   ;;  %1297 = vmatprep.subr.bf16.mxu0 %v1553_v0  ;;  %1361 = vmatprep.subr.bf16.mxu1 %v1553_v0  ;;  %v1556_v3 = vld [vmem:[%s2186_s1 + $0x8] sm:$0xff]   ;;  %v1705_v5 = vld [vmem:[%s2186_s1 + $0x10] sm:$0xff]  }
   0x3   :  { %1298 = vmatpush3.bf16.msra.mxu0 %v1554_v1  ;;  %1362 = vmatpush3.bf16.msra.mxu1 %v1554_v1  ;;  %v1712_v6 = vld [vmem:[%s2186_s1 + $0x58] sm:$0xff]   ;;  %v1726_v8 = vld [vmem:[%s2186_s1 + $0x60] sm:$0xff]   ;;  %v1740_v10 = vld [vmem:[%s2186_s1 + $0x68] sm:$0xff]  }
   0x4   :  { %1299 = vmatprep.subr.bf16.mxu0 %v1555_v2  ;;  %1363 = vmatprep.subr.bf16.mxu1 %v1555_v2  ;;  %v1719_v7 = vld [vmem:[%s2186_s1 + $0x18] sm:$0xff]   ;;  %v1733_v9 = vld [vmem:[%s2186_s1 + $0x20] sm:$0xff]   ;;  %v1753_v13 = vld [vmem:[%s2186_s1 + $0x28] sm:$0xff]  }
   0x5   :  { %v1571_v11 = vld [vmem:[%s2187_s0 + $0x4] ss:$8 sps:$4 sm:$0xff]   ;;  %v1574_v12 = vld [vmem:[%s2187_s0 + $0x14] ss:$8 sps:$4 sm:$0xff]   ;;  %v1569_v18 = vld [vmem:[%s2187_s0] ss:$8 sps:$4 sm:$0xff]  }
   0x6   :  { %v1760_v14 = vld [vmem:[%s2186_s1 + $0x70] sm:$0xff]   ;;  %271 = vmatprep.mubr.bf16.mxu0 %v1571_v11  ;;  %465 = vmatprep.mubr.bf16.mxu1 %v1574_v12  ;;  %v1774_v16 = vld [vmem:[%s2186_s1 + $0x78] sm:$0xff]   ;;  %v1575_v20 = vld [vmem:[%s2187_s0 + $0x44] ss:$8 sps:$4 sm:$0xff]  }
   0x7   :  { %1300 = vmatpush3.bf16.msra.mxu0 %v1556_v3  ;;  %1364 = vmatpush3.bf16.msra.mxu1 %v1556_v3  ;;  %v1767_v15 = vld [vmem:[%s2186_s1 + $0x30] sm:$0xff]   ;;  %v1781_v17 = vld [vmem:[%s2186_s1 + $0x38] sm:$0xff]   ;;  %v1579_v22 = vld [vmem:[%s2187_s0 + $0x40] ss:$8 sps:$4 sm:$0xff]  }
   0x8   :  { %1301 = vmatprep.subr.bf16.mxu0 %v1700_v4  ;;  %1365 = vmatprep.subr.bf16.mxu1 %v1700_v4  ;;  %v1572_v19 = vld [vmem:[%s2187_s0 + $0x10] ss:$8 sps:$4 sm:$0xff]   ;;  %v1577_v21 = vld [vmem:[%s2187_s0 + $0x54] ss:$8 sps:$4 sm:$0xff]   ;;  %v1581_v24 = vld [vmem:[%s2187_s0 + $0x84] ss:$8 sps:$4 sm:$0xff]  }
   0x9   :  { %v1580_v23 = vld [vmem:[%s2187_s0 + $0x50] ss:$8 sps:$4 sm:$0xff]   ;;  %v1583_v25 = vld [vmem:[%s2187_s0 + $0x94] ss:$8 sps:$4 sm:$0xff]   ;;  %v1585_v26 = vld [vmem:[%s2187_s0 + $0x80] ss:$8 sps:$4 sm:$0xff]  }
   0xa   :  { %v1586_v27 = vld [vmem:[%s2187_s0 + $0x90] ss:$8 sps:$4 sm:$0xff]   ;;  %v1587_v28 = vld [vmem:[%s2187_s0 + $0xc4] ss:$8 sps:$4 sm:$0xff]   ;;  %v1589_v29 = vld [vmem:[%s2187_s0 + $0xd4] ss:$8 sps:$4 sm:$0xff]  }
   0xb   :  { %1302 = vmatpush3.bf16.msra.mxu0 %v1705_v5  ;;  %1366 = vmatpush3.bf16.msra.mxu1 %v1705_v5  ;;  %v1591_v30 = vld [vmem:[%s2187_s0 + $0xc0] ss:$8 sps:$4 sm:$0xff]   ;;  %v1592_v31 = vld [vmem:[%s2187_s0 + $0xd0] ss:$8 sps:$4 sm:$0xff]   ;;  %v1593_v32 = vld [vmem:[%s2187_s0 + $0x104] ss:$8 sps:$4 sm:$0xff]  }
   0xc   :  { %1303 = vmatprep.subr.bf16.mxu0 %v1712_v6  ;;  %1367 = vmatprep.subr.bf16.mxu1 %v1712_v6  ;;  %v1595_v33 = vld [vmem:[%s2187_s0 + $0x114] ss:$8 sps:$4 sm:$0xff]   ;;  %v1597_v34 = vld [vmem:[%s2187_s0 + $0x100] ss:$8 sps:$4 sm:$0xff]   ;;  %v1598_v35 = vld [vmem:[%s2187_s0 + $0x110] ss:$8 sps:$4 sm:$0xff]  }
   0xd   :  { %v1599_v36 = vld [vmem:[%s2187_s0 + $0x144] ss:$8 sps:$4 sm:$0xff]   ;;  %v1601_v37 = vld [vmem:[%s2187_s0 + $0x154] ss:$8 sps:$4 sm:$0xff]   ;;  %v1603_v38 = vld [vmem:[%s2187_s0 + $0x140] ss:$8 sps:$4 sm:$0xff]  }
   0xe   :  { %v1604_v39 = vld [vmem:[%s2187_s0 + $0x150] ss:$8 sps:$4 sm:$0xff]   ;;  %v1605_v40 = vld [vmem:[%s2187_s0 + $0x184] ss:$8 sps:$4 sm:$0xff]   ;;  %v1607_v41 = vld [vmem:[%s2187_s0 + $0x194] ss:$8 sps:$4 sm:$0xff]  }
   0xf   :  { %1304 = vmatpush3.bf16.msra.mxu0 %v1719_v7  ;;  %1368 = vmatpush3.bf16.msra.mxu1 %v1719_v7  ;;  %v1609_v42 = vld [vmem:[%s2187_s0 + $0x180] ss:$8 sps:$4 sm:$0xff]   ;;  %v1610_v43 = vld [vmem:[%s2187_s0 + $0x190] ss:$8 sps:$4 sm:$0xff]   ;;  %v1611_v44 = vld [vmem:[%s2187_s0 + $0x1c4] ss:$8 sps:$4 sm:$0xff]  }
  0x10   :  { %1305 = vmatprep.subr.bf16.mxu0 %v1726_v8  ;;  %1369 = vmatprep.subr.bf16.mxu1 %v1726_v8  ;;  %v1613_v45 = vld [vmem:[%s2187_s0 + $0x1d4] ss:$8 sps:$4 sm:$0xff]   ;;  %v1615_v46 = vld [vmem:[%s2187_s0 + $0x1c0] ss:$8 sps:$4 sm:$0xff]   ;;  %v1616_v47 = vld [vmem:[%s2187_s0 + $0x1d0] ss:$8 sps:$4 sm:$0xff]  }
  0x11   :  { %v1619_v48 = vld [vmem:[%s2187_s0 + $0x24] ss:$8 sps:$4 sm:$0xff]   ;;  %v1622_v49 = vld [vmem:[%s2187_s0 + $0x34] ss:$8 sps:$4 sm:$0xff]   ;;  %v1617_v50 = vld [vmem:[%s2187_s0 + $0x20] ss:$8 sps:$4 sm:$0xff]  }
  0x12   :  { %v1620_v51 = vld [vmem:[%s2187_s0 + $0x30] ss:$8 sps:$4 sm:$0xff]   ;;  %v1623_v52 = vld [vmem:[%s2187_s0 + $0x64] ss:$8 sps:$4 sm:$0xff]   ;;  %v1625_v53 = vld [vmem:[%s2187_s0 + $0x74] ss:$8 sps:$4 sm:$0xff]  }
  0x13   :  { %1306 = vmatpush3.bf16.msra.mxu0 %v1733_v9  ;;  %1370 = vmatpush3.bf16.msra.mxu1 %v1733_v9  ;;  %v1627_v54 = vld [vmem:[%s2187_s0 + $0x60] ss:$8 sps:$4 sm:$0xff]   ;;  %v1628_v55 = vld [vmem:[%s2187_s0 + $0x70] ss:$8 sps:$4 sm:$0xff]   ;;  %v1629_v56 = vld [vmem:[%s2187_s0 + $0xa4] ss:$8 sps:$4 sm:$0xff]  }
  0x14   :  { %1307 = vmatprep.subr.bf16.mxu0 %v1740_v10  ;;  %1371 = vmatprep.subr.bf16.mxu1 %v1740_v10  ;;  %v1631_v57 = vld [vmem:[%s2187_s0 + $0xb4] ss:$8 sps:$4 sm:$0xff]   ;;  %v1633_v58 = vld [vmem:[%s2187_s0 + $0xa0] ss:$8 sps:$4 sm:$0xff]   ;;  %v1634_v59 = vld [vmem:[%s2187_s0 + $0xb0] ss:$8 sps:$4 sm:$0xff]  }
  0x15   :  { %v1635_v60 = vld [vmem:[%s2187_s0 + $0xe4] ss:$8 sps:$4 sm:$0xff]   ;;  %v1637_v61 = vld [vmem:[%s2187_s0 + $0xf4] ss:$8 sps:$4 sm:$0xff]   ;;  %v1639_v62 = vld [vmem:[%s2187_s0 + $0xe0] ss:$8 sps:$4 sm:$0xff]  }
  0x16   :  { %v1640_v63 = vld [vmem:[%s2187_s0 + $0xf0] ss:$8 sps:$4 sm:$0xff]   ;;  %v1659_v12 = vld [vmem:[%s2187_s0 + $0x1e4] ss:$8 sps:$4 sm:$0xff]  }
  0x17   :  { %1308 = vmatpush3.bf16.msra.mxu0 %v1753_v13  ;;  %1372 = vmatpush3.bf16.msra.mxu1 %v1753_v13  ;;  %v1658_v11 = vld [vmem:[%s2187_s0 + $0x1b0] ss:$8 sps:$4 sm:$0xff]  }
  0x18   :  { %1309 = vmatprep.subr.bf16.mxu0 %v1760_v14  ;;  %1373 = vmatprep.subr.bf16.mxu1 %v1760_v14 }
  0x1b   :  { %1310 = vmatpush3.bf16.msra.mxu0 %v1767_v15  ;;  %1374 = vmatpush3.bf16.msra.mxu1 %v1767_v15 }
  0x1c   :  { %1311 = vmatprep.subr.bf16.mxu0 %v1774_v16  ;;  %1375 = vmatprep.subr.bf16.mxu1 %v1774_v16 }
  0x1f   :  { %1312 = vmatpush3.bf16.msra.mxu0 %v1781_v17  ;;  %1376 = vmatpush3.bf16.msra.mxu1 %v1781_v17 }
  0x20   :  { %1425 = vmatprep.subr.bf16.mxu0 %v1553_v0  ;;  %1489 = vmatprep.subr.bf16.mxu1 %v1553_v0  ;;  %v1641_v0 = vld [vmem:[%s2187_s0 + $0x124] ss:$8 sps:$4 sm:$0xff]  }
  0x22   :  { %272 = vmatmul.mubr.bf16.vlgmr.msra.gmra.mrb[0].mxu0 %v1569_v18  ;;  %466 = vmatmul.mubr.bf16.vlgmr.msra.gmra.mrb[0].mxu1 %v1572_v19 }
  0x23   :  { %1426 = vmatpush3.bf16.msra.mxu0 %v1554_v1  ;;  %1490 = vmatpush3.bf16.msra.mxu1 %v1554_v1  ;;  %v1643_v1 = vld [vmem:[%s2187_s0 + $0x134] ss:$8 sps:$4 sm:$0xff]  }
  0x24   :  { %279 = vmatprep.mubr.bf16.mxu0 %v1575_v20  ;;  %473 = vmatprep.mubr.bf16.mxu1 %v1577_v21 }
  0x25   :  { %1427 = vmatprep.subr.bf16.mxu0 %v1555_v2  ;;  %1491 = vmatprep.subr.bf16.mxu1 %v1555_v2  ;;  %v1645_v2 = vld [vmem:[%s2187_s0 + $0x120] ss:$8 sps:$4 sm:$0xff]  }
  0x27   :  { %1428 = vmatpush3.bf16.msra.mxu0 %v1556_v3  ;;  %1492 = vmatpush3.bf16.msra.mxu1 %v1556_v3  ;;  %v1646_v3 = vld [vmem:[%s2187_s0 + $0x130] ss:$8 sps:$4 sm:$0xff]  }
  0x28   :  { %1429 = vmatprep.subr.bf16.mxu0 %v1700_v4  ;;  %1493 = vmatprep.subr.bf16.mxu1 %v1700_v4  ;;  %v1647_v4 = vld [vmem:[%s2187_s0 + $0x164] ss:$8 sps:$4 sm:$0xff]  }
  0x2a   :  { %280 = vmatmul.mubr.bf16.gmra.mrb[4].mxu0 %v1579_v22  ;;  %474 = vmatmul.mubr.bf16.gmra.mrb[4].mxu1 %v1580_v23 }
  0x2b   :  { %287 = vmatprep.mubr.bf16.mxu0 %v1581_v24  ;;  %481 = vmatprep.mubr.bf16.mxu1 %v1583_v25 }
  0x2c   :  { %1430 = vmatpush3.bf16.msra.mxu0 %v1705_v5  ;;  %1494 = vmatpush3.bf16.msra.mxu1 %v1705_v5  ;;  %v1649_v5 = vld [vmem:[%s2187_s0 + $0x174] ss:$8 sps:$4 sm:$0xff]  }
  0x2d   :  { %1431 = vmatprep.subr.bf16.mxu0 %v1712_v6  ;;  %1495 = vmatprep.subr.bf16.mxu1 %v1712_v6  ;;  %v1651_v6 = vld [vmem:[%s2187_s0 + $0x160] ss:$8 sps:$4 sm:$0xff]  }
  0x30   :  { %1432 = vmatpush3.bf16.msra.mxu0 %v1719_v7  ;;  %1496 = vmatpush3.bf16.msra.mxu1 %v1719_v7  ;;  %v1652_v7 = vld [vmem:[%s2187_s0 + $0x170] ss:$8 sps:$4 sm:$0xff]  }
  0x31   :  { %1433 = vmatprep.subr.bf16.mxu0 %v1726_v8  ;;  %1497 = vmatprep.subr.bf16.mxu1 %v1726_v8  ;;  %v1653_v8 = vld [vmem:[%s2187_s0 + $0x1a4] ss:$8 sps:$4 sm:$0xff]  }
  0x32   :  { %288 = vmatmul.mubr.bf16.gmra.mrb[8].mxu0 %v1585_v26  ;;  %482 = vmatmul.mubr.bf16.gmra.mrb[8].mxu1 %v1586_v27 }
  0x33   :  { %295 = vmatprep.mubr.bf16.mxu0 %v1587_v28  ;;  %489 = vmatprep.mubr.bf16.mxu1 %v1589_v29 }
  0x34   :  { %1434 = vmatpush3.bf16.msra.mxu0 %v1733_v9  ;;  %1498 = vmatpush3.bf16.msra.mxu1 %v1733_v9  ;;  %v1655_v9 = vld [vmem:[%s2187_s0 + $0x1b4] ss:$8 sps:$4 sm:$0xff]  }
  0x35   :  { %1435 = vmatprep.subr.bf16.mxu0 %v1740_v10  ;;  %1499 = vmatprep.subr.bf16.mxu1 %v1740_v10  ;;  %v1657_v10 = vld [vmem:[%s2187_s0 + $0x1a0] ss:$8 sps:$4 sm:$0xff]  }
  0x38   :  { %1436 = vmatpush3.bf16.msra.mxu0 %v1753_v13  ;;  %1500 = vmatpush3.bf16.msra.mxu1 %v1753_v13  ;;  %v1661_v13 = vld [vmem:[%s2187_s0 + $0x1f4] ss:$8 sps:$4 sm:$0xff]  }
  0x39   :  { %1437 = vmatprep.subr.bf16.mxu0 %v1760_v14  ;;  %1501 = vmatprep.subr.bf16.mxu1 %v1760_v14  ;;  %v1663_v14 = vld [vmem:[%s2187_s0 + $0x1e0] ss:$8 sps:$4 sm:$0xff]  }
  0x3a   :  { %296 = vmatmul.mubr.bf16.gmra.mrb[12].mxu0 %v1591_v30  ;;  %490 = vmatmul.mubr.bf16.gmra.mrb[12].mxu1 %v1592_v31 }
  0x3b   :  { %303 = vmatprep.mubr.bf16.mxu0 %v1593_v32  ;;  %497 = vmatprep.mubr.bf16.mxu1 %v1595_v33 }
  0x3c   :  { %1438 = vmatpush3.bf16.msra.mxu0 %v1767_v15  ;;  %1502 = vmatpush3.bf16.msra.mxu1 %v1767_v15  ;;  %v1664_v15 = vld [vmem:[%s2187_s0 + $0x1f0] ss:$8 sps:$4 sm:$0xff]  }
  0x3d   :  { %1439 = vmatprep.subr.bf16.mxu0 %v1774_v16  ;;  %1503 = vmatprep.subr.bf16.mxu1 %v1774_v16 }
  0x40   :  { %1440 = vmatpush3.bf16.msra.mxu0 %v1781_v17  ;;  %1504 = vmatpush3.bf16.msra.mxu1 %v1781_v17 }
  0x42   :  { %304 = vmatmul.mubr.bf16.gmra.mrb[16].mxu0 %v1597_v34  ;;  %498 = vmatmul.mubr.bf16.gmra.mrb[16].mxu1 %v1598_v35 }
  0x43   :  { %311 = vmatprep.mubr.bf16.mxu0 %v1599_v36  ;;  %505 = vmatprep.mubr.bf16.mxu1 %v1601_v37 }
  0x4a   :  { %312 = vmatmul.mubr.bf16.gmra.mrb[20].mxu0 %v1603_v38  ;;  %506 = vmatmul.mubr.bf16.gmra.mrb[20].mxu1 %v1604_v39 }
  0x4b   :  { %319 = vmatprep.mubr.bf16.mxu0 %v1605_v40  ;;  %513 = vmatprep.mubr.bf16.mxu1 %v1607_v41 }
  0x52   :  { %320 = vmatmul.mubr.bf16.gmra.mrb[24].mxu0 %v1609_v42  ;;  %514 = vmatmul.mubr.bf16.gmra.mrb[24].mxu1 %v1610_v43 }
  0x53   :  { %327 = vmatprep.mubr.bf16.mxu0 %v1611_v44  ;;  %521 = vmatprep.mubr.bf16.mxu1 %v1613_v45 }
  0x5a   :  { %328 = vmatmul.mubr.bf16.gmra.mrb[28].mxu0 %v1615_v46  ;;  %522 = vmatmul.mubr.bf16.gmra.mrb[28].mxu1 %v1616_v47 }
  0x5b   :  { %675 = vmatprep.mubr.bf16.mxu0 %v1619_v48  ;;  %885 = vmatprep.mubr.bf16.mxu1 %v1622_v49 }
  0x62   :  { %676 = vmatmul.mubr.bf16.vlgmr.msra.gmra.mrb[32].mxu0 %v1617_v50  ;;  %886 = vmatmul.mubr.bf16.vlgmr.msra.gmra.mrb[32].mxu1 %v1620_v51 }
  0x63   :  { %683 = vmatprep.mubr.bf16.mxu0 %v1623_v52  ;;  %893 = vmatprep.mubr.bf16.mxu1 %v1625_v53 }
  0x6a   :  { %684 = vmatmul.mubr.bf16.gmra.mrb[36].mxu0 %v1627_v54  ;;  %894 = vmatmul.mubr.bf16.gmra.mrb[36].mxu1 %v1628_v55 }
  0x6b   :  { %691 = vmatprep.mubr.bf16.mxu0 %v1629_v56  ;;  %901 = vmatprep.mubr.bf16.mxu1 %v1631_v57 }
  0x72   :  { %692 = vmatmul.mubr.bf16.gmra.mrb[40].mxu0 %v1633_v58  ;;  %902 = vmatmul.mubr.bf16.gmra.mrb[40].mxu1 %v1634_v59 }
  0x73   :  { %699 = vmatprep.mubr.bf16.mxu0 %v1635_v60  ;;  %909 = vmatprep.mubr.bf16.mxu1 %v1637_v61 }
  0x7a   :  { %700 = vmatmul.mubr.bf16.gmra.mrb[44].mxu0 %v1639_v62  ;;  %910 = vmatmul.mubr.bf16.gmra.mrb[44].mxu1 %v1640_v63 }
  0x7b   :  { %707 = vmatprep.mubr.bf16.mxu0 %v1641_v0  ;;  %917 = vmatprep.mubr.bf16.mxu1 %v1643_v1 }
  0x82   :  { %708 = vmatmul.mubr.bf16.gmra.mrb[48].mxu0 %v1645_v2  ;;  %918 = vmatmul.mubr.bf16.gmra.mrb[48].mxu1 %v1646_v3 }
  0x83   :  { %715 = vmatprep.mubr.bf16.mxu0 %v1647_v4  ;;  %925 = vmatprep.mubr.bf16.mxu1 %v1649_v5 }
  0x8a   :  { %716 = vmatmul.mubr.bf16.gmra.mrb[52].mxu0 %v1651_v6  ;;  %926 = vmatmul.mubr.bf16.gmra.mrb[52].mxu1 %v1652_v7 }
  0x8b   :  { %723 = vmatprep.mubr.bf16.mxu0 %v1653_v8  ;;  %933 = vmatprep.mubr.bf16.mxu1 %v1655_v9 }
  0x92   :  { %724 = vmatmul.mubr.bf16.gmra.mrb[56].mxu0 %v1657_v10  ;;  %934 = vmatmul.mubr.bf16.gmra.mrb[56].mxu1 %v1658_v11 }
  0x93   :  { %731 = vmatprep.mubr.bf16.mxu0 %v1659_v12  ;;  %941 = vmatprep.mubr.bf16.mxu1 %v1661_v13 }
  0x9a   :  { %732 = vmatmul.mubr.bf16.gmra.mrb[60].mxu0 %v1663_v14  ;;  %942 = vmatmul.mubr.bf16.gmra.mrb[60].mxu1 %v1664_v15 }
  0xf5   :  { %v1313_v16 = vpop.f32.mrb[0].mxu0  ;;  %v1377_v17 = vpop.f32.mrb[0].mxu1 }
  0xf6   :  { %v1314_v18 = vpop.f32.mrb[1].mxu0  ;;  %v1378_v19 = vpop.f32.mrb[1].mxu1 }
  0xf7   :  { %v1997_v20 = vadd.f32 %v1314_v18, %v1313_v16  ;;  %v1999_v21 = vadd.f32 %v1378_v19, %v1377_v17  ;;  %v1316_v22 = vpop.f32.mrb[2].mxu0  ;;  %v1380_v23 = vpop.f32.mrb[2].mxu1 }
  0xf8   :  { %v1317_v24 = vpop.f32.mrb[3].mxu0  ;;  %v1381_v25 = vpop.f32.mrb[3].mxu1 }
  0xf9   :  { %v530_v26 = vmax.f32 %v1997_v20, %v1999_v21  ;;  %v2003_v27 = vadd.f32 %v1317_v24, %v1316_v22  ;;  %v2005_v28 = vadd.f32 %v1381_v25, %v1380_v23 }
  0xfb   :  { %v531_v29 = vmax.f32 %v2003_v27, %v2005_v28 }
  0xfd   :  { %v1319_v30 = vpop.f32.mrb[4].mxu0  ;;  %v1383_v31 = vpop.f32.mrb[4].mxu1 }
  0xfe   :  { %v1320_v32 = vpop.f32.mrb[5].mxu0  ;;  %v1384_v33 = vpop.f32.mrb[5].mxu1 }
  0xff   :  { %v2009_v34 = vadd.f32 %v1320_v32, %v1319_v30  ;;  %v2011_v35 = vadd.f32 %v1384_v33, %v1383_v31  ;;  %v1322_v36 = vpop.f32.mrb[6].mxu0  ;;  %v1386_v37 = vpop.f32.mrb[6].mxu1 }
 0x100   :  { %v1323_v38 = vpop.f32.mrb[7].mxu0  ;;  %v1387_v39 = vpop.f32.mrb[7].mxu1 }
 0x101   :  { %v532_v40 = vmax.f32 %v2009_v34, %v2011_v35  ;;  %v2015_v41 = vadd.f32 %v1323_v38, %v1322_v36  ;;  %v2017_v42 = vadd.f32 %v1387_v39, %v1386_v37 }
 0x103   :  { %v533_v43 = vmax.f32 %v2015_v41, %v2017_v42 }
 0x105   :  { %v1325_v44 = vpop.f32.mrb[8].mxu0  ;;  %v1389_v45 = vpop.f32.mrb[8].mxu1 }
 0x106   :  { %v1326_v46 = vpop.f32.mrb[9].mxu0  ;;  %v1390_v47 = vpop.f32.mrb[9].mxu1 }
 0x107   :  { %v2021_v48 = vadd.f32 %v1326_v46, %v1325_v44  ;;  %v2023_v49 = vadd.f32 %v1390_v47, %v1389_v45  ;;  %v1328_v50 = vpop.f32.mrb[10].mxu0  ;;  %v1392_v51 = vpop.f32.mrb[10].mxu1 }
 0x108   :  { %v1329_v52 = vpop.f32.mrb[11].mxu0  ;;  %v1393_v53 = vpop.f32.mrb[11].mxu1 }
 0x109   :  { %v534_v54 = vmax.f32 %v2021_v48, %v2023_v49  ;;  %v2027_v55 = vadd.f32 %v1329_v52, %v1328_v50  ;;  %v2029_v56 = vadd.f32 %v1393_v53, %v1392_v51 }
 0x10b   :  { %v535_v57 = vmax.f32 %v2027_v55, %v2029_v56 }
 0x10d   :  { %v1331_v58 = vpop.f32.mrb[12].mxu0  ;;  %v1395_v59 = vpop.f32.mrb[12].mxu1 }
 0x10e   :  { %v1332_v60 = vpop.f32.mrb[13].mxu0  ;;  %v1396_v61 = vpop.f32.mrb[13].mxu1 }
 0x10f   :  { %v2033_v62 = vadd.f32 %v1332_v60, %v1331_v58  ;;  %v2035_v63 = vadd.f32 %v1396_v61, %v1395_v59  ;;  %v1334_v0 = vpop.f32.mrb[14].mxu0  ;;  %v1398_v1 = vpop.f32.mrb[14].mxu1 }
 0x110   :  { %v1335_v2 = vpop.f32.mrb[15].mxu0  ;;  %v1399_v3 = vpop.f32.mrb[15].mxu1 }
 0x111   :  { %v536_v4 = vmax.f32 %v2033_v62, %v2035_v63  ;;  %v2039_v5 = vadd.f32 %v1335_v2, %v1334_v0  ;;  %v2041_v6 = vadd.f32 %v1399_v3, %v1398_v1 }
 0x113   :  { %v537_v7 = vmax.f32 %v2039_v5, %v2041_v6 }
 0x115   :  { %v1337_v8 = vpop.f32.mrb[16].mxu0  ;;  %v1401_v9 = vpop.f32.mrb[16].mxu1 }
 0x116   :  { %v1338_v10 = vpop.f32.mrb[17].mxu0  ;;  %v1402_v11 = vpop.f32.mrb[17].mxu1 }
 0x117   :  { %v2045_v12 = vadd.f32 %v1338_v10, %v1337_v8  ;;  %v2047_v13 = vadd.f32 %v1402_v11, %v1401_v9  ;;  %v1340_v14 = vpop.f32.mrb[18].mxu0  ;;  %v1404_v15 = vpop.f32.mrb[18].mxu1 }
 0x118   :  { %v1341_v16 = vpop.f32.mrb[19].mxu0  ;;  %v1405_v17 = vpop.f32.mrb[19].mxu1 }
 0x119   :  { %v538_v18 = vmax.f32 %v2045_v12, %v2047_v13  ;;  %v2051_v19 = vadd.f32 %v1341_v16, %v1340_v14  ;;  %v2053_v22 = vadd.f32 %v1405_v17, %v1404_v15 }
 0x11b   :  { %v539_v23 = vmax.f32 %v2051_v19, %v2053_v22 }
 0x11d   :  { %v1343_v24 = vpop.f32.mrb[20].mxu0  ;;  %v1407_v25 = vpop.f32.mrb[20].mxu1 }
 0x11e   :  { %v1344_v30 = vpop.f32.mrb[21].mxu0  ;;  %v1408_v31 = vpop.f32.mrb[21].mxu1 }
 0x11f   :  { %v2057_v32 = vadd.f32 %v1344_v30, %v1343_v24  ;;  %v2059_v33 = vadd.f32 %v1408_v31, %v1407_v25  ;;  %v1346_v36 = vpop.f32.mrb[22].mxu0  ;;  %v1410_v37 = vpop.f32.mrb[22].mxu1 }
 0x120   :  { %v1347_v38 = vpop.f32.mrb[23].mxu0  ;;  %v1411_v39 = vpop.f32.mrb[23].mxu1 }
 0x121   :  { %v540_v44 = vmax.f32 %v2057_v32, %v2059_v33  ;;  %v2063_v45 = vadd.f32 %v1347_v38, %v1346_v36  ;;  %v2065_v46 = vadd.f32 %v1411_v39, %v1410_v37 }
 0x123   :  { %v541_v47 = vmax.f32 %v2063_v45, %v2065_v46 }
 0x125   :  { %v1349_v50 = vpop.f32.mrb[24].mxu0  ;;  %v1413_v51 = vpop.f32.mrb[24].mxu1 }
 0x126   :  { %v1350_v52 = vpop.f32.mrb[25].mxu0  ;;  %v1414_v53 = vpop.f32.mrb[25].mxu1 }
 0x127   :  { %v2069_v58 = vadd.f32 %v1350_v52, %v1349_v50  ;;  %v2071_v59 = vadd.f32 %v1414_v53, %v1413_v51  ;;  %v1352_v60 = vpop.f32.mrb[26].mxu0  ;;  %v1416_v61 = vpop.f32.mrb[26].mxu1 }
 0x128   :  { %v1353_v0 = vpop.f32.mrb[27].mxu0  ;;  %v1417_v1 = vpop.f32.mrb[27].mxu1 }
 0x129   :  { %v542_v2 = vmax.f32 %v2069_v58, %v2071_v59  ;;  %v2075_v3 = vadd.f32 %v1353_v0, %v1352_v60  ;;  %v2077_v8 = vadd.f32 %v1417_v1, %v1416_v61 }
 0x12b   :  { %v543_v9 = vmax.f32 %v2075_v3, %v2077_v8 }
 0x12d   :  { %v1355_v10 = vpop.f32.mrb[28].mxu0  ;;  %v1419_v11 = vpop.f32.mrb[28].mxu1 }
 0x12e   :  { %v1356_v14 = vpop.f32.mrb[29].mxu0  ;;  %v1420_v15 = vpop.f32.mrb[29].mxu1 }
 0x12f   :  { %v2081_v16 = vadd.f32 %v1356_v14, %v1355_v10  ;;  %v2083_v17 = vadd.f32 %v1420_v15, %v1419_v11  ;;  %v1358_v24 = vpop.f32.mrb[30].mxu0  ;;  %v1422_v25 = vpop.f32.mrb[30].mxu1 }
 0x130   :  { %v1359_v30 = vpop.f32.mrb[31].mxu0  ;;  %v1423_v31 = vpop.f32.mrb[31].mxu1 }
 0x131   :  { %v544_v36 = vmax.f32 %v2081_v16, %v2083_v17  ;;  %v2087_v37 = vadd.f32 %v1359_v30, %v1358_v24  ;;  %v2089_v38 = vadd.f32 %v1423_v31, %v1422_v25  ;;  %v2099_v25 = vld [vmem:[%s2188_s2] ss:$0 sm:$0xff] }
 0x135   :  { %v1441_v50 = vpop.f32.mrb[32].mxu0  ;;  %v1505_v51 = vpop.f32.mrb[32].mxu1 }
 0x136   :  { %v1442_v52 = vpop.f32.mrb[33].mxu0  ;;  %v1506_v53 = vpop.f32.mrb[33].mxu1 }
 0x137   :  { %v1443_v60 = vadd.f32 %v1442_v52, %v1441_v50  ;;  %v1507_v61 = vadd.f32 %v1506_v53, %v1505_v51  ;;  %v1444_v0 = vpop.f32.mrb[34].mxu0  ;;  %v1508_v1 = vpop.f32.mrb[34].mxu1 }
 0x138   :  { %v1445_v10 = vpop.f32.mrb[35].mxu0  ;;  %v1509_v11 = vpop.f32.mrb[35].mxu1 }
 0x139   :  { %v740_v14 = vmax.f32 %v530_v26, %v1443_v60  ;;  %v1446_v15 = vadd.f32 %v1445_v10, %v1444_v0  ;;  %v1510_v24 = vadd.f32 %v1509_v11, %v1508_v1 }
 0x13b   :  { %v950_v30 = vmax.f32 %v740_v14, %v1507_v61  ;;  %v741_v31 = vmax.f32 %v531_v29, %v1446_v15 }
 0x13d   :  { %v973_v50 = vadd.f32 %v2099_v25, %v950_v30  ;;  %v951_v51 = vmax.f32 %v741_v31, %v1510_v24  ;;  %v1447_v52 = vpop.f32.mrb[36].mxu0  ;;  %v1511_v53 = vpop.f32.mrb[36].mxu1 }
 0x13e   :  { %v1448_v39 = vpop.f32.mrb[37].mxu0  ;;  %v1512_v20 = vpop.f32.mrb[37].mxu1 }
 0x13f   :  { %v974_v21 = vadd.f32 %v2099_v25, %v951_v51  ;;  %v1449_v26 = vadd.f32 %v1448_v39, %v1447_v52  ;;  %v1513_v60 = vadd.f32 %v1512_v20, %v1511_v53  ;;  %v1450_v0 = vpop.f32.mrb[38].mxu0  ;;  %v1514_v1 = vpop.f32.mrb[38].mxu1  ;;  %v989_v10 = vmax.f32 %v973_v50, 0.0 }
 0x140   :  { %v1451_v11 = vpop.f32.mrb[39].mxu0  ;;  %v1515_v61 = vpop.f32.mrb[39].mxu1 }
 0x141   :  { %v990_v14 = vmax.f32 %v974_v21, 0.0  ;;  %v742_v27 = vmax.f32 %v532_v40, %v1449_v26  ;;  %v1452_v28 = vadd.f32 %v1451_v11, %v1450_v0  ;;  %v1516_v29 = vadd.f32 %v1515_v61, %v1514_v1 }
 0x143   :  { %v1253_v15 = vpack.c.bf16 %v990_v14, %v989_v10  ;;  %v952_v24 = vmax.f32 %v742_v27, %v1513_v60  ;;  %v743_v30 = vmax.f32 %v533_v43, %v1452_v28 }
 0x145   :  { %1254 = vst [vmem:[%s2189_s3] sm:$0xff] %v1253_v15   ;;  %v975_v39 = vadd.f32 %v2099_v25, %v952_v24  ;;  %v953_v31 = vmax.f32 %v743_v30, %v1516_v29  ;;  %v1453_v50 = vpop.f32.mrb[40].mxu0  ;;  %v1517_v51 = vpop.f32.mrb[40].mxu1 }
 0x146   :  { %v1454_v52 = vpop.f32.mrb[41].mxu0  ;;  %v1518_v34 = vpop.f32.mrb[41].mxu1 }
 0x147   :  { %v976_v35 = vadd.f32 %v2099_v25, %v953_v31  ;;  %v1455_v40 = vadd.f32 %v1454_v52, %v1453_v50  ;;  %v1519_v53 = vadd.f32 %v1518_v34, %v1517_v51  ;;  %v1456_v20 = vpop.f32.mrb[42].mxu0  ;;  %v1520_v21 = vpop.f32.mrb[42].mxu1  ;;  %v991_v26 = vmax.f32 %v975_v39, 0.0 }
 0x148   :  { %v1457_v41 = vpop.f32.mrb[43].mxu0  ;;  %v1521_v42 = vpop.f32.mrb[43].mxu1 }
 0x149   :  { %v992_v43 = vmax.f32 %v976_v35, 0.0  ;;  %v744_v60 = vmax.f32 %v534_v54, %v1455_v40  ;;  %v1458_v0 = vadd.f32 %v1457_v41, %v1456_v20  ;;  %v1522_v1 = vadd.f32 %v1521_v42, %v1520_v21 }
 0x14b   :  { %v1258_v10 = vpack.c.bf16 %v992_v43, %v991_v26  ;;  %v954_v11 = vmax.f32 %v744_v60, %v1519_v53  ;;  %v745_v61 = vmax.f32 %v535_v57, %v1458_v0 }
 0x14d   :  { %1290 = vst [vmem:[%s2189_s3 + $0x8] sm:$0xff] %v1258_v10   ;;  %v977_v14 = vadd.f32 %v2099_v25, %v954_v11  ;;  %v955_v27 = vmax.f32 %v745_v61, %v1522_v1  ;;  %v1459_v28 = vpop.f32.mrb[44].mxu0  ;;  %v1523_v29 = vpop.f32.mrb[44].mxu1 }
 0x14e   :  { %v1460_v15 = vpop.f32.mrb[45].mxu0  ;;  %v1524_v48 = vpop.f32.mrb[45].mxu1 }
 0x14f   :  { %v978_v49 = vadd.f32 %v2099_v25, %v955_v27  ;;  %v1461_v54 = vadd.f32 %v1460_v15, %v1459_v28  ;;  %v1525_v24 = vadd.f32 %v1524_v48, %v1523_v29  ;;  %v1462_v30 = vpop.f32.mrb[46].mxu0  ;;  %v1526_v39 = vpop.f32.mrb[46].mxu1  ;;  %v993_v31 = vmax.f32 %v977_v14, 0.0 }
 0x150   :  { %v1463_v55 = vpop.f32.mrb[47].mxu0  ;;  %v1527_v56 = vpop.f32.mrb[47].mxu1 }
 0x151   :  { %v994_v57 = vmax.f32 %v978_v49, 0.0  ;;  %v746_v50 = vmax.f32 %v536_v4, %v1461_v54  ;;  %v1464_v51 = vadd.f32 %v1463_v55, %v1462_v30  ;;  %v1528_v52 = vadd.f32 %v1527_v56, %v1526_v39 }
 0x153   :  { %v1263_v34 = vpack.c.bf16 %v994_v57, %v993_v31  ;;  %v956_v35 = vmax.f32 %v746_v50, %v1525_v24  ;;  %v747_v40 = vmax.f32 %v537_v7, %v1464_v51 }
 0x155   :  { %1291 = vst [vmem:[%s2189_s3 + $0x10] sm:$0xff] %v1263_v34   ;;  %v979_v53 = vadd.f32 %v2099_v25, %v956_v35  ;;  %v957_v20 = vmax.f32 %v747_v40, %v1528_v52  ;;  %v1465_v21 = vpop.f32.mrb[48].mxu0  ;;  %v1529_v26 = vpop.f32.mrb[48].mxu1 }
 0x156   :  { %v1466_v41 = vpop.f32.mrb[49].mxu0  ;;  %v1530_v62 = vpop.f32.mrb[49].mxu1 }
 0x157   :  { %v980_v63 = vadd.f32 %v2099_v25, %v957_v20  ;;  %v1467_v4 = vadd.f32 %v1466_v41, %v1465_v21  ;;  %v1531_v42 = vadd.f32 %v1530_v62, %v1529_v26  ;;  %v1468_v43 = vpop.f32.mrb[50].mxu0  ;;  %v1532_v60 = vpop.f32.mrb[50].mxu1  ;;  %v995_v0 = vmax.f32 %v979_v53, 0.0 }
 0x158   :  { %v1469_v5 = vpop.f32.mrb[51].mxu0  ;;  %v1533_v6 = vpop.f32.mrb[51].mxu1 }
 0x159   :  { %v996_v7 = vmax.f32 %v980_v63, 0.0  ;;  %v748_v1 = vmax.f32 %v538_v18, %v1467_v4  ;;  %v1470_v10 = vadd.f32 %v1469_v5, %v1468_v43  ;;  %v1534_v11 = vadd.f32 %v1533_v6, %v1532_v60 }
 0x15b   :  { %v1268_v61 = vpack.c.bf16 %v996_v7, %v995_v0  ;;  %v958_v14 = vmax.f32 %v748_v1, %v1531_v42  ;;  %v749_v27 = vmax.f32 %v539_v23, %v1470_v10 }
 0x15d   :  { %1292 = vst [vmem:[%s2189_s3 + $0x18] sm:$0xff] %v1268_v61   ;;  %v981_v28 = vadd.f32 %v2099_v25, %v958_v14  ;;  %v959_v29 = vmax.f32 %v749_v27, %v1534_v11  ;;  %v1471_v15 = vpop.f32.mrb[52].mxu0  ;;  %v1535_v48 = vpop.f32.mrb[52].mxu1 }
 0x15e   :  { %v1472_v49 = vpop.f32.mrb[53].mxu0  ;;  %v1536_v12 = vpop.f32.mrb[53].mxu1 }
 0x15f   :  { %v982_v13 = vadd.f32 %v2099_v25, %v959_v29  ;;  %v1473_v18 = vadd.f32 %v1472_v49, %v1471_v15  ;;  %v1537_v54 = vadd.f32 %v1536_v12, %v1535_v48  ;;  %v1474_v24 = vpop.f32.mrb[54].mxu0  ;;  %v1538_v30 = vpop.f32.mrb[54].mxu1  ;;  %v997_v39 = vmax.f32 %v981_v28, 0.0 }
 0x160   :  { %v1475_v19 = vpop.f32.mrb[55].mxu0  ;;  %v1539_v22 = vpop.f32.mrb[55].mxu1  ;;  %v2190_v49 = vmax.f32 %v2087_v37, %v2089_v38 }
 0x161   :  { %v998_v23 = vmax.f32 %v982_v13, 0.0  ;;  %v750_v31 = vmax.f32 %v540_v44, %v1473_v18  ;;  %v1476_v55 = vadd.f32 %v1475_v19, %v1474_v24  ;;  %v1540_v56 = vadd.f32 %v1539_v22, %v1538_v30 }
 0x163   :  { %v1273_v57 = vpack.c.bf16 %v998_v23, %v997_v39  ;;  %v960_v50 = vmax.f32 %v750_v31, %v1537_v54  ;;  %v751_v51 = vmax.f32 %v541_v47, %v1476_v55 }
 0x165   :  { %1293 = vst [vmem:[%s2189_s3 + $0x20] sm:$0xff] %v1273_v57   ;;  %v983_v52 = vadd.f32 %v2099_v25, %v960_v50  ;;  %v961_v34 = vmax.f32 %v751_v51, %v1540_v56  ;;  %v1477_v35 = vpop.f32.mrb[56].mxu0  ;;  %v1541_v40 = vpop.f32.mrb[56].mxu1 }
 0x166   :  { %v1478_v53 = vpop.f32.mrb[57].mxu0  ;;  %v1542_v32 = vpop.f32.mrb[57].mxu1 }
 0x167   :  { %v984_v33 = vadd.f32 %v2099_v25, %v961_v34  ;;  %v1479_v44 = vadd.f32 %v1478_v53, %v1477_v35  ;;  %v1543_v20 = vadd.f32 %v1542_v32, %v1541_v40  ;;  %v1480_v21 = vpop.f32.mrb[58].mxu0  ;;  %v1544_v26 = vpop.f32.mrb[58].mxu1  ;;  %v999_v41 = vmax.f32 %v983_v52, 0.0 }
 0x168   :  { %v1481_v45 = vpop.f32.mrb[59].mxu0  ;;  %v1545_v46 = vpop.f32.mrb[59].mxu1 }
 0x169   :  { %v1000_v47 = vmax.f32 %v984_v33, 0.0  ;;  %v752_v62 = vmax.f32 %v542_v2, %v1479_v44  ;;  %v1482_v63 = vadd.f32 %v1481_v45, %v1480_v21  ;;  %v1546_v4 = vadd.f32 %v1545_v46, %v1544_v26 }
 0x16b   :  { %v1278_v42 = vpack.c.bf16 %v1000_v47, %v999_v41  ;;  %v962_v43 = vmax.f32 %v752_v62, %v1543_v20  ;;  %v753_v60 = vmax.f32 %v543_v9, %v1482_v63 }
 0x16d   :  { %1294 = vst [vmem:[%s2189_s3 + $0x28] sm:$0xff] %v1278_v42   ;;  %v985_v0 = vadd.f32 %v2099_v25, %v962_v43  ;;  %v963_v5 = vmax.f32 %v753_v60, %v1546_v4  ;;  %v1483_v6 = vpop.f32.mrb[60].mxu0  ;;  %v1547_v7 = vpop.f32.mrb[60].mxu1 }
 0x16e   :  { %v1484_v1 = vpop.f32.mrb[61].mxu0  ;;  %v1548_v58 = vpop.f32.mrb[61].mxu1 }
 0x16f   :  { %v986_v59 = vadd.f32 %v2099_v25, %v963_v5  ;;  %v1485_v2 = vadd.f32 %v1484_v1, %v1483_v6  ;;  %v1549_v10 = vadd.f32 %v1548_v58, %v1547_v7  ;;  %v1486_v11 = vpop.f32.mrb[62].mxu0  ;;  %v1550_v61 = vpop.f32.mrb[62].mxu1  ;;  %v1001_v14 = vmax.f32 %v985_v0, 0.0 }
 0x170   :  { %v1487_v3 = vpop.f32.mrb[63].mxu0  ;;  %v1551_v8 = vpop.f32.mrb[63].mxu1 }
 0x171   :  { %v1002_v9 = vmax.f32 %v986_v59, 0.0  ;;  %v754_v27 = vmax.f32 %v544_v36, %v1485_v2  ;;  %v1488_v28 = vadd.f32 %v1487_v3, %v1486_v11  ;;  %v1552_v29 = vadd.f32 %v1551_v8, %v1550_v61 }
 0x173   :  { %v1283_v15 = vpack.c.bf16 %v1002_v9, %v1001_v14  ;;  %v964_v48 = vmax.f32 %v754_v27, %v1549_v10  ;;  %v755_v12 = vmax.f32 %v2190_v49, %v1488_v28 }
 0x175   :  { %1295 = vst [vmem:[%s2189_s3 + $0x30] sm:$0xff] %v1283_v15   ;;  %v987_v13 = vadd.f32 %v2099_v25, %v964_v48  ;;  %v965_v18 = vmax.f32 %v755_v12, %v1552_v29 }
 0x177   :  { %v988_v54 = vadd.f32 %v2099_v25, %v965_v18  ;;  %v1003_v24 = vmax.f32 %v987_v13, 0.0 }
 0x179   :  { %v1004_v16 = vmax.f32 %v988_v54, 0.0 }
 0x17b   :  { %v1288_v17 = vpack.c.bf16 %v1004_v16, %v1003_v24 }
 0x17d   :  { %1296 = vst [vmem:[%s2189_s3 + $0x38] sm:$0xff] %v1288_v17  }

// kernel: forward.5
= control target key start
LH: loop header
LB: loop body
LE: loop exit
PB: predicated region body
PF: predicated region fallthrough
CT: control target
= control target key end

     0   :  { %vm2082_vm0 = vmmov 0   ;;  %s2554_s1 = inlined_call_operand.vmem [shape: bf16[2048,128], index: 1, kind: input, shape index: {}]   ;;  %s2555_s0 = inlined_call_operand.vmem [shape: bf16[8,2048], index: 0, kind: input, shape index: {}]   ;;  %s2556_s3 = inlined_call_operand.vmem [shape: bf16[128,128], index: 3, kind: input, shape index: {}]   ;;  %s2557_s2 = inlined_call_operand.vmem [shape: f32[1,128], index: 2, kind: input, shape index: {}]   ;;  %s2558_s4 = inlined_call_operand.vmem [shape: f32[1,128], index: 4, kind: input, shape index: {}]   ;;  %s2559_s5 = inlined_call_operand.vmem [shape: f32[8,128], index: 5, kind: output, shape index: {}]  }
   0x1   :  { %v1925_v0 = vld [vmem:[%s2554_s1 + $0x40] sm:$0xff]   ;;  %v1929_v4 = vld [vmem:[%s2554_s1 + $0x48] sm:$0xff]   ;;  %v1933_v8 = vld [vmem:[%s2554_s1 + $0x50] sm:$0xff]  }
   0x2   :  { %v1926_v1 = vld [vmem:[%s2554_s1 + $0xc0] sm:$0xff]   ;;  %1718 = vmatprep.subr.bf16.mxu0 %v1925_v0  ;;  %v1930_v5 = vld [vmem:[%s2554_s1 + $0xc8] sm:$0xff]   ;;  %v1934_v9 = vld [vmem:[%s2554_s1 + $0xd0] sm:$0xff]  }
   0x3   :  { %v1927_v2 = vld [vmem:[%s2554_s1] sm:$0xff]   ;;  %1740 = vmatprep.subr.bf16.mxu1 %v1926_v1  ;;  %v1931_v6 = vld [vmem:[%s2554_s1 + $0x8] sm:$0xff]   ;;  %v1935_v10 = vld [vmem:[%s2554_s1 + $0x10] sm:$0xff]  }
   0x4   :  { %v1928_v3 = vld [vmem:[%s2554_s1 + $0x80] sm:$0xff]   ;;  %1719 = vmatpush3.bf16.msra.mxu0 %v1927_v2  ;;  %v1932_v7 = vld [vmem:[%s2554_s1 + $0x88] sm:$0xff]   ;;  %v1936_v11 = vld [vmem:[%s2554_s1 + $0x90] sm:$0xff]  }
   0x5   :  { %1741 = vmatpush3.bf16.msra.mxu1 %v1928_v3  ;;  %1720 = vmatprep.subr.bf16.mxu0 %v1929_v4  ;;  %v1937_v12 = vld [vmem:[%s2554_s1 + $0x58] sm:$0xff]   ;;  %v1941_v16 = vld [vmem:[%s2554_s1 + $0x60] sm:$0xff]   ;;  %v1945_v20 = vld [vmem:[%s2554_s1 + $0x68] sm:$0xff]  }
   0x6   :  { %1742 = vmatprep.subr.bf16.mxu1 %v1930_v5  ;;  %v1938_v13 = vld [vmem:[%s2554_s1 + $0xd8] sm:$0xff]   ;;  %v1942_v17 = vld [vmem:[%s2554_s1 + $0xe0] sm:$0xff]   ;;  %v1946_v21 = vld [vmem:[%s2554_s1 + $0xe8] sm:$0xff]  }
   0x7   :  { %v1939_v14 = vld [vmem:[%s2554_s1 + $0x18] sm:$0xff]   ;;  %v1943_v18 = vld [vmem:[%s2554_s1 + $0x20] sm:$0xff]   ;;  %v1947_v22 = vld [vmem:[%s2554_s1 + $0x28] sm:$0xff]  }
   0x8   :  { %1721 = vmatpush3.bf16.msra.mxu0 %v1931_v6  ;;  %v1940_v15 = vld [vmem:[%s2554_s1 + $0x98] sm:$0xff]   ;;  %v1944_v19 = vld [vmem:[%s2554_s1 + $0xa0] sm:$0xff]   ;;  %v1948_v23 = vld [vmem:[%s2554_s1 + $0xa8] sm:$0xff]  }
   0x9   :  { %1743 = vmatpush3.bf16.msra.mxu1 %v1932_v7  ;;  %1722 = vmatprep.subr.bf16.mxu0 %v1933_v8  ;;  %v1949_v24 = vld [vmem:[%s2554_s1 + $0x70] sm:$0xff]   ;;  %v1953_v28 = vld [vmem:[%s2554_s1 + $0x78] sm:$0xff]   ;;  %v21_v32 = vld [vmem:[%s2555_s0] sm:$0xff] }
   0xa   :  { %1744 = vmatprep.subr.bf16.mxu1 %v1934_v9  ;;  %v1950_v25 = vld [vmem:[%s2554_s1 + $0xf0] sm:$0xff]   ;;  %v1954_v29 = vld [vmem:[%s2554_s1 + $0xf8] sm:$0xff]   ;;  %v22_v33 = vld [vmem:[%s2555_s0 + $0x8] sm:$0xff]  ;;  %v1565_v34 = vcombine.low %v21_v32, %v21_v32  ;;  %v1566_v35 = vcombine.high %v21_v32, %v21_v32 }
   0xb   :  { %v1951_v26 = vld [vmem:[%s2554_s1 + $0x30] sm:$0xff]   ;;  %v1955_v30 = vld [vmem:[%s2554_s1 + $0x38] sm:$0xff]   ;;  %v1567_v36 = vcombine.low %v22_v33, %v22_v33  ;;  %v1568_v37 = vcombine.high %v22_v33, %v22_v33  ;;  %v1961_v38 = vld [vmem:[%s2554_s1 + $0x140] sm:$0xff]  }
   0xc   :  { %1723 = vmatpush3.bf16.msra.mxu0 %v1935_v10  ;;  %v1952_v27 = vld [vmem:[%s2554_s1 + $0xb0] sm:$0xff]   ;;  %v1956_v31 = vld [vmem:[%s2554_s1 + $0xb8] sm:$0xff]   ;;  %v1962_v39 = vld [vmem:[%s2554_s1 + $0x1c0] sm:$0xff]   ;;  %1148 = vmatprep.mubr.bf16.mxu0 %v1566_v35 }
   0xd   :  { %1745 = vmatpush3.bf16.msra.mxu1 %v1936_v11  ;;  %1724 = vmatprep.subr.bf16.mxu0 %v1937_v12  ;;  %v1963_v40 = vld [vmem:[%s2554_s1 + $0x100] sm:$0xff]   ;;  %v1965_v42 = vld [vmem:[%s2554_s1 + $0x148] sm:$0xff]   ;;  %v1969_v46 = vld [vmem:[%s2554_s1 + $0x150] sm:$0xff]  }
   0xe   :  { %1746 = vmatprep.subr.bf16.mxu1 %v1938_v13  ;;  %1188 = vmatprep.mubr.bf16.mxu1 %v1568_v37  ;;  %v1964_v41 = vld [vmem:[%s2554_s1 + $0x180] sm:$0xff]   ;;  %v1966_v43 = vld [vmem:[%s2554_s1 + $0x1c8] sm:$0xff]   ;;  %v1970_v47 = vld [vmem:[%s2554_s1 + $0x1d0] sm:$0xff]  }
   0xf   :  { %v1967_v44 = vld [vmem:[%s2554_s1 + $0x108] sm:$0xff]   ;;  %v1971_v48 = vld [vmem:[%s2554_s1 + $0x110] sm:$0xff]   ;;  %v1973_v50 = vld [vmem:[%s2554_s1 + $0x158] sm:$0xff]  }
  0x10   :  { %1725 = vmatpush3.bf16.msra.mxu0 %v1939_v14  ;;  %v1968_v45 = vld [vmem:[%s2554_s1 + $0x188] sm:$0xff]   ;;  %v1972_v49 = vld [vmem:[%s2554_s1 + $0x190] sm:$0xff]   ;;  %v1974_v51 = vld [vmem:[%s2554_s1 + $0x1d8] sm:$0xff]  }
  0x11   :  { %1747 = vmatpush3.bf16.msra.mxu1 %v1940_v15  ;;  %1726 = vmatprep.subr.bf16.mxu0 %v1941_v16  ;;  %v1975_v52 = vld [vmem:[%s2554_s1 + $0x118] sm:$0xff]   ;;  %v1977_v54 = vld [vmem:[%s2554_s1 + $0x160] sm:$0xff]   ;;  %v1981_v58 = vld [vmem:[%s2554_s1 + $0x168] sm:$0xff]  }
  0x12   :  { %1748 = vmatprep.subr.bf16.mxu1 %v1942_v17  ;;  %v1976_v53 = vld [vmem:[%s2554_s1 + $0x198] sm:$0xff]   ;;  %v1978_v55 = vld [vmem:[%s2554_s1 + $0x1e0] sm:$0xff]   ;;  %v1982_v59 = vld [vmem:[%s2554_s1 + $0x1e8] sm:$0xff]  }
  0x13   :  { %v1979_v56 = vld [vmem:[%s2554_s1 + $0x120] sm:$0xff]   ;;  %v1983_v60 = vld [vmem:[%s2554_s1 + $0x128] sm:$0xff]   ;;  %v1985_v62 = vld [vmem:[%s2554_s1 + $0x170] sm:$0xff]  }
  0x14   :  { %1727 = vmatpush3.bf16.msra.mxu0 %v1943_v18  ;;  %v1980_v57 = vld [vmem:[%s2554_s1 + $0x1a0] sm:$0xff]   ;;  %v1984_v61 = vld [vmem:[%s2554_s1 + $0x1a8] sm:$0xff]   ;;  %v1986_v63 = vld [vmem:[%s2554_s1 + $0x1f0] sm:$0xff]  }
  0x15   :  { %1749 = vmatpush3.bf16.msra.mxu1 %v1944_v19  ;;  %1728 = vmatprep.subr.bf16.mxu0 %v1945_v20  ;;  %v1987_v0 = vld [vmem:[%s2554_s1 + $0x130] sm:$0xff]   ;;  %v1989_v2 = vld [vmem:[%s2554_s1 + $0x178] sm:$0xff]   ;;  %v1997_v12 = vld [vmem:[%s2554_s1 + $0x240] sm:$0xff]  }
  0x16   :  { %1750 = vmatprep.subr.bf16.mxu1 %v1946_v21  ;;  %v1988_v1 = vld [vmem:[%s2554_s1 + $0x1b0] sm:$0xff]   ;;  %v1990_v3 = vld [vmem:[%s2554_s1 + $0x1f8] sm:$0xff]   ;;  %v1998_v13 = vld [vmem:[%s2554_s1 + $0x2c0] sm:$0xff]  }
  0x17   :  { %v1991_v4 = vld [vmem:[%s2554_s1 + $0x138] sm:$0xff]   ;;  %v23_v6 = vld [vmem:[%s2555_s0 + $0x10] sm:$0xff]  ;;  %v1999_v14 = vld [vmem:[%s2554_s1 + $0x200] sm:$0xff]  }
  0x18   :  { %1729 = vmatpush3.bf16.msra.mxu0 %v1947_v22  ;;  %v1992_v5 = vld [vmem:[%s2554_s1 + $0x1b8] sm:$0xff]   ;;  %v1569_v7 = vcombine.low %v23_v6, %v23_v6  ;;  %v1570_v8 = vcombine.high %v23_v6, %v23_v6  ;;  %v2000_v15 = vld [vmem:[%s2554_s1 + $0x280] sm:$0xff]   ;;  %v2001_v16 = vld [vmem:[%s2554_s1 + $0x248] sm:$0xff]  }
  0x19   :  { %1751 = vmatpush3.bf16.msra.mxu1 %v1948_v23  ;;  %1730 = vmatprep.subr.bf16.mxu0 %v1949_v24  ;;  %v24_v9 = vld [vmem:[%s2555_s0 + $0x18] sm:$0xff]  ;;  %v2002_v17 = vld [vmem:[%s2554_s1 + $0x2c8] sm:$0xff]   ;;  %v2005_v20 = vld [vmem:[%s2554_s1 + $0x250] sm:$0xff]  }
  0x1a   :  { %1752 = vmatprep.subr.bf16.mxu1 %v1950_v25  ;;  %v1571_v10 = vcombine.low %v24_v9, %v24_v9  ;;  %v1572_v11 = vcombine.high %v24_v9, %v24_v9  ;;  %v2003_v18 = vld [vmem:[%s2554_s1 + $0x208] sm:$0xff]   ;;  %v2006_v21 = vld [vmem:[%s2554_s1 + $0x2d0] sm:$0xff]   ;;  %v2009_v24 = vld [vmem:[%s2554_s1 + $0x258] sm:$0xff]  }
  0x1b   :  { %v2004_v19 = vld [vmem:[%s2554_s1 + $0x288] sm:$0xff]   ;;  %v2007_v22 = vld [vmem:[%s2554_s1 + $0x210] sm:$0xff]   ;;  %v2010_v25 = vld [vmem:[%s2554_s1 + $0x2d8] sm:$0xff]  }
  0x1c   :  { %1731 = vmatpush3.bf16.msra.mxu0 %v1951_v26  ;;  %v2008_v23 = vld [vmem:[%s2554_s1 + $0x290] sm:$0xff]   ;;  %v2011_v26 = vld [vmem:[%s2554_s1 + $0x218] sm:$0xff]   ;;  %v2017_v32 = vld [vmem:[%s2554_s1 + $0x268] sm:$0xff]  }
  0x1d   :  { %1753 = vmatpush3.bf16.msra.mxu1 %v1952_v27  ;;  %1732 = vmatprep.subr.bf16.mxu0 %v1953_v28  ;;  %v2012_v27 = vld [vmem:[%s2554_s1 + $0x298] sm:$0xff]   ;;  %v2013_v28 = vld [vmem:[%s2554_s1 + $0x260] sm:$0xff]   ;;  %v2018_v33 = vld [vmem:[%s2554_s1 + $0x2e8] sm:$0xff]  }
  0x1e   :  { %1754 = vmatprep.subr.bf16.mxu1 %v1954_v29  ;;  %v2014_v29 = vld [vmem:[%s2554_s1 + $0x2e0] sm:$0xff]   ;;  %v2020_v35 = vld [vmem:[%s2554_s1 + $0x2a8] sm:$0xff]   ;;  %v2022_v37 = vld [vmem:[%s2554_s1 + $0x2f0] sm:$0xff]  }
  0x1f   :  { %v2053_v6 = vld [vmem:[%s2554_s1 + $0x368] sm:$0xff]  }
  0x20   :  { %1733 = vmatpush3.bf16.msra.mxu0 %v1955_v30  ;;  %v2015_v30 = vld [vmem:[%s2554_s1 + $0x220] sm:$0xff]   ;;  %v2056_v9 = vld [vmem:[%s2554_s1 + $0x3a8] sm:$0xff]  }
  0x21   :  { %1755 = vmatpush3.bf16.msra.mxu1 %v1956_v31  ;;  %1762 = vmatprep.subr.bf16.mxu0 %v1961_v38  ;;  %v2016_v31 = vld [vmem:[%s2554_s1 + $0x2a0] sm:$0xff]   ;;  %v2023_v38 = vld [vmem:[%s2554_s1 + $0x230] sm:$0xff]  }
  0x22   :  { %1784 = vmatprep.subr.bf16.mxu1 %v1962_v39  ;;  %v2024_v39 = vld [vmem:[%s2554_s1 + $0x2b0] sm:$0xff]  }
  0x23   :  { %1149 = vmatmul.mubr.bf16.vlgmr.msra.gmra.mrb[0].mxu0 %v1565_v34  ;;  %v2019_v34 = vld [vmem:[%s2554_s1 + $0x228] sm:$0xff]  }
  0x24   :  { %1189 = vmatmul.mubr.bf16.vlgmr.msra.gmra.mrb[0].mxu1 %v1567_v36  ;;  %1763 = vmatpush3.bf16.msra.mxu0 %v1963_v40  ;;  %v2021_v36 = vld [vmem:[%s2554_s1 + $0x270] sm:$0xff]   ;;  %v2025_v40 = vld [vmem:[%s2554_s1 + $0x278] sm:$0xff]  }
  0x25   :  { %1785 = vmatpush3.bf16.msra.mxu1 %v1964_v41  ;;  %1764 = vmatprep.subr.bf16.mxu0 %v1965_v42  ;;  %v2026_v41 = vld [vmem:[%s2554_s1 + $0x2f8] sm:$0xff]  }
  0x26   :  { %1786 = vmatprep.subr.bf16.mxu1 %v1966_v43  ;;  %1228 = vmatprep.mubr.bf16.mxu0 %v1570_v8  ;;  %v2027_v42 = vld [vmem:[%s2554_s1 + $0x238] sm:$0xff]   ;;  %v2055_v8 = vld [vmem:[%s2554_s1 + $0x328] sm:$0xff]  }
  0x27   :  { %1268 = vmatprep.mubr.bf16.mxu1 %v1572_v11  ;;  %v2028_v43 = vld [vmem:[%s2554_s1 + $0x2b8] sm:$0xff]   ;;  %v2058_v11 = vld [vmem:[%s2554_s1 + $0x3f0] sm:$0xff]  }
  0x28   :  { %1765 = vmatpush3.bf16.msra.mxu0 %v1967_v44  ;;  %v25_v44 = vld [vmem:[%s2555_s0 + $0x20] sm:$0xff] }
  0x29   :  { %1787 = vmatpush3.bf16.msra.mxu1 %v1968_v45  ;;  %1766 = vmatprep.subr.bf16.mxu0 %v1969_v46  ;;  %v26_v45 = vld [vmem:[%s2555_s0 + $0x28] sm:$0xff]  ;;  %v1573_v46 = vcombine.low %v25_v44, %v25_v44 }
  0x2a   :  { %1788 = vmatprep.subr.bf16.mxu1 %v1970_v47  ;;  %v1574_v47 = vcombine.high %v25_v44, %v25_v44 }
  0x2c   :  { %1767 = vmatpush3.bf16.msra.mxu0 %v1971_v48  ;;  %v1575_v48 = vcombine.low %v26_v45, %v26_v45 }
  0x2d   :  { %1789 = vmatpush3.bf16.msra.mxu1 %v1972_v49  ;;  %1768 = vmatprep.subr.bf16.mxu0 %v1973_v50  ;;  %v1576_v49 = vcombine.high %v26_v45, %v26_v45  ;;  %v2033_v50 = vld [vmem:[%s2554_s1 + $0x340] sm:$0xff]  }
  0x2e   :  { %1790 = vmatprep.subr.bf16.mxu1 %v1974_v51  ;;  %v2034_v51 = vld [vmem:[%s2554_s1 + $0x3c0] sm:$0xff]  }
  0x30   :  { %1769 = vmatpush3.bf16.msra.mxu0 %v1975_v52  ;;  %v2035_v52 = vld [vmem:[%s2554_s1 + $0x300] sm:$0xff]  }
  0x31   :  { %1791 = vmatpush3.bf16.msra.mxu1 %v1976_v53  ;;  %1770 = vmatprep.subr.bf16.mxu0 %v1977_v54  ;;  %v2036_v53 = vld [vmem:[%s2554_s1 + $0x380] sm:$0xff]   ;;  %v2037_v54 = vld [vmem:[%s2554_s1 + $0x348] sm:$0xff]  }
  0x32   :  { %1792 = vmatprep.subr.bf16.mxu1 %v1978_v55  ;;  %v2038_v55 = vld [vmem:[%s2554_s1 + $0x3c8] sm:$0xff]  }
  0x34   :  { %1771 = vmatpush3.bf16.msra.mxu0 %v1979_v56  ;;  %v2039_v56 = vld [vmem:[%s2554_s1 + $0x308] sm:$0xff]  }
  0x35   :  { %1793 = vmatpush3.bf16.msra.mxu1 %v1980_v57  ;;  %1772 = vmatprep.subr.bf16.mxu0 %v1981_v58  ;;  %v2040_v57 = vld [vmem:[%s2554_s1 + $0x388] sm:$0xff]   ;;  %v2041_v58 = vld [vmem:[%s2554_s1 + $0x350] sm:$0xff]  }
  0x36   :  { %1794 = vmatprep.subr.bf16.mxu1 %v1982_v59  ;;  %v2042_v59 = vld [vmem:[%s2554_s1 + $0x3d0] sm:$0xff]  }
  0x38   :  { %1773 = vmatpush3.bf16.msra.mxu0 %v1983_v60  ;;  %v2043_v60 = vld [vmem:[%s2554_s1 + $0x310] sm:$0xff]  }
  0x39   :  { %1795 = vmatpush3.bf16.msra.mxu1 %v1984_v61  ;;  %1774 = vmatprep.subr.bf16.mxu0 %v1985_v62  ;;  %v2044_v61 = vld [vmem:[%s2554_s1 + $0x390] sm:$0xff]   ;;  %v2045_v62 = vld [vmem:[%s2554_s1 + $0x358] sm:$0xff]  }
  0x3a   :  { %1796 = vmatprep.subr.bf16.mxu1 %v1986_v63  ;;  %v2046_v63 = vld [vmem:[%s2554_s1 + $0x3d8] sm:$0xff]  }
  0x3c   :  { %1775 = vmatpush3.bf16.msra.mxu0 %v1987_v0  ;;  %v2047_v0 = vld [vmem:[%s2554_s1 + $0x318] sm:$0xff]  }
  0x3d   :  { %1797 = vmatpush3.bf16.msra.mxu1 %v1988_v1  ;;  %1776 = vmatprep.subr.bf16.mxu0 %v1989_v2  ;;  %v2048_v1 = vld [vmem:[%s2554_s1 + $0x398] sm:$0xff]   ;;  %v2049_v2 = vld [vmem:[%s2554_s1 + $0x360] sm:$0xff]  }
  0x3e   :  { %1798 = vmatprep.subr.bf16.mxu1 %v1990_v3  ;;  %v2050_v3 = vld [vmem:[%s2554_s1 + $0x3e0] sm:$0xff]  }
  0x40   :  { %1777 = vmatpush3.bf16.msra.mxu0 %v1991_v4  ;;  %v2051_v4 = vld [vmem:[%s2554_s1 + $0x320] sm:$0xff]  }
  0x41   :  { %1799 = vmatpush3.bf16.msra.mxu1 %v1992_v5  ;;  %1806 = vmatprep.subr.bf16.mxu0 %v1997_v12  ;;  %v2052_v5 = vld [vmem:[%s2554_s1 + $0x3a0] sm:$0xff]   ;;  %v2059_v12 = vld [vmem:[%s2554_s1 + $0x330] sm:$0xff]  }
  0x42   :  { %1828 = vmatprep.subr.bf16.mxu1 %v1998_v13  ;;  %v2060_v13 = vld [vmem:[%s2554_s1 + $0x3b0] sm:$0xff]  }
  0x43   :  { %1229 = vmatmul.mubr.bf16.vlgmr.msra.gmra.mrb[4].mxu0 %v1569_v7  ;;  %v2054_v7 = vld [vmem:[%s2554_s1 + $0x3e8] sm:$0xff]  }
  0x44   :  { %1269 = vmatmul.mubr.bf16.vlgmr.msra.gmra.mrb[4].mxu1 %v1571_v10  ;;  %1807 = vmatpush3.bf16.msra.mxu0 %v1999_v14  ;;  %v2057_v10 = vld [vmem:[%s2554_s1 + $0x370] sm:$0xff]   ;;  %v2061_v14 = vld [vmem:[%s2554_s1 + $0x378] sm:$0xff]  }
  0x45   :  { %1829 = vmatpush3.bf16.msra.mxu1 %v2000_v15  ;;  %1808 = vmatprep.subr.bf16.mxu0 %v2001_v16  ;;  %v2062_v15 = vld [vmem:[%s2554_s1 + $0x3f8] sm:$0xff]  }
  0x46   :  { %1830 = vmatprep.subr.bf16.mxu1 %v2002_v17  ;;  %1308 = vmatprep.mubr.bf16.mxu0 %v1574_v47  ;;  %v2063_v16 = vld [vmem:[%s2554_s1 + $0x338] sm:$0xff]  }
  0x47   :  { %1348 = vmatprep.mubr.bf16.mxu1 %v1576_v49  ;;  %v2064_v17 = vld [vmem:[%s2554_s1 + $0x3b8] sm:$0xff]  }
  0x48   :  { %1809 = vmatpush3.bf16.msra.mxu0 %v2003_v18  ;;  %v27_v18 = vld [vmem:[%s2555_s0 + $0x30] sm:$0xff] }
  0x49   :  { %1831 = vmatpush3.bf16.msra.mxu1 %v2004_v19  ;;  %1810 = vmatprep.subr.bf16.mxu0 %v2005_v20  ;;  %v28_v19 = vld [vmem:[%s2555_s0 + $0x38] sm:$0xff]  ;;  %v1577_v20 = vcombine.low %v27_v18, %v27_v18 }
  0x4a   :  { %1832 = vmatprep.subr.bf16.mxu1 %v2006_v21  ;;  %v1578_v21 = vcombine.high %v27_v18, %v27_v18 }
  0x4c   :  { %1811 = vmatpush3.bf16.msra.mxu0 %v2007_v22  ;;  %v1579_v22 = vcombine.low %v28_v19, %v28_v19 }
  0x4d   :  { %1833 = vmatpush3.bf16.msra.mxu1 %v2008_v23  ;;  %1812 = vmatprep.subr.bf16.mxu0 %v2009_v24  ;;  %v1580_v23 = vcombine.high %v28_v19, %v28_v19  ;;  %v2081_v24 = vmov 0.0  }
  0x4e   :  { %1834 = vmatprep.subr.bf16.mxu1 %v2010_v25  ;;  %v2069_v25 = vld [vmem:[%s2556_s3] sm:$0xff]  }
  0x50   :  { %1813 = vmatpush3.bf16.msra.mxu0 %v2011_v26  ;;  %v2070_v26 = vld [vmem:[%s2556_s3 + $0x8] sm:$0xff]  }
  0x51   :  { %1835 = vmatpush3.bf16.msra.mxu1 %v2012_v27  ;;  %1814 = vmatprep.subr.bf16.mxu0 %v2013_v28  ;;  %v2071_v27 = vld [vmem:[%s2556_s3 + $0x10] sm:$0xff]   ;;  %v2072_v28 = vld [vmem:[%s2556_s3 + $0x18] sm:$0xff]  }
  0x52   :  { %1836 = vmatprep.subr.bf16.mxu1 %v2014_v29  ;;  %v2073_v29 = vld [vmem:[%s2556_s3 + $0x20] sm:$0xff]  }
  0x54   :  { %1815 = vmatpush3.bf16.msra.mxu0 %v2015_v30  ;;  %v2074_v30 = vld [vmem:[%s2556_s3 + $0x28] sm:$0xff]  }
  0x55   :  { %1837 = vmatpush3.bf16.msra.mxu1 %v2016_v31  ;;  %1816 = vmatprep.subr.bf16.mxu0 %v2017_v32  ;;  %v2075_v31 = vld [vmem:[%s2556_s3 + $0x30] sm:$0xff]   ;;  %v2076_v32 = vld [vmem:[%s2556_s3 + $0x38] sm:$0xff]  }
  0x56   :  { %1838 = vmatprep.subr.bf16.mxu1 %v2018_v33 }
  0x58   :  { %1817 = vmatpush3.bf16.msra.mxu0 %v2019_v34 }
  0x59   :  { %1839 = vmatpush3.bf16.msra.mxu1 %v2020_v35  ;;  %1818 = vmatprep.subr.bf16.mxu0 %v2021_v36  ;;  %v1564_v35 = vld [vmem:[%s2557_s2] ss:$0 sm:$0xff] }
  0x5a   :  { %1840 = vmatprep.subr.bf16.mxu1 %v2022_v37 }
  0x5c   :  { %1819 = vmatpush3.bf16.msra.mxu0 %v2023_v38 }
  0x5d   :  { %1841 = vmatpush3.bf16.msra.mxu1 %v2024_v39  ;;  %1820 = vmatprep.subr.bf16.mxu0 %v2025_v40 }
  0x5e   :  { %1842 = vmatprep.subr.bf16.mxu1 %v2026_v41 }
  0x60   :  { %1821 = vmatpush3.bf16.msra.mxu0 %v2027_v42 }
  0x61   :  { %1843 = vmatpush3.bf16.msra.mxu1 %v2028_v43  ;;  %1850 = vmatprep.subr.bf16.mxu0 %v2033_v50 }
  0x62   :  { %1872 = vmatprep.subr.bf16.mxu1 %v2034_v51 }
  0x63   :  { %1309 = vmatmul.mubr.bf16.vlgmr.msra.gmra.mrb[8].mxu0 %v1573_v46 }
  0x64   :  { %1349 = vmatmul.mubr.bf16.vlgmr.msra.gmra.mrb[8].mxu1 %v1575_v48  ;;  %1851 = vmatpush3.bf16.msra.mxu0 %v2035_v52 }
  0x65   :  { %1873 = vmatpush3.bf16.msra.mxu1 %v2036_v53  ;;  %1852 = vmatprep.subr.bf16.mxu0 %v2037_v54 }
  0x66   :  { %1874 = vmatprep.subr.bf16.mxu1 %v2038_v55  ;;  %1388 = vmatprep.mubr.bf16.mxu0 %v1578_v21 }
  0x67   :  { %1428 = vmatprep.mubr.bf16.mxu1 %v1580_v23 }
  0x68   :  { %1853 = vmatpush3.bf16.msra.mxu0 %v2039_v56 }
  0x69   :  { %1875 = vmatpush3.bf16.msra.mxu1 %v2040_v57  ;;  %1854 = vmatprep.subr.bf16.mxu0 %v2041_v58 }
  0x6a   :  { %1876 = vmatprep.subr.bf16.mxu1 %v2042_v59 }
  0x6c   :  { %1855 = vmatpush3.bf16.msra.mxu0 %v2043_v60 }
  0x6d   :  { %1877 = vmatpush3.bf16.msra.mxu1 %v2044_v61  ;;  %1856 = vmatprep.subr.bf16.mxu0 %v2045_v62 }
  0x6e   :  { %1878 = vmatprep.subr.bf16.mxu1 %v2046_v63 }
  0x70   :  { %1857 = vmatpush3.bf16.msra.mxu0 %v2047_v0 }
  0x71   :  { %1879 = vmatpush3.bf16.msra.mxu1 %v2048_v1  ;;  %1858 = vmatprep.subr.bf16.mxu0 %v2049_v2 }
  0x72   :  { %1880 = vmatprep.subr.bf16.mxu1 %v2050_v3 }
  0x74   :  { %1859 = vmatpush3.bf16.msra.mxu0 %v2051_v4 }
  0x75   :  { %1881 = vmatpush3.bf16.msra.mxu1 %v2052_v5  ;;  %1860 = vmatprep.subr.bf16.mxu0 %v2053_v6 }
  0x76   :  { %1882 = vmatprep.subr.bf16.mxu1 %v2054_v7 }
  0x78   :  { %1861 = vmatpush3.bf16.msra.mxu0 %v2055_v8 }
  0x79   :  { %1883 = vmatpush3.bf16.msra.mxu1 %v2056_v9  ;;  %1862 = vmatprep.subr.bf16.mxu0 %v2057_v10 }
  0x7a   :  { %1884 = vmatprep.subr.bf16.mxu1 %v2058_v11 }
  0x7c   :  { %1863 = vmatpush3.bf16.msra.mxu0 %v2059_v12 }
  0x7d   :  { %1885 = vmatpush3.bf16.msra.mxu1 %v2060_v13  ;;  %1864 = vmatprep.subr.bf16.mxu0 %v2061_v14 }
  0x7e   :  { %1886 = vmatprep.subr.bf16.mxu1 %v2062_v15 }
  0x80   :  { %1865 = vmatpush3.bf16.msra.mxu0 %v2063_v16 }
  0x81   :  { %1887 = vmatpush3.bf16.msra.mxu1 %v2064_v17  ;;  %1903 = vmatprep.subr.bf16.mxu0 %v2081_v24 }
  0x83   :  { %1389 = vmatmul.mubr.bf16.vlgmr.msra.gmra.mrb[12].mxu0 %v1577_v20  ;;  %v1709_v20 = vld [vmem:[%s2558_s4] ss:$0 sm:$0xff] }
  0x84   :  { %1429 = vmatmul.mubr.bf16.vlgmr.msra.gmra.mrb[12].mxu1 %v1579_v22  ;;  %1904 = vmatpush3.bf16.msra.mxu0 %v2069_v25 }
  0x85   :  { %1905 = vmatprep.subr.bf16.mxu0 %v2081_v24  ;;  %1919 = vmatprep.mubr.msk.bf16.mxu0 %vm2082_vm0, %v2081_v24 }
  0x88   :  { %1906 = vmatpush3.bf16.msra.mxu0 %v2070_v26 }
  0x89   :  { %1907 = vmatprep.subr.bf16.mxu0 %v2081_v24 }
  0x8c   :  { %1908 = vmatpush3.bf16.msra.mxu0 %v2071_v27 }
  0x8d   :  { %1909 = vmatprep.subr.bf16.mxu0 %v2081_v24 }
  0x90   :  { %1910 = vmatpush3.bf16.msra.mxu0 %v2072_v28 }
  0x91   :  { %1911 = vmatprep.subr.bf16.mxu0 %v2081_v24 }
  0x94   :  { %1912 = vmatpush3.bf16.msra.mxu0 %v2073_v29 }
  0x95   :  { %1913 = vmatprep.subr.bf16.mxu0 %v2081_v24 }
  0x98   :  { %1914 = vmatpush3.bf16.msra.mxu0 %v2074_v30 }
  0x99   :  { %1915 = vmatprep.subr.bf16.mxu0 %v2081_v24 }
  0x9c   :  { %1916 = vmatpush3.bf16.msra.mxu0 %v2075_v31 }
  0x9d   :  { %1917 = vmatprep.subr.bf16.mxu0 %v2081_v24 }
  0xa0   :  { %1918 = vmatpush3.bf16.msra.mxu0 %v2076_v32 }
  0xf6   :  { %v1734_v33 = vpop.f32.mrb[0].mxu0 }
  0xf7   :  { %v1756_v34 = vpop.f32.mrb[0].mxu1  ;;  %v1735_v36 = vpop.f32.mrb[1].mxu0 }
  0xf8   :  { %v1757_v37 = vpop.f32.mrb[1].mxu1  ;;  %v1736_v38 = vadd.f32 %v1735_v36, %v1734_v33  ;;  %v1737_v40 = vpop.f32.mrb[2].mxu0 }
  0xf9   :  { %v1758_v39 = vadd.f32 %v1757_v37, %v1756_v34  ;;  %v1759_v41 = vpop.f32.mrb[2].mxu1  ;;  %v1738_v42 = vpop.f32.mrb[3].mxu0 }
  0xfa   :  { %v1760_v43 = vpop.f32.mrb[3].mxu1  ;;  %v1151_v44 = vadd.f32 %v1736_v38, %v1564_v35 }
  0xfc   :  { %v1191_v45 = vadd.f32 %v1758_v39, %v1151_v44 }
 0x116   :  { %v1778_v46 = vpop.f32.mrb[4].mxu0 }
 0x117   :  { %v1800_v47 = vpop.f32.mrb[4].mxu1  ;;  %v1779_v48 = vpop.f32.mrb[5].mxu0 }
 0x118   :  { %v1801_v49 = vpop.f32.mrb[5].mxu1  ;;  %v1780_v50 = vadd.f32 %v1779_v48, %v1778_v46  ;;  %v1781_v52 = vpop.f32.mrb[6].mxu0 }
 0x119   :  { %v1802_v51 = vadd.f32 %v1801_v49, %v1800_v47  ;;  %v1803_v53 = vpop.f32.mrb[6].mxu1  ;;  %v1782_v54 = vpop.f32.mrb[7].mxu0 }
 0x11a   :  { %v1804_v55 = vpop.f32.mrb[7].mxu1  ;;  %v1231_v56 = vadd.f32 %v1780_v50, %v1191_v45 }
 0x11c   :  { %v1271_v57 = vadd.f32 %v1802_v51, %v1231_v56 }
 0x136   :  { %v1822_v58 = vpop.f32.mrb[8].mxu0 }
 0x137   :  { %v1844_v59 = vpop.f32.mrb[8].mxu1  ;;  %v1823_v60 = vpop.f32.mrb[9].mxu0 }
 0x138   :  { %v1824_v61 = vadd.f32 %v1823_v60, %v1822_v58  ;;  %v1845_v62 = vpop.f32.mrb[9].mxu1  ;;  %v1825_v63 = vpop.f32.mrb[10].mxu0 }
 0x139   :  { %v1846_v0 = vadd.f32 %v1845_v62, %v1844_v59  ;;  %v1847_v1 = vpop.f32.mrb[10].mxu1  ;;  %v1826_v2 = vpop.f32.mrb[11].mxu0 }
 0x13a   :  { %v1311_v3 = vadd.f32 %v1824_v61, %v1271_v57  ;;  %v1848_v4 = vpop.f32.mrb[11].mxu1 }
 0x13c   :  { %v1351_v5 = vadd.f32 %v1846_v0, %v1311_v3 }
 0x156   :  { %v1866_v6 = vpop.f32.mrb[12].mxu0 }
 0x157   :  { %v1888_v7 = vpop.f32.mrb[12].mxu1  ;;  %v1867_v8 = vpop.f32.mrb[13].mxu0 }
 0x158   :  { %v1868_v9 = vadd.f32 %v1867_v8, %v1866_v6  ;;  %v1889_v10 = vpop.f32.mrb[13].mxu1  ;;  %v1869_v11 = vpop.f32.mrb[14].mxu0 }
 0x159   :  { %v1890_v12 = vadd.f32 %v1889_v10, %v1888_v7  ;;  %v1891_v13 = vpop.f32.mrb[14].mxu1  ;;  %v1870_v14 = vpop.f32.mrb[15].mxu0 }
 0x15a   :  { %v1391_v15 = vadd.f32 %v1868_v9, %v1351_v5  ;;  %v1892_v16 = vpop.f32.mrb[15].mxu1 }
 0x15c   :  { %v1431_v17 = vadd.f32 %v1890_v12, %v1391_v15 }
 0x15e   :  { %v1436_v18 = vmax.f32 %v1431_v17, 0.0 }
 0x160   :  { %v1437_v19 = vpack.c.bf16 %v1436_v18, %v1436_v18 }
 0x162   :  { %1920 = vmatmul.mubr.bf16.vlgmr.msra.gmra.mrb[16].mxu0 %v1437_v19 }
 0x235   :  { %v1543_v21 = vpop.f32.mrb[16].mxu0 }
 0x236   :  { %v1544_v22 = vadd.f32 %v1709_v20, %v1543_v21  ;;  %v1921_v23 = vpop.f32.mrb[17].mxu0 }
 0x237   :  { %v1546_v24 = vpop.f32.mrb[18].mxu0 }
 0x238   :  { %1549 = vmax.xlane.f32.xlu0 %v1544_v22  ;;  %v1922_v25 = vpop.f32.mrb[19].mxu0 }
 0x2c5   :  { %v1550_v26 = vpop.xlane.xlu0 %1549 }
 0x2c6   :  { %v1551_v27 = vsub.f32 %v1544_v22, %v1550_v26 }
 0x2c8   :  { %v1552_v28 = vmul.f32 1.442695, %v1551_v27 }
 0x2ca   :  { %2077 = vpow2.f32 %v1552_v28 }
 0x2d4   :  { %v2078_v29 = vpop.eup %2077 }
 0x2d5   :  { %1554 = vadd.xlane.f32.xlu0 %v2078_v29 }
 0x362   :  { %v1555_v30 = vpop.xlane.xlu0 %1554 }
 0x363   :  { %2079 = vlog2.f32 %v1555_v30 }
 0x36d   :  { %v2080_v31 = vpop.eup %2079 }
 0x36e   :  { %v1557_v32 = vmul.f32 0.6931472, %v2080_v31 }
 0x370   :  { %v1558_v33 = vsub.f32 %v1551_v27, %v1557_v32 }
 0x372   :  { %1559 = vst [vmem:[%s2559_s5] sm:$0xff] %v1558_v33 }

</bundles_post_ra>
